<compile_context>
chip_gen: v6e
topology: v6e:2x2x1
jax: 0.10.0
libtpu: 0.0.40
codegen_flags: <defaults>
</compile_context>

<pallas_src>
import functools

import jax
import jax.numpy as jnp
from jax.experimental import pallas as pl
from jax.experimental.pallas import tpu as pltpu


# Row indices into the packed scale / shift / bias vector slab.
_ROW_FP_S1, _ROW_FP_T1 = 0, 1
_ROW_FP_S2, _ROW_FP_T2 = 2, 3
_ROW_G_S1, _ROW_G_T1 = 4, 5
_ROW_G_S2, _ROW_G_T2 = 6, 7
_ROW_ATT_B1, _ROW_ATT_W2 = 8, 9
_ROW_KG_S1, _ROW_KG_T1 = 10, 11
_ROW_KG_S2, _ROW_KG_T2 = 12, 13
_ROW_KG_S3, _ROW_KG_T3 = 14, 15
_ROW_L2_B = 16
_NUM_VEC_ROWS = 17


# ------------------------------ fused kernel --------------------------------

def _fused_forward_kernel(
    fp_ref, molx_ref, moladj_ref, pool_ref, gene_ref, a3_ref, vec_ref,
    fpw1_ref, fpw2_ref, gw1_ref, gw2_ref, aw1_ref,
    r1w_hbm, r1root_ref, r2w_hbm, r2root_ref, l1w_ref, l2w_ref,
    out_ref, beta_ref,
    r1w_buf, r2w_buf, dma_sem):
  """Entire MolFPKG forward; all intermediates live in VMEM/vregs."""
  f32 = jnp.float32
  bf16 = jnp.bfloat16

  def bdot(a, b):
    # bf16 MXU inputs, f32 accumulation.
    return jnp.dot(a.astype(bf16), b.astype(bf16), preferred_element_type=f32)

  num_mols = fp_ref.shape[0]
  num_rel = a3_ref.shape[0]

  # Kick off DMA of the two big relation-weight stacks now; they are only
  # needed by the RGCN layers, so the copies hide under the FP-MLP /
  # molecular-GCN / attention phases below.
  r1_copy = pltpu.make_async_copy(r1w_hbm, r1w_buf, dma_sem.at[0])
  r2_copy = pltpu.make_async_copy(r2w_hbm, r2w_buf, dma_sem.at[1])
  r1_copy.start()
  r2_copy.start()

  def row(i):
    return vec_ref[i:i + 1, :]                       # (1, 128) f32

  # ---- fingerprint MLP branch: (Linear -> BN -> ReLU) x2, dropout=id -------
  fp = jnp.maximum(bdot(fp_ref[...], fpw1_ref[...]) * row(_ROW_FP_S1)
                   + row(_ROW_FP_T1), 0.0)
  fp = jnp.maximum(bdot(fp, fpw2_ref[...]) * row(_ROW_FP_S2)
                   + row(_ROW_FP_T2), 0.0)

  # ---- molecular GCN branch: (GCNConv -> BN -> ReLU) x2, mean pool ---------
  adj = moladj_ref[...]
  h = bdot(adj, bdot(molx_ref[...], gw1_ref[...]))
  h = jnp.maximum(h * row(_ROW_G_S1) + row(_ROW_G_T1), 0.0)
  h = bdot(adj, bdot(h, gw2_ref[...]))
  h = jnp.maximum(h * row(_ROW_G_S2) + row(_ROW_G_T2), 0.0)
  graph_out = bdot(pool_ref[...], h)                      # (M, D) f32

  # ---- attention over the pair [graph_out, fp] (torch stack dim=1, size 2) -
  z = jnp.concatenate([graph_out, fp], axis=0)            # (2M, D)
  hatt = jnp.tanh(bdot(z, aw1_ref[...]) + row(_ROW_ATT_B1))      # (2M, 128)
  s = jnp.sum(hatt * row(_ROW_ATT_W2), axis=-1, keepdims=True)   # (2M, 1)
  s0 = s[:num_mols]
  s1 = s[num_mols:]
  mx = jnp.maximum(s0, s1)
  e0 = jnp.exp(s0 - mx)
  e1 = jnp.exp(s1 - mx)
  inv = pl.reciprocal(e0 + e1, approx=True)
  b0 = e0 * inv
  b1 = e1 * inv
  res = b0 * graph_out + b1 * fp                          # (M, D)

  # Lane-dense beta output: (M, 128) padded slab, cols 0/1 hold the weights.
  col = jax.lax.broadcasted_iota(jnp.int32, (num_mols, beta_ref.shape[1]), 1)
  beta_ref[...] = jnp.where(
      col == 0, b0, jnp.where(col == 1, b1, 0.0)).astype(beta_ref.dtype)

  # ---- knowledge-graph node features (res rows followed by gene_emb) -------
  x = jnp.concatenate([res, gene_ref[...]], axis=0)       # (Nk, D) f32

  def rgcn(x, w3_buf, wroot_ref, s_row, t_row):
    # out = X @ W_root + sum_r A_r @ (X @ W_r); per-relation matmuls read the
    # 3-D weight / adjacency refs at static indices (no concat / relayout).
    y = bdot(x, wroot_ref[...])
    for r in range(num_rel):
      y = y + bdot(a3_ref[r], bdot(x, w3_buf[r]))
    return jnp.maximum(y * s_row + t_row, 0.0)

  r1_copy.wait()
  x = rgcn(x, r1w_buf, r1root_ref, row(_ROW_KG_S1), row(_ROW_KG_T1))
  r2_copy.wait()
  x = rgcn(x, r2w_buf, r2root_ref, row(_ROW_KG_S2), row(_ROW_KG_T2))

  # ---- head: Linear -> BN -> ReLU, Linear (128-lane padded) -> log_softmax -
  x = jnp.maximum(bdot(x, l1w_ref[...]) * row(_ROW_KG_S3)
                  + row(_ROW_KG_T3), 0.0)
  logits = bdot(x, l2w_ref[...]) + row(_ROW_L2_B)         # (Nk, 128) padded
  mxl = jnp.max(logits, axis=-1, keepdims=True)
  zl = logits - mxl
  lse = jnp.log(jnp.sum(jnp.exp(zl), axis=-1, keepdims=True))
  out_ref[...] = (zl - lse).astype(out_ref.dtype)


def _full_spec(shape):
  nd = len(shape)
  return pl.BlockSpec(shape, lambda i: (0,) * nd)


def mol_fpkg_forward(pp, fp_data, mol_x, mol_adj, pool_mat, kg_adj_rel,
                     *, num_classes):
  """Single fused pallas_call for the whole forward pass (inference mode)."""
  num_mols = fp_data.shape[0]
  n_kg = num_mols + pp['gene_emb'].shape[0]
  pad_lanes = pp['lin2_w_pad'].shape[1]
  bf16 = jnp.bfloat16

  # (array, use_manual_dma)
  tagged = [
      (fp_data.astype(bf16), False),
      (mol_x.astype(bf16), False),
      (mol_adj.astype(bf16), False),
      (pool_mat.astype(bf16), False),
      (pp['gene_emb'], False),
      (kg_adj_rel.astype(bf16), False),
      (pp['vec_slab'], False),
      (pp['fp_w1'], False), (pp['fp_w2'], False),
      (pp['g_w1'], False), (pp['g_w2'], False),
      (pp['att_w1'], False),
      (pp['r1_w3'], True), (pp['r1_wroot'], False),
      (pp['r2_w3'], True), (pp['r2_wroot'], False),
      (pp['lin1_w_pad'], False), (pp['lin2_w_pad'], False),
  ]
  inputs = [a for a, _ in tagged]
  in_specs = [pl.BlockSpec(memory_space=pl.ANY) if manual
              else _full_spec(a.shape) for a, manual in tagged]

  out_pad, beta_pad = pl.pallas_call(
      _fused_forward_kernel,
      out_shape=(jax.ShapeDtypeStruct((n_kg, pad_lanes), jnp.float32),
                 jax.ShapeDtypeStruct((num_mols, pad_lanes), jnp.float32)),
      grid=(1,),
      in_specs=in_specs,
      out_specs=(_full_spec((n_kg, pad_lanes)),
                 _full_spec((num_mols, pad_lanes))),
      scratch_shapes=[
          pltpu.VMEM(pp['r1_w3'].shape, pp['r1_w3'].dtype),
          pltpu.VMEM(pp['r2_w3'].shape, pp['r2_w3'].dtype),
          pltpu.SemaphoreType.DMA((2,)),
      ],
      compiler_params=pltpu.CompilerParams(
          dimension_semantics=("arbitrary",),
          vmem_limit_bytes=32 * 1024 * 1024),
  )(*inputs)

  output = out_pad[:, :num_classes]
  att = beta_pad[:, :2, None]        # (num_mols, 2, 1) == torch softmax(dim=1)
  return output, att


# --------------------------- parameters / glue -------------------------------

def _dense(key, din, dout):
  kw, kb = jax.random.split(key)
  w = jax.random.normal(kw, (din, dout), jnp.float32) / jnp.sqrt(float(din))
  b = 0.01 * jax.random.normal(kb, (dout,), jnp.float32)
  return w, b


def _bn(key, d):
  k1, k2, k3, k4 = jax.random.split(key, 4)
  return dict(gamma=1.0 + 0.1 * jax.random.normal(k1, (d,), jnp.float32),
              beta=0.1 * jax.random.normal(k2, (d,), jnp.float32),
              mean=0.1 * jax.random.normal(k3, (d,), jnp.float32),
              var=jnp.abs(jax.random.normal(k4, (d,), jnp.float32)) + 0.5)


def bn_fold(bias, bn, eps=1e-5):
  """Fold (x + bias) -> BatchNorm(eval) into per-feature scale/shift."""
  scale = bn['gamma'] / jnp.sqrt(bn['var'] + eps)
  shift = bn['beta'] - bn['mean'] * scale + bias * scale
  return scale, shift


def init_params(key, cfg):
  keys = iter(jax.random.split(key, 32))
  p = {}
  p['fp_lin1_w'], p['fp_lin1_b'] = _dense(next(keys), cfg['mlp_input_dim'],
                                          cfg['mlp_hidden_dim'])
  p['fp_bn1'] = _bn(next(keys), cfg['mlp_hidden_dim'])
  p['fp_lin2_w'], p['fp_lin2_b'] = _dense(next(keys), cfg['mlp_hidden_dim'],
                                          cfg['mlp_output_dim'])
  p['fp_bn2'] = _bn(next(keys), cfg['mlp_output_dim'])
  p['gconv1_w'], p['gconv1_b'] = _dense(next(keys), cfg['gcn_input_dim'],
                                        cfg['gcn_hidden_dim'])
  p['g_bn1'] = _bn(next(keys), cfg['gcn_hidden_dim'])
  p['gconv2_w'], p['gconv2_b'] = _dense(next(keys), cfg['gcn_hidden_dim'],
                                        cfg['gcn_output_dim'])
  p['g_bn2'] = _bn(next(keys), cfg['gcn_output_dim'])
  # Attention: Linear(gcn_output_dim, 128) -> tanh -> Linear(128, 1, no bias)
  p['att_w1'], p['att_b1'] = _dense(next(keys), cfg['gcn_output_dim'], 128)
  p['att_w2'], _ = _dense(next(keys), 128, 1)
  p['gene_emb'] = jax.random.normal(
      next(keys), (cfg['num_nodes'], cfg['gcn_output_dim']), jnp.float32)
  num_rel = 8
  p['rgcn1_wr'] = jax.random.normal(
      next(keys), (num_rel, cfg['gcn_output_dim'], cfg['dim1']),
      jnp.float32) / jnp.sqrt(float(cfg['gcn_output_dim']))
  p['rgcn1_wroot'], p['rgcn1_b'] = _dense(next(keys), cfg['gcn_output_dim'],
                                          cfg['dim1'])
  p['kg_bn1'] = _bn(next(keys), cfg['dim1'])
  p['rgcn2_wr'] = jax.random.normal(
      next(keys), (num_rel, cfg['dim1'], cfg['dim2']),
      jnp.float32) / jnp.sqrt(float(cfg['dim1']))
  p['rgcn2_wroot'], p['rgcn2_b'] = _dense(next(keys), cfg['dim1'], cfg['dim2'])
  p['kg_bn2'] = _bn(next(keys), cfg['dim2'])
  p['lin1_w'], p['lin1_b'] = _dense(next(keys), cfg['dim2'], cfg['dim3'])
  p['kg_bn3'] = _bn(next(keys), cfg['dim3'])
  p['lin2_w'], p['lin2_b'] = _dense(next(keys), cfg['dim3'],
                                    cfg['num_classes'])
  return p


def prepare_params(p, cfg, pad_lanes=128):
  """One-time BN folding / padding / bf16 casting of kernel parameters."""
  f32, bf16 = jnp.float32, jnp.bfloat16
  widths = {cfg['mlp_hidden_dim'], cfg['mlp_output_dim'],
            cfg['gcn_hidden_dim'], cfg['gcn_output_dim'],
            cfg['dim1'], cfg['dim2']}
  assert widths == {pad_lanes}, widths
  assert cfg['dim3'] <= pad_lanes and cfg['num_classes'] <= pad_lanes

  def fold(bias, bn):
    s, t = bn_fold(bias, bn)
    return s.astype(f32), t.astype(f32)

  def pad_row(v):
    v = jnp.asarray(v, f32).reshape(-1)
    return jnp.zeros((pad_lanes,), f32).at[:v.shape[0]].set(v)

  pp = {}
  # MXU-feeding weights -> bf16 (f32 accumulation happens in-kernel).
  pp['fp_w1'] = p['fp_lin1_w'].astype(bf16)
  pp['fp_w2'] = p['fp_lin2_w'].astype(bf16)
  pp['g_w1'] = p['gconv1_w'].astype(bf16)
  pp['g_w2'] = p['gconv2_w'].astype(bf16)
  pp['att_w1'] = p['att_w1'].astype(bf16)
  pp['gene_emb'] = p['gene_emb'].astype(f32)
  pp['r1_w3'] = p['rgcn1_wr'].astype(bf16)        # (R, D, dim1)
  pp['r1_wroot'] = p['rgcn1_wroot'].astype(bf16)
  pp['r2_w3'] = p['rgcn2_wr'].astype(bf16)        # (R, dim1, dim2)
  pp['r2_wroot'] = p['rgcn2_wroot'].astype(bf16)

  dim2, dim3 = p['lin1_w'].shape
  nc = cfg['num_classes']
  pp['lin1_w_pad'] = (jnp.zeros((dim2, pad_lanes), f32)
                      .at[:, :dim3].set(p['lin1_w'])).astype(bf16)
  pp['lin2_w_pad'] = (jnp.zeros((pad_lanes, pad_lanes), f32)
                      .at[:dim3, :nc].set(p['lin2_w'])).astype(bf16)

  # Packed scale / shift / bias slab (f32): one DMA instead of ~17 tiny ones.
  rows = [None] * _NUM_VEC_ROWS
  rows[_ROW_FP_S1], rows[_ROW_FP_T1] = fold(p['fp_lin1_b'], p['fp_bn1'])
  rows[_ROW_FP_S2], rows[_ROW_FP_T2] = fold(p['fp_lin2_b'], p['fp_bn2'])
  rows[_ROW_G_S1], rows[_ROW_G_T1] = fold(p['gconv1_b'], p['g_bn1'])
  rows[_ROW_G_S2], rows[_ROW_G_T2] = fold(p['gconv2_b'], p['g_bn2'])
  rows[_ROW_ATT_B1] = p['att_b1']
  rows[_ROW_ATT_W2] = p['att_w2'][:, 0]
  rows[_ROW_KG_S1], rows[_ROW_KG_T1] = fold(p['rgcn1_b'], p['kg_bn1'])
  rows[_ROW_KG_S2], rows[_ROW_KG_T2] = fold(p['rgcn2_b'], p['kg_bn2'])
  rows[_ROW_KG_S3], rows[_ROW_KG_T3] = fold(p['lin1_b'], p['kg_bn3'])
  rows[_ROW_L2_B] = jnp.full((pad_lanes,), -1e30, f32).at[:nc].set(p['lin2_b'])
  slab = jnp.stack([pad_row(r) for r in rows], axis=0)
  n_pad_rows = (-slab.shape[0]) % 8
  if n_pad_rows:
    slab = jnp.concatenate([slab, jnp.zeros((n_pad_rows, pad_lanes), f32)],
                           axis=0)
  pp['vec_slab'] = slab
  return pp


def gcn_norm_adj(edge_index, n):
  """GCNConv normalization: D^-1/2 (A_sym + I) D^-1/2 (dense)."""
  src, dst = edge_index
  a = jnp.zeros((n, n), jnp.float32).at[dst, src].set(1.0)
  a = jnp.maximum(a, a.T) + jnp.eye(n, dtype=jnp.float32)
  deg = a.sum(axis=1)
  dinv = 1.0 / jnp.sqrt(jnp.maximum(deg, 1e-12))
  return a * dinv[:, None] * dinv[None, :]


def mean_pool_matrix(batch, num_graphs):
  """global_mean_pool as a dense (num_graphs, num_nodes) matrix."""
  onehot = (batch[None, :] == jnp.arange(num_graphs)[:, None]).astype(jnp.float32)
  counts = jnp.maximum(onehot.sum(axis=1, keepdims=True), 1.0)
  return onehot / counts


def rgcn_rel_adj(edge_index, edge_type, num_rel, n):
  """Per-relation mean-normalized adjacency (RGCNConv aggr='mean')."""
  src, dst = edge_index
  a = jnp.zeros((num_rel, n, n), jnp.float32).at[edge_type, dst, src].add(1.0)
  deg = a.sum(axis=2, keepdims=True)
  return a / jnp.maximum(deg, 1.0)


# ------------------------------ pure-JAX reference ---------------------------

def reference_forward(p, fp_data, mol_x, mol_adj, pool_mat, kg_adj_rel):
  """Pure-JAX reference of the original torch formulation.  Matmuls use the
  same bf16-operand / f32-accumulate policy as the fused kernel so the
  comparison isolates wiring errors from the (deliberate) precision policy."""
  f32, bf16 = jnp.float32, jnp.bfloat16
  mm = lambda a, b: jnp.dot(a.astype(bf16), b.astype(bf16),
                            preferred_element_type=f32)
  num_rel = kg_adj_rel.shape[0]

  s, t = bn_fold(p['fp_lin1_b'], p['fp_bn1'])
  fp = jax.nn.relu(mm(fp_data, p['fp_lin1_w']) * s + t)
  s, t = bn_fold(p['fp_lin2_b'], p['fp_bn2'])
  fp = jax.nn.relu(mm(fp, p['fp_lin2_w']) * s + t)

  s, t = bn_fold(p['gconv1_b'], p['g_bn1'])
  h = jax.nn.relu(mm(mol_adj, mm(mol_x, p['gconv1_w'])) * s + t)
  s, t = bn_fold(p['gconv2_b'], p['g_bn2'])
  h = jax.nn.relu(mm(mol_adj, mm(h, p['gconv2_w'])) * s + t)
  g = mm(pool_mat, h)

  z = jnp.stack([g, fp], axis=1)                                 # (M, 2, D)
  w = jnp.tanh(mm(z, p['att_w1']) + p['att_b1']) @ p['att_w2']   # (M, 2, 1)
  beta = jax.nn.softmax(w, axis=1)
  res = jnp.sum(beta * z, axis=1)

  x = jnp.concatenate([res, p['gene_emb']], axis=0)
  for l in (1, 2):
    s, t = bn_fold(p[f'rgcn{l}_b'], p[f'kg_bn{l}'])
    msg = 0.0
    for r in range(num_rel):
      msg = msg + mm(kg_adj_rel[r], mm(x, p[f'rgcn{l}_wr'][r]))
    x = jax.nn.relu((mm(x, p[f'rgcn{l}_wroot']) + msg) * s + t)

  s, t = bn_fold(p['lin1_b'], p['kg_bn3'])
  x = jax.nn.relu(mm(x, p['lin1_w']) * s + t)
  logits = mm(x, p['lin2_w']) + p['lin2_b']
  return jax.nn.log_softmax(logits, axis=-1), beta


# --------------------------------- main --------------------------------------

if __name__ == "__main__":
  cfg = dict(mlp_input_dim=64, mlp_hidden_dim=128, mlp_output_dim=128,
             gcn_input_dim=32, gcn_hidden_dim=128, gcn_output_dim=128,
             dim1=128, dim2=128, dim3=64, num_nodes=24, num_classes=2,
             dropout=0.2)
  num_mols = 8
  atoms_per_mol = 4
  n_atoms = num_mols * atoms_per_mol          # 32 atoms in the batched graph
  n_kg = num_mols + cfg['num_nodes']          # 32 KG nodes
  num_rel = 8
  n_kg_edges = 96

  key = jax.random.PRNGKey(0)
  kp, kfp, kmx, ke1, ke2, ket = jax.random.split(key, 6)
  params = init_params(kp, cfg)
  prepared = prepare_params(params, cfg)

  fp_data = jax.random.normal(kfp, (num_mols, cfg['mlp_input_dim']), jnp.float32)
  mol_x = jax.random.normal(kmx, (n_atoms, cfg['gcn_input_dim']), jnp.float32)

  # Batched molecular graph: ring edges within each molecule + batch vector.
  atoms = jnp.arange(n_atoms)
  mol_of = atoms // atoms_per_mol
  ring_dst = mol_of * atoms_per_mol + (atoms + 1) % atoms_per_mol
  mol_edge_index = jnp.stack([atoms, ring_dst])
  mol_adj = gcn_norm_adj(mol_edge_index, n_atoms)
  pool_mat = mean_pool_matrix(mol_of, num_mols)

  # Knowledge-graph edges/types -> dense per-relation adjacency (glue).
  kg_src = jax.random.randint(ke1, (n_kg_edges,), 0, n_kg)
  kg_dst = jax.random.randint(ke2, (n_kg_edges,), 0, n_kg)
  kg_edge_index = jnp.stack([kg_src, kg_dst])
  kg_edge_type = jax.random.randint(ket, (n_kg_edges,), 0, num_rel)
  kg_adj_rel = rgcn_rel_adj(kg_edge_index, kg_edge_type, num_rel, n_kg)

  fwd = jax.jit(functools.partial(mol_fpkg_forward,
                                  num_classes=cfg['num_classes']))
  output, att = fwd(prepared, fp_data, mol_x, mol_adj, pool_mat, kg_adj_rel)
  jax.block_until_ready((output, att))

  assert output.shape == (n_kg, cfg['num_classes'])
  assert att.shape == (num_mols, 2, 1)
  assert bool(jnp.all(jnp.isfinite(output)))

  # Correctness check against a pure-JAX reference of the original formulation.
  with jax.default_matmul_precision("highest"):
    ref_out, ref_beta = reference_forward(params, fp_data, mol_x, mol_adj,
                                          pool_mat, kg_adj_rel)
  err_out = float(jnp.max(jnp.abs(output - ref_out)))
  err_att = float(jnp.max(jnp.abs(att - ref_beta)))
  assert err_out < 5e-2 and err_att < 2e-2, (err_out, err_att)

  print("KERNEL_OK")
</pallas_src>

<mosaic_0001>
module attributes {stable_mosaic.version = 11 : i64} {
  func.func @_fused_forward_kernel(%arg0: i32, %arg1: memref<8x64xbf16, #tpu.memory_space<vmem>>, %arg2: memref<32x32xbf16, #tpu.memory_space<vmem>>, %arg3: memref<32x32xbf16, #tpu.memory_space<vmem>>, %arg4: memref<8x32xbf16, #tpu.memory_space<vmem>>, %arg5: memref<24x128xf32, #tpu.memory_space<vmem>>, %arg6: memref<8x32x32xbf16, #tpu.memory_space<vmem>>, %arg7: memref<24x128xf32, #tpu.memory_space<vmem>>, %arg8: memref<64x128xbf16, #tpu.memory_space<vmem>>, %arg9: memref<128x128xbf16, #tpu.memory_space<vmem>>, %arg10: memref<32x128xbf16, #tpu.memory_space<vmem>>, %arg11: memref<128x128xbf16, #tpu.memory_space<vmem>>, %arg12: memref<128x128xbf16, #tpu.memory_space<vmem>>, %arg13: memref<8x128x128xbf16, #tpu.memory_space<any>>, %arg14: memref<128x128xbf16, #tpu.memory_space<vmem>>, %arg15: memref<8x128x128xbf16, #tpu.memory_space<any>>, %arg16: memref<128x128xbf16, #tpu.memory_space<vmem>>, %arg17: memref<128x128xbf16, #tpu.memory_space<vmem>>, %arg18: memref<128x128xbf16, #tpu.memory_space<vmem>>, %arg19: memref<32x128xf32, #tpu.memory_space<vmem>>, %arg20: memref<8x128xf32, #tpu.memory_space<vmem>>, %arg21: memref<8x128x128xbf16, #tpu.memory_space<vmem>>, %arg22: memref<8x128x128xbf16, #tpu.memory_space<vmem>>, %arg23: memref<2x!tpu.dma_semaphore, #tpu.memory_space<semaphore_mem>>) attributes {dimension_semantics = [#tpu.dimension_semantics<arbitrary>], iteration_bounds = array<i64: 1>, scalar_prefetch = 0 : i64, scratch_operands = 3 : i64, tpu.core_type = #tpu.core_type<tc>, window_params = [{pipeline_mode = #tpu.pipeline_mode<synchronous>, transform_indices = @transform_0, window_bounds = array<i64: 8, 64>}, {pipeline_mode = #tpu.pipeline_mode<synchronous>, transform_indices = @transform_1, window_bounds = array<i64: 32, 32>}, {pipeline_mode = #tpu.pipeline_mode<synchronous>, transform_indices = @transform_2, window_bounds = array<i64: 32, 32>}, {pipeline_mode = #tpu.pipeline_mode<synchronous>, transform_indices = @transform_3, window_bounds = array<i64: 8, 32>}, {pipeline_mode = #tpu.pipeline_mode<synchronous>, transform_indices = @transform_4, window_bounds = array<i64: 24, 128>}, {pipeline_mode = #tpu.pipeline_mode<synchronous>, transform_indices = @transform_5, window_bounds = array<i64: 8, 32, 32>}, {pipeline_mode = #tpu.pipeline_mode<synchronous>, transform_indices = @transform_6, window_bounds = array<i64: 24, 128>}, {pipeline_mode = #tpu.pipeline_mode<synchronous>, transform_indices = @transform_7, window_bounds = array<i64: 64, 128>}, {pipeline_mode = #tpu.pipeline_mode<synchronous>, transform_indices = @transform_8, window_bounds = array<i64: 128, 128>}, {pipeline_mode = #tpu.pipeline_mode<synchronous>, transform_indices = @transform_9, window_bounds = array<i64: 32, 128>}, {pipeline_mode = #tpu.pipeline_mode<synchronous>, transform_indices = @transform_10, window_bounds = array<i64: 128, 128>}, {pipeline_mode = #tpu.pipeline_mode<synchronous>, transform_indices = @transform_11, window_bounds = array<i64: 128, 128>}, {}, {pipeline_mode = #tpu.pipeline_mode<synchronous>, transform_indices = @transform_13, window_bounds = array<i64: 128, 128>}, {}, {pipeline_mode = #tpu.pipeline_mode<synchronous>, transform_indices = @transform_15, window_bounds = array<i64: 128, 128>}, {pipeline_mode = #tpu.pipeline_mode<synchronous>, transform_indices = @transform_16, window_bounds = array<i64: 128, 128>}, {pipeline_mode = #tpu.pipeline_mode<synchronous>, transform_indices = @transform_17, window_bounds = array<i64: 128, 128>}, {pipeline_mode = #tpu.pipeline_mode<synchronous>, transform_indices = @transform_18, window_bounds = array<i64: 32, 128>}, {pipeline_mode = #tpu.pipeline_mode<synchronous>, transform_indices = @transform_19, window_bounds = array<i64: 8, 128>}]} {
    %c0_i32 = arith.constant 0 : i32
    %0 = tpu.memref_slice %arg23[%c0_i32] : memref<2x!tpu.dma_semaphore, #tpu.memory_space<semaphore_mem>> -> memref<1x!tpu.dma_semaphore, #tpu.memory_space<semaphore_mem>>
    %1 = tpu.memref_squeeze %0 : memref<1x!tpu.dma_semaphore, #tpu.memory_space<semaphore_mem>> -> memref<!tpu.dma_semaphore, #tpu.memory_space<semaphore_mem>>
    tpu.enqueue_dma source(%arg13 : memref<8x128x128xbf16, #tpu.memory_space<any>>) target(%arg21 : memref<8x128x128xbf16, #tpu.memory_space<vmem>>) target_semaphore(%1 : memref<!tpu.dma_semaphore, #tpu.memory_space<semaphore_mem>>)
    %c1_i32 = arith.constant 1 : i32
    %2 = tpu.memref_slice %arg23[%c1_i32] : memref<2x!tpu.dma_semaphore, #tpu.memory_space<semaphore_mem>> -> memref<1x!tpu.dma_semaphore, #tpu.memory_space<semaphore_mem>>
    %3 = tpu.memref_squeeze %2 : memref<1x!tpu.dma_semaphore, #tpu.memory_space<semaphore_mem>> -> memref<!tpu.dma_semaphore, #tpu.memory_space<semaphore_mem>>
    tpu.enqueue_dma source(%arg15 : memref<8x128x128xbf16, #tpu.memory_space<any>>) target(%arg22 : memref<8x128x128xbf16, #tpu.memory_space<vmem>>) target_semaphore(%3 : memref<!tpu.dma_semaphore, #tpu.memory_space<semaphore_mem>>)
    %c0 = arith.constant 0 : index
    %c0_0 = arith.constant 0 : index
    %4 = vector.load %arg1[%c0, %c0_0] : memref<8x64xbf16, #tpu.memory_space<vmem>>, vector<8x64xbf16>
    %c0_1 = arith.constant 0 : index
    %c0_2 = arith.constant 0 : index
    %5 = vector.load %arg8[%c0_1, %c0_2] : memref<64x128xbf16, #tpu.memory_space<vmem>>, vector<64x128xbf16>
    %cst = arith.constant dense<0.000000e+00> : vector<8x128xf32>
    %6 = tpu.matmul %4, %5, %cst {dimension_numbers = #tpu.dot_dimension_numbers<[1], [0], [0], [1], [0, 0, 1, 1], [], []>} : vector<8x64xbf16>, vector<64x128xbf16>, vector<8x128xf32> -> vector<8x128xf32>
    %c0_3 = arith.constant 0 : index
    %c0_4 = arith.constant 0 : index
    %7 = vector.load %arg7[%c0_3, %c0_4] : memref<24x128xf32, #tpu.memory_space<vmem>>, vector<1x128xf32>
    %8 = vector.broadcast %7 : vector<1x128xf32> to vector<8x128xf32>
    %9 = arith.mulf %6, %8 : vector<8x128xf32>
    %c1 = arith.constant 1 : index
    %c0_5 = arith.constant 0 : index
    %10 = vector.load %arg7[%c1, %c0_5] : memref<24x128xf32, #tpu.memory_space<vmem>>, vector<1x128xf32>
    %11 = vector.broadcast %10 : vector<1x128xf32> to vector<8x128xf32>
    %12 = arith.addf %9, %11 : vector<8x128xf32>
    %cst_6 = arith.constant 0.000000e+00 : f32
    %13 = vector.broadcast %cst_6 : f32 to vector<8x128xf32>
    %14 = arith.maximumf %12, %13 : vector<8x128xf32>
    %c0_7 = arith.constant 0 : index
    %c0_8 = arith.constant 0 : index
    %15 = vector.load %arg9[%c0_7, %c0_8] : memref<128x128xbf16, #tpu.memory_space<vmem>>, vector<128x128xbf16>
    %16 = arith.truncf %14 : vector<8x128xf32> to vector<8x128xbf16>
    %cst_9 = arith.constant dense<0.000000e+00> : vector<8x128xf32>
    %17 = tpu.matmul %16, %15, %cst_9 {dimension_numbers = #tpu.dot_dimension_numbers<[1], [0], [0], [1], [0, 0, 1, 1], [], []>} : vector<8x128xbf16>, vector<128x128xbf16>, vector<8x128xf32> -> vector<8x128xf32>
    %c2 = arith.constant 2 : index
    %c0_10 = arith.constant 0 : index
    %18 = vector.load %arg7[%c2, %c0_10] : memref<24x128xf32, #tpu.memory_space<vmem>>, vector<1x128xf32>
    %19 = vector.broadcast %18 : vector<1x128xf32> to vector<8x128xf32>
    %20 = arith.mulf %17, %19 : vector<8x128xf32>
    %c3 = arith.constant 3 : index
    %c0_11 = arith.constant 0 : index
    %21 = vector.load %arg7[%c3, %c0_11] : memref<24x128xf32, #tpu.memory_space<vmem>>, vector<1x128xf32>
    %22 = vector.broadcast %21 : vector<1x128xf32> to vector<8x128xf32>
    %23 = arith.addf %20, %22 : vector<8x128xf32>
    %cst_12 = arith.constant 0.000000e+00 : f32
    %24 = vector.broadcast %cst_12 : f32 to vector<8x128xf32>
    %25 = arith.maximumf %23, %24 : vector<8x128xf32>
    %c0_13 = arith.constant 0 : index
    %c0_14 = arith.constant 0 : index
    %26 = vector.load %arg3[%c0_13, %c0_14] : memref<32x32xbf16, #tpu.memory_space<vmem>>, vector<32x32xbf16>
    %c0_15 = arith.constant 0 : index
    %c0_16 = arith.constant 0 : index
    %27 = vector.load %arg2[%c0_15, %c0_16] : memref<32x32xbf16, #tpu.memory_space<vmem>>, vector<32x32xbf16>
    %c0_17 = arith.constant 0 : index
    %c0_18 = arith.constant 0 : index
    %28 = vector.load %arg10[%c0_17, %c0_18] : memref<32x128xbf16, #tpu.memory_space<vmem>>, vector<32x128xbf16>
    %cst_19 = arith.constant dense<0.000000e+00> : vector<32x128xf32>
    %29 = tpu.matmul %27, %28, %cst_19 {dimension_numbers = #tpu.dot_dimension_numbers<[1], [0], [0], [1], [0, 0, 1, 1], [], []>} : vector<32x32xbf16>, vector<32x128xbf16>, vector<32x128xf32> -> vector<32x128xf32>
    %30 = arith.truncf %29 : vector<32x128xf32> to vector<32x128xbf16>
    %cst_20 = arith.constant dense<0.000000e+00> : vector<32x128xf32>
    %31 = tpu.matmul %26, %30, %cst_20 {dimension_numbers = #tpu.dot_dimension_numbers<[1], [0], [0], [1], [0, 0, 1, 1], [], []>} : vector<32x32xbf16>, vector<32x128xbf16>, vector<32x128xf32> -> vector<32x128xf32>
    %c4 = arith.constant 4 : index
    %c0_21 = arith.constant 0 : index
    %32 = vector.load %arg7[%c4, %c0_21] : memref<24x128xf32, #tpu.memory_space<vmem>>, vector<1x128xf32>
    %33 = vector.broadcast %32 : vector<1x128xf32> to vector<32x128xf32>
    %34 = arith.mulf %31, %33 : vector<32x128xf32>
    %c5 = arith.constant 5 : index
    %c0_22 = arith.constant 0 : index
    %35 = vector.load %arg7[%c5, %c0_22] : memref<24x128xf32, #tpu.memory_space<vmem>>, vector<1x128xf32>
    %36 = vector.broadcast %35 : vector<1x128xf32> to vector<32x128xf32>
    %37 = arith.addf %34, %36 : vector<32x128xf32>
    %cst_23 = arith.constant 0.000000e+00 : f32
    %38 = vector.broadcast %cst_23 : f32 to vector<32x128xf32>
    %39 = arith.maximumf %37, %38 : vector<32x128xf32>
    %c0_24 = arith.constant 0 : index
    %c0_25 = arith.constant 0 : index
    %40 = vector.load %arg11[%c0_24, %c0_25] : memref<128x128xbf16, #tpu.memory_space<vmem>>, vector<128x128xbf16>
    %41 = arith.truncf %39 : vector<32x128xf32> to vector<32x128xbf16>
    %cst_26 = arith.constant dense<0.000000e+00> : vector<32x128xf32>
    %42 = tpu.matmul %41, %40, %cst_26 {dimension_numbers = #tpu.dot_dimension_numbers<[1], [0], [0], [1], [0, 0, 1, 1], [], []>} : vector<32x128xbf16>, vector<128x128xbf16>, vector<32x128xf32> -> vector<32x128xf32>
    %43 = arith.truncf %42 : vector<32x128xf32> to vector<32x128xbf16>
    %cst_27 = arith.constant dense<0.000000e+00> : vector<32x128xf32>
    %44 = tpu.matmul %26, %43, %cst_27 {dimension_numbers = #tpu.dot_dimension_numbers<[1], [0], [0], [1], [0, 0, 1, 1], [], []>} : vector<32x32xbf16>, vector<32x128xbf16>, vector<32x128xf32> -> vector<32x128xf32>
    %c6 = arith.constant 6 : index
    %c0_28 = arith.constant 0 : index
    %45 = vector.load %arg7[%c6, %c0_28] : memref<24x128xf32, #tpu.memory_space<vmem>>, vector<1x128xf32>
    %46 = vector.broadcast %45 : vector<1x128xf32> to vector<32x128xf32>
    %47 = arith.mulf %44, %46 : vector<32x128xf32>
    %c7 = arith.constant 7 : index
    %c0_29 = arith.constant 0 : index
    %48 = vector.load %arg7[%c7, %c0_29] : memref<24x128xf32, #tpu.memory_space<vmem>>, vector<1x128xf32>
    %49 = vector.broadcast %48 : vector<1x128xf32> to vector<32x128xf32>
    %50 = arith.addf %47, %49 : vector<32x128xf32>
    %cst_30 = arith.constant 0.000000e+00 : f32
    %51 = vector.broadcast %cst_30 : f32 to vector<32x128xf32>
    %52 = arith.maximumf %50, %51 : vector<32x128xf32>
    %c0_31 = arith.constant 0 : index
    %c0_32 = arith.constant 0 : index
    %53 = vector.load %arg4[%c0_31, %c0_32] : memref<8x32xbf16, #tpu.memory_space<vmem>>, vector<8x32xbf16>
    %54 = arith.truncf %52 : vector<32x128xf32> to vector<32x128xbf16>
    %cst_33 = arith.constant dense<0.000000e+00> : vector<8x128xf32>
    %55 = tpu.matmul %53, %54, %cst_33 {dimension_numbers = #tpu.dot_dimension_numbers<[1], [0], [0], [1], [0, 0, 1, 1], [], []>} : vector<8x32xbf16>, vector<32x128xbf16>, vector<8x128xf32> -> vector<8x128xf32>
    %56 = tpu.concatenate %55, %25 in 0 : vector<8x128xf32>, vector<8x128xf32> -> vector<16x128xf32>
    %c0_34 = arith.constant 0 : index
    %c0_35 = arith.constant 0 : index
    %57 = vector.load %arg12[%c0_34, %c0_35] : memref<128x128xbf16, #tpu.memory_space<vmem>>, vector<128x128xbf16>
    %58 = arith.truncf %56 : vector<16x128xf32> to vector<16x128xbf16>
    %cst_36 = arith.constant dense<0.000000e+00> : vector<16x128xf32>
    %59 = tpu.matmul %58, %57, %cst_36 {dimension_numbers = #tpu.dot_dimension_numbers<[1], [0], [0], [1], [0, 0, 1, 1], [], []>} : vector<16x128xbf16>, vector<128x128xbf16>, vector<16x128xf32> -> vector<16x128xf32>
    %c8 = arith.constant 8 : index
    %c0_37 = arith.constant 0 : index
    %60 = vector.load %arg7[%c8, %c0_37] : memref<24x128xf32, #tpu.memory_space<vmem>>, vector<1x128xf32>
    %61 = vector.broadcast %60 : vector<1x128xf32> to vector<16x128xf32>
    %62 = arith.addf %59, %61 : vector<16x128xf32>
    %63 = math.tanh %62 : vector<16x128xf32>
    %c9 = arith.constant 9 : index
    %c0_38 = arith.constant 0 : index
    %64 = vector.load %arg7[%c9, %c0_38] : memref<24x128xf32, #tpu.memory_space<vmem>>, vector<1x128xf32>
    %65 = vector.broadcast %64 : vector<1x128xf32> to vector<16x128xf32>
    %66 = arith.mulf %63, %65 : vector<16x128xf32>
    %cst_39 = arith.constant dense<0.000000e+00> : vector<16xf32>
    %67 = vector.multi_reduction <add>, %66, %cst_39 [1] : vector<16x128xf32> to vector<16xf32>
    %68 = vector.shape_cast %67 : vector<16xf32> to vector<16x1xf32>
    %69 = vector.extract_strided_slice %68 {offsets = [0, 0], sizes = [8, 1], strides = [1, 1]} : vector<16x1xf32> to vector<8x1xf32>
    %70 = vector.extract_strided_slice %68 {offsets = [8, 0], sizes = [8, 1], strides = [1, 1]} : vector<16x1xf32> to vector<8x1xf32>
    %71 = arith.maximumf %69, %70 : vector<8x1xf32>
    %72 = arith.subf %69, %71 : vector<8x1xf32>
    %73 = math.exp %72 : vector<8x1xf32>
    %74 = arith.subf %70, %71 : vector<8x1xf32>
    %75 = math.exp %74 : vector<8x1xf32>
    %76 = arith.addf %73, %75 : vector<8x1xf32>
    %77 = tpu.reciprocal %76 {approx = true} : vector<8x1xf32> -> vector<8x1xf32>
    %78 = arith.mulf %73, %77 : vector<8x1xf32>
    %79 = arith.mulf %75, %77 : vector<8x1xf32>
    %80 = vector.broadcast %78 : vector<8x1xf32> to vector<8x128xf32>
    %81 = arith.mulf %80, %55 : vector<8x128xf32>
    %82 = vector.broadcast %79 : vector<8x1xf32> to vector<8x128xf32>
    %83 = arith.mulf %82, %25 : vector<8x128xf32>
    %84 = arith.addf %81, %83 : vector<8x128xf32>
    %85 = tpu.iota {dimensions = array<i32: 1>} : vector<8x128xi32>
    %c0_i32_40 = arith.constant 0 : i32
    %86 = vector.broadcast %c0_i32_40 : i32 to vector<8x128xi32>
    %87 = arith.cmpi eq, %85, %86 : vector<8x128xi32>
    %c1_i32_41 = arith.constant 1 : i32
    %88 = vector.broadcast %c1_i32_41 : i32 to vector<8x128xi32>
    %89 = arith.cmpi eq, %85, %88 : vector<8x128xi32>
    %cst_42 = arith.constant 0.000000e+00 : f32
    %90 = vector.shape_cast %79 : vector<8x1xf32> to vector<8x1xf32>
    %91 = vector.broadcast %90 : vector<8x1xf32> to vector<8x128xf32>
    %92 = vector.broadcast %cst_42 : f32 to vector<8x128xf32>
    %93 = arith.select %89, %91, %92 : vector<8x128xi1>, vector<8x128xf32>
    %94 = vector.shape_cast %78 : vector<8x1xf32> to vector<8x1xf32>
    %95 = vector.broadcast %94 : vector<8x1xf32> to vector<8x128xf32>
    %96 = arith.select %87, %95, %93 : vector<8x128xi1>, vector<8x128xf32>
    %c0_43 = arith.constant 0 : index
    %c0_44 = arith.constant 0 : index
    %97 = vector.load %arg20[%c0_43, %c0_44] : memref<8x128xf32, #tpu.memory_space<vmem>>, vector<8x128xf32>
    tpu.vector_store %arg20[%c0_43, %c0_44], %96 {strides = array<i32>} : memref<8x128xf32, #tpu.memory_space<vmem>>, vector<8x128xf32>,
    %c0_45 = arith.constant 0 : index
    %c0_46 = arith.constant 0 : index
    %98 = vector.load %arg5[%c0_45, %c0_46] : memref<24x128xf32, #tpu.memory_space<vmem>>, vector<24x128xf32>
    %99 = tpu.concatenate %84, %98 in 0 : vector<8x128xf32>, vector<24x128xf32> -> vector<32x128xf32>
    %c0_i32_47 = arith.constant 0 : i32
    %100 = tpu.memref_slice %arg23[%c0_i32_47] : memref<2x!tpu.dma_semaphore, #tpu.memory_space<semaphore_mem>> -> memref<1x!tpu.dma_semaphore, #tpu.memory_space<semaphore_mem>>
    %101 = tpu.memref_squeeze %100 : memref<1x!tpu.dma_semaphore, #tpu.memory_space<semaphore_mem>> -> memref<!tpu.dma_semaphore, #tpu.memory_space<semaphore_mem>>
    tpu.wait_dma2 semaphore(%101 : memref<!tpu.dma_semaphore, #tpu.memory_space<semaphore_mem>>) src(%arg13 : memref<8x128x128xbf16, #tpu.memory_space<any>>) dst(%arg21 : memref<8x128x128xbf16, #tpu.memory_space<vmem>>)
    %c10 = arith.constant 10 : index
    %c0_48 = arith.constant 0 : index
    %102 = vector.load %arg7[%c10, %c0_48] : memref<24x128xf32, #tpu.memory_space<vmem>>, vector<1x128xf32>
    %c11 = arith.constant 11 : index
    %c0_49 = arith.constant 0 : index
    %103 = vector.load %arg7[%c11, %c0_49] : memref<24x128xf32, #tpu.memory_space<vmem>>, vector<1x128xf32>
    %c0_50 = arith.constant 0 : index
    %c0_51 = arith.constant 0 : index
    %104 = vector.load %arg14[%c0_50, %c0_51] : memref<128x128xbf16, #tpu.memory_space<vmem>>, vector<128x128xbf16>
    %105 = arith.truncf %99 : vector<32x128xf32> to vector<32x128xbf16>
    %cst_52 = arith.constant dense<0.000000e+00> : vector<32x128xf32>
    %106 = tpu.matmul %105, %104, %cst_52 {dimension_numbers = #tpu.dot_dimension_numbers<[1], [0], [0], [1], [0, 0, 1, 1], [], []>} : vector<32x128xbf16>, vector<128x128xbf16>, vector<32x128xf32> -> vector<32x128xf32>
    %c0_53 = arith.constant 0 : index
    %c0_54 = arith.constant 0 : index
    %c0_55 = arith.constant 0 : index
    %107 = vector.load %arg6[%c0_53, %c0_54, %c0_55] : memref<8x32x32xbf16, #tpu.memory_space<vmem>>, vector<1x32x32xbf16>
    %108 = vector.shape_cast %107 : vector<1x32x32xbf16> to vector<32x32xbf16>
    %c0_56 = arith.constant 0 : index
    %c0_57 = arith.constant 0 : index
    %c0_58 = arith.constant 0 : index
    %109 = vector.load %arg21[%c0_56, %c0_57, %c0_58] : memref<8x128x128xbf16, #tpu.memory_space<vmem>>, vector<1x128x128xbf16>
    %110 = vector.shape_cast %109 : vector<1x128x128xbf16> to vector<128x128xbf16>
    %111 = arith.truncf %99 : vector<32x128xf32> to vector<32x128xbf16>
    %cst_59 = arith.constant dense<0.000000e+00> : vector<32x128xf32>
    %112 = tpu.matmul %111, %110, %cst_59 {dimension_numbers = #tpu.dot_dimension_numbers<[1], [0], [0], [1], [0, 0, 1, 1], [], []>} : vector<32x128xbf16>, vector<128x128xbf16>, vector<32x128xf32> -> vector<32x128xf32>
    %113 = arith.truncf %112 : vector<32x128xf32> to vector<32x128xbf16>
    %cst_60 = arith.constant dense<0.000000e+00> : vector<32x128xf32>
    %114 = tpu.matmul %108, %113, %cst_60 {dimension_numbers = #tpu.dot_dimension_numbers<[1], [0], [0], [1], [0, 0, 1, 1], [], []>} : vector<32x32xbf16>, vector<32x128xbf16>, vector<32x128xf32> -> vector<32x128xf32>
    %115 = arith.addf %106, %114 : vector<32x128xf32>
    %c1_61 = arith.constant 1 : index
    %c0_62 = arith.constant 0 : index
    %c0_63 = arith.constant 0 : index
    %116 = vector.load %arg6[%c1_61, %c0_62, %c0_63] : memref<8x32x32xbf16, #tpu.memory_space<vmem>>, vector<1x32x32xbf16>
    %117 = vector.shape_cast %116 : vector<1x32x32xbf16> to vector<32x32xbf16>
    %c1_64 = arith.constant 1 : index
    %c0_65 = arith.constant 0 : index
    %c0_66 = arith.constant 0 : index
    %118 = vector.load %arg21[%c1_64, %c0_65, %c0_66] : memref<8x128x128xbf16, #tpu.memory_space<vmem>>, vector<1x128x128xbf16>
    %119 = vector.shape_cast %118 : vector<1x128x128xbf16> to vector<128x128xbf16>
    %120 = arith.truncf %99 : vector<32x128xf32> to vector<32x128xbf16>
    %cst_67 = arith.constant dense<0.000000e+00> : vector<32x128xf32>
    %121 = tpu.matmul %120, %119, %cst_67 {dimension_numbers = #tpu.dot_dimension_numbers<[1], [0], [0], [1], [0, 0, 1, 1], [], []>} : vector<32x128xbf16>, vector<128x128xbf16>, vector<32x128xf32> -> vector<32x128xf32>
    %122 = arith.truncf %121 : vector<32x128xf32> to vector<32x128xbf16>
    %cst_68 = arith.constant dense<0.000000e+00> : vector<32x128xf32>
    %123 = tpu.matmul %117, %122, %cst_68 {dimension_numbers = #tpu.dot_dimension_numbers<[1], [0], [0], [1], [0, 0, 1, 1], [], []>} : vector<32x32xbf16>, vector<32x128xbf16>, vector<32x128xf32> -> vector<32x128xf32>
    %124 = arith.addf %115, %123 : vector<32x128xf32>
    %c2_69 = arith.constant 2 : index
    %c0_70 = arith.constant 0 : index
    %c0_71 = arith.constant 0 : index
    %125 = vector.load %arg6[%c2_69, %c0_70, %c0_71] : memref<8x32x32xbf16, #tpu.memory_space<vmem>>, vector<1x32x32xbf16>
    %126 = vector.shape_cast %125 : vector<1x32x32xbf16> to vector<32x32xbf16>
    %c2_72 = arith.constant 2 : index
    %c0_73 = arith.constant 0 : index
    %c0_74 = arith.constant 0 : index
    %127 = vector.load %arg21[%c2_72, %c0_73, %c0_74] : memref<8x128x128xbf16, #tpu.memory_space<vmem>>, vector<1x128x128xbf16>
    %128 = vector.shape_cast %127 : vector<1x128x128xbf16> to vector<128x128xbf16>
    %129 = arith.truncf %99 : vector<32x128xf32> to vector<32x128xbf16>
    %cst_75 = arith.constant dense<0.000000e+00> : vector<32x128xf32>
    %130 = tpu.matmul %129, %128, %cst_75 {dimension_numbers = #tpu.dot_dimension_numbers<[1], [0], [0], [1], [0, 0, 1, 1], [], []>} : vector<32x128xbf16>, vector<128x128xbf16>, vector<32x128xf32> -> vector<32x128xf32>
    %131 = arith.truncf %130 : vector<32x128xf32> to vector<32x128xbf16>
    %cst_76 = arith.constant dense<0.000000e+00> : vector<32x128xf32>
    %132 = tpu.matmul %126, %131, %cst_76 {dimension_numbers = #tpu.dot_dimension_numbers<[1], [0], [0], [1], [0, 0, 1, 1], [], []>} : vector<32x32xbf16>, vector<32x128xbf16>, vector<32x128xf32> -> vector<32x128xf32>
    %133 = arith.addf %124, %132 : vector<32x128xf32>
    %c3_77 = arith.constant 3 : index
    %c0_78 = arith.constant 0 : index
    %c0_79 = arith.constant 0 : index
    %134 = vector.load %arg6[%c3_77, %c0_78, %c0_79] : memref<8x32x32xbf16, #tpu.memory_space<vmem>>, vector<1x32x32xbf16>
    %135 = vector.shape_cast %134 : vector<1x32x32xbf16> to vector<32x32xbf16>
    %c3_80 = arith.constant 3 : index
    %c0_81 = arith.constant 0 : index
    %c0_82 = arith.constant 0 : index
    %136 = vector.load %arg21[%c3_80, %c0_81, %c0_82] : memref<8x128x128xbf16, #tpu.memory_space<vmem>>, vector<1x128x128xbf16>
    %137 = vector.shape_cast %136 : vector<1x128x128xbf16> to vector<128x128xbf16>
    %138 = arith.truncf %99 : vector<32x128xf32> to vector<32x128xbf16>
    %cst_83 = arith.constant dense<0.000000e+00> : vector<32x128xf32>
    %139 = tpu.matmul %138, %137, %cst_83 {dimension_numbers = #tpu.dot_dimension_numbers<[1], [0], [0], [1], [0, 0, 1, 1], [], []>} : vector<32x128xbf16>, vector<128x128xbf16>, vector<32x128xf32> -> vector<32x128xf32>
    %140 = arith.truncf %139 : vector<32x128xf32> to vector<32x128xbf16>
    %cst_84 = arith.constant dense<0.000000e+00> : vector<32x128xf32>
    %141 = tpu.matmul %135, %140, %cst_84 {dimension_numbers = #tpu.dot_dimension_numbers<[1], [0], [0], [1], [0, 0, 1, 1], [], []>} : vector<32x32xbf16>, vector<32x128xbf16>, vector<32x128xf32> -> vector<32x128xf32>
    %142 = arith.addf %133, %141 : vector<32x128xf32>
    %c4_85 = arith.constant 4 : index
    %c0_86 = arith.constant 0 : index
    %c0_87 = arith.constant 0 : index
    %143 = vector.load %arg6[%c4_85, %c0_86, %c0_87] : memref<8x32x32xbf16, #tpu.memory_space<vmem>>, vector<1x32x32xbf16>
    %144 = vector.shape_cast %143 : vector<1x32x32xbf16> to vector<32x32xbf16>
    %c4_88 = arith.constant 4 : index
    %c0_89 = arith.constant 0 : index
    %c0_90 = arith.constant 0 : index
    %145 = vector.load %arg21[%c4_88, %c0_89, %c0_90] : memref<8x128x128xbf16, #tpu.memory_space<vmem>>, vector<1x128x128xbf16>
    %146 = vector.shape_cast %145 : vector<1x128x128xbf16> to vector<128x128xbf16>
    %147 = arith.truncf %99 : vector<32x128xf32> to vector<32x128xbf16>
    %cst_91 = arith.constant dense<0.000000e+00> : vector<32x128xf32>
    %148 = tpu.matmul %147, %146, %cst_91 {dimension_numbers = #tpu.dot_dimension_numbers<[1], [0], [0], [1], [0, 0, 1, 1], [], []>} : vector<32x128xbf16>, vector<128x128xbf16>, vector<32x128xf32> -> vector<32x128xf32>
    %149 = arith.truncf %148 : vector<32x128xf32> to vector<32x128xbf16>
    %cst_92 = arith.constant dense<0.000000e+00> : vector<32x128xf32>
    %150 = tpu.matmul %144, %149, %cst_92 {dimension_numbers = #tpu.dot_dimension_numbers<[1], [0], [0], [1], [0, 0, 1, 1], [], []>} : vector<32x32xbf16>, vector<32x128xbf16>, vector<32x128xf32> -> vector<32x128xf32>
    %151 = arith.addf %142, %150 : vector<32x128xf32>
    %c5_93 = arith.constant 5 : index
    %c0_94 = arith.constant 0 : index
    %c0_95 = arith.constant 0 : index
    %152 = vector.load %arg6[%c5_93, %c0_94, %c0_95] : memref<8x32x32xbf16, #tpu.memory_space<vmem>>, vector<1x32x32xbf16>
    %153 = vector.shape_cast %152 : vector<1x32x32xbf16> to vector<32x32xbf16>
    %c5_96 = arith.constant 5 : index
    %c0_97 = arith.constant 0 : index
    %c0_98 = arith.constant 0 : index
    %154 = vector.load %arg21[%c5_96, %c0_97, %c0_98] : memref<8x128x128xbf16, #tpu.memory_space<vmem>>, vector<1x128x128xbf16>
    %155 = vector.shape_cast %154 : vector<1x128x128xbf16> to vector<128x128xbf16>
    %156 = arith.truncf %99 : vector<32x128xf32> to vector<32x128xbf16>
    %cst_99 = arith.constant dense<0.000000e+00> : vector<32x128xf32>
    %157 = tpu.matmul %156, %155, %cst_99 {dimension_numbers = #tpu.dot_dimension_numbers<[1], [0], [0], [1], [0, 0, 1, 1], [], []>} : vector<32x128xbf16>, vector<128x128xbf16>, vector<32x128xf32> -> vector<32x128xf32>
    %158 = arith.truncf %157 : vector<32x128xf32> to vector<32x128xbf16>
    %cst_100 = arith.constant dense<0.000000e+00> : vector<32x128xf32>
    %159 = tpu.matmul %153, %158, %cst_100 {dimension_numbers = #tpu.dot_dimension_numbers<[1], [0], [0], [1], [0, 0, 1, 1], [], []>} : vector<32x32xbf16>, vector<32x128xbf16>, vector<32x128xf32> -> vector<32x128xf32>
    %160 = arith.addf %151, %159 : vector<32x128xf32>
    %c6_101 = arith.constant 6 : index
    %c0_102 = arith.constant 0 : index
    %c0_103 = arith.constant 0 : index
    %161 = vector.load %arg6[%c6_101, %c0_102, %c0_103] : memref<8x32x32xbf16, #tpu.memory_space<vmem>>, vector<1x32x32xbf16>
    %162 = vector.shape_cast %161 : vector<1x32x32xbf16> to vector<32x32xbf16>
    %c6_104 = arith.constant 6 : index
    %c0_105 = arith.constant 0 : index
    %c0_106 = arith.constant 0 : index
    %163 = vector.load %arg21[%c6_104, %c0_105, %c0_106] : memref<8x128x128xbf16, #tpu.memory_space<vmem>>, vector<1x128x128xbf16>
    %164 = vector.shape_cast %163 : vector<1x128x128xbf16> to vector<128x128xbf16>
    %165 = arith.truncf %99 : vector<32x128xf32> to vector<32x128xbf16>
    %cst_107 = arith.constant dense<0.000000e+00> : vector<32x128xf32>
    %166 = tpu.matmul %165, %164, %cst_107 {dimension_numbers = #tpu.dot_dimension_numbers<[1], [0], [0], [1], [0, 0, 1, 1], [], []>} : vector<32x128xbf16>, vector<128x128xbf16>, vector<32x128xf32> -> vector<32x128xf32>
    %167 = arith.truncf %166 : vector<32x128xf32> to vector<32x128xbf16>
    %cst_108 = arith.constant dense<0.000000e+00> : vector<32x128xf32>
    %168 = tpu.matmul %162, %167, %cst_108 {dimension_numbers = #tpu.dot_dimension_numbers<[1], [0], [0], [1], [0, 0, 1, 1], [], []>} : vector<32x32xbf16>, vector<32x128xbf16>, vector<32x128xf32> -> vector<32x128xf32>
    %169 = arith.addf %160, %168 : vector<32x128xf32>
    %c7_109 = arith.constant 7 : index
    %c0_110 = arith.constant 0 : index
    %c0_111 = arith.constant 0 : index
    %170 = vector.load %arg6[%c7_109, %c0_110, %c0_111] : memref<8x32x32xbf16, #tpu.memory_space<vmem>>, vector<1x32x32xbf16>
    %171 = vector.shape_cast %170 : vector<1x32x32xbf16> to vector<32x32xbf16>
    %c7_112 = arith.constant 7 : index
    %c0_113 = arith.constant 0 : index
    %c0_114 = arith.constant 0 : index
    %172 = vector.load %arg21[%c7_112, %c0_113, %c0_114] : memref<8x128x128xbf16, #tpu.memory_space<vmem>>, vector<1x128x128xbf16>
    %173 = vector.shape_cast %172 : vector<1x128x128xbf16> to vector<128x128xbf16>
    %174 = arith.truncf %99 : vector<32x128xf32> to vector<32x128xbf16>
    %cst_115 = arith.constant dense<0.000000e+00> : vector<32x128xf32>
    %175 = tpu.matmul %174, %173, %cst_115 {dimension_numbers = #tpu.dot_dimension_numbers<[1], [0], [0], [1], [0, 0, 1, 1], [], []>} : vector<32x128xbf16>, vector<128x128xbf16>, vector<32x128xf32> -> vector<32x128xf32>
    %176 = arith.truncf %175 : vector<32x128xf32> to vector<32x128xbf16>
    %cst_116 = arith.constant dense<0.000000e+00> : vector<32x128xf32>
    %177 = tpu.matmul %171, %176, %cst_116 {dimension_numbers = #tpu.dot_dimension_numbers<[1], [0], [0], [1], [0, 0, 1, 1], [], []>} : vector<32x32xbf16>, vector<32x128xbf16>, vector<32x128xf32> -> vector<32x128xf32>
    %178 = arith.addf %169, %177 : vector<32x128xf32>
    %179 = vector.broadcast %102 : vector<1x128xf32> to vector<32x128xf32>
    %180 = arith.mulf %178, %179 : vector<32x128xf32>
    %181 = vector.broadcast %103 : vector<1x128xf32> to vector<32x128xf32>
    %182 = arith.addf %180, %181 : vector<32x128xf32>
    %cst_117 = arith.constant 0.000000e+00 : f32
    %183 = vector.broadcast %cst_117 : f32 to vector<32x128xf32>
    %184 = arith.maximumf %182, %183 : vector<32x128xf32>
    %c1_i32_118 = arith.constant 1 : i32
    %185 = tpu.memref_slice %arg23[%c1_i32_118] : memref<2x!tpu.dma_semaphore, #tpu.memory_space<semaphore_mem>> -> memref<1x!tpu.dma_semaphore, #tpu.memory_space<semaphore_mem>>
    %186 = tpu.memref_squeeze %185 : memref<1x!tpu.dma_semaphore, #tpu.memory_space<semaphore_mem>> -> memref<!tpu.dma_semaphore, #tpu.memory_space<semaphore_mem>>
    tpu.wait_dma2 semaphore(%186 : memref<!tpu.dma_semaphore, #tpu.memory_space<semaphore_mem>>) src(%arg15 : memref<8x128x128xbf16, #tpu.memory_space<any>>) dst(%arg22 : memref<8x128x128xbf16, #tpu.memory_space<vmem>>)
    %c12 = arith.constant 12 : index
    %c0_119 = arith.constant 0 : index
    %187 = vector.load %arg7[%c12, %c0_119] : memref<24x128xf32, #tpu.memory_space<vmem>>, vector<1x128xf32>
    %c13 = arith.constant 13 : index
    %c0_120 = arith.constant 0 : index
    %188 = vector.load %arg7[%c13, %c0_120] : memref<24x128xf32, #tpu.memory_space<vmem>>, vector<1x128xf32>
    %c0_121 = arith.constant 0 : index
    %c0_122 = arith.constant 0 : index
    %189 = vector.load %arg16[%c0_121, %c0_122] : memref<128x128xbf16, #tpu.memory_space<vmem>>, vector<128x128xbf16>
    %190 = arith.truncf %184 : vector<32x128xf32> to vector<32x128xbf16>
    %cst_123 = arith.constant dense<0.000000e+00> : vector<32x128xf32>
    %191 = tpu.matmul %190, %189, %cst_123 {dimension_numbers = #tpu.dot_dimension_numbers<[1], [0], [0], [1], [0, 0, 1, 1], [], []>} : vector<32x128xbf16>, vector<128x128xbf16>, vector<32x128xf32> -> vector<32x128xf32>
    %c0_124 = arith.constant 0 : index
    %c0_125 = arith.constant 0 : index
    %c0_126 = arith.constant 0 : index
    %192 = vector.load %arg6[%c0_124, %c0_125, %c0_126] : memref<8x32x32xbf16, #tpu.memory_space<vmem>>, vector<1x32x32xbf16>
    %193 = vector.shape_cast %192 : vector<1x32x32xbf16> to vector<32x32xbf16>
    %c0_127 = arith.constant 0 : index
    %c0_128 = arith.constant 0 : index
    %c0_129 = arith.constant 0 : index
    %194 = vector.load %arg22[%c0_127, %c0_128, %c0_129] : memref<8x128x128xbf16, #tpu.memory_space<vmem>>, vector<1x128x128xbf16>
    %195 = vector.shape_cast %194 : vector<1x128x128xbf16> to vector<128x128xbf16>
    %196 = arith.truncf %184 : vector<32x128xf32> to vector<32x128xbf16>
    %cst_130 = arith.constant dense<0.000000e+00> : vector<32x128xf32>
    %197 = tpu.matmul %196, %195, %cst_130 {dimension_numbers = #tpu.dot_dimension_numbers<[1], [0], [0], [1], [0, 0, 1, 1], [], []>} : vector<32x128xbf16>, vector<128x128xbf16>, vector<32x128xf32> -> vector<32x128xf32>
    %198 = arith.truncf %197 : vector<32x128xf32> to vector<32x128xbf16>
    %cst_131 = arith.constant dense<0.000000e+00> : vector<32x128xf32>
    %199 = tpu.matmul %193, %198, %cst_131 {dimension_numbers = #tpu.dot_dimension_numbers<[1], [0], [0], [1], [0, 0, 1, 1], [], []>} : vector<32x32xbf16>, vector<32x128xbf16>, vector<32x128xf32> -> vector<32x128xf32>
    %200 = arith.addf %191, %199 : vector<32x128xf32>
    %c1_132 = arith.constant 1 : index
    %c0_133 = arith.constant 0 : index
    %c0_134 = arith.constant 0 : index
    %201 = vector.load %arg6[%c1_132, %c0_133, %c0_134] : memref<8x32x32xbf16, #tpu.memory_space<vmem>>, vector<1x32x32xbf16>
    %202 = vector.shape_cast %201 : vector<1x32x32xbf16> to vector<32x32xbf16>
    %c1_135 = arith.constant 1 : index
    %c0_136 = arith.constant 0 : index
    %c0_137 = arith.constant 0 : index
    %203 = vector.load %arg22[%c1_135, %c0_136, %c0_137] : memref<8x128x128xbf16, #tpu.memory_space<vmem>>, vector<1x128x128xbf16>
    %204 = vector.shape_cast %203 : vector<1x128x128xbf16> to vector<128x128xbf16>
    %205 = arith.truncf %184 : vector<32x128xf32> to vector<32x128xbf16>
    %cst_138 = arith.constant dense<0.000000e+00> : vector<32x128xf32>
    %206 = tpu.matmul %205, %204, %cst_138 {dimension_numbers = #tpu.dot_dimension_numbers<[1], [0], [0], [1], [0, 0, 1, 1], [], []>} : vector<32x128xbf16>, vector<128x128xbf16>, vector<32x128xf32> -> vector<32x128xf32>
    %207 = arith.truncf %206 : vector<32x128xf32> to vector<32x128xbf16>
    %cst_139 = arith.constant dense<0.000000e+00> : vector<32x128xf32>
    %208 = tpu.matmul %202, %207, %cst_139 {dimension_numbers = #tpu.dot_dimension_numbers<[1], [0], [0], [1], [0, 0, 1, 1], [], []>} : vector<32x32xbf16>, vector<32x128xbf16>, vector<32x128xf32> -> vector<32x128xf32>
    %209 = arith.addf %200, %208 : vector<32x128xf32>
    %c2_140 = arith.constant 2 : index
    %c0_141 = arith.constant 0 : index
    %c0_142 = arith.constant 0 : index
    %210 = vector.load %arg6[%c2_140, %c0_141, %c0_142] : memref<8x32x32xbf16, #tpu.memory_space<vmem>>, vector<1x32x32xbf16>
    %211 = vector.shape_cast %210 : vector<1x32x32xbf16> to vector<32x32xbf16>
    %c2_143 = arith.constant 2 : index
    %c0_144 = arith.constant 0 : index
    %c0_145 = arith.constant 0 : index
    %212 = vector.load %arg22[%c2_143, %c0_144, %c0_145] : memref<8x128x128xbf16, #tpu.memory_space<vmem>>, vector<1x128x128xbf16>
    %213 = vector.shape_cast %212 : vector<1x128x128xbf16> to vector<128x128xbf16>
    %214 = arith.truncf %184 : vector<32x128xf32> to vector<32x128xbf16>
    %cst_146 = arith.constant dense<0.000000e+00> : vector<32x128xf32>
    %215 = tpu.matmul %214, %213, %cst_146 {dimension_numbers = #tpu.dot_dimension_numbers<[1], [0], [0], [1], [0, 0, 1, 1], [], []>} : vector<32x128xbf16>, vector<128x128xbf16>, vector<32x128xf32> -> vector<32x128xf32>
    %216 = arith.truncf %215 : vector<32x128xf32> to vector<32x128xbf16>
    %cst_147 = arith.constant dense<0.000000e+00> : vector<32x128xf32>
    %217 = tpu.matmul %211, %216, %cst_147 {dimension_numbers = #tpu.dot_dimension_numbers<[1], [0], [0], [1], [0, 0, 1, 1], [], []>} : vector<32x32xbf16>, vector<32x128xbf16>, vector<32x128xf32> -> vector<32x128xf32>
    %218 = arith.addf %209, %217 : vector<32x128xf32>
    %c3_148 = arith.constant 3 : index
    %c0_149 = arith.constant 0 : index
    %c0_150 = arith.constant 0 : index
    %219 = vector.load %arg6[%c3_148, %c0_149, %c0_150] : memref<8x32x32xbf16, #tpu.memory_space<vmem>>, vector<1x32x32xbf16>
    %220 = vector.shape_cast %219 : vector<1x32x32xbf16> to vector<32x32xbf16>
    %c3_151 = arith.constant 3 : index
    %c0_152 = arith.constant 0 : index
    %c0_153 = arith.constant 0 : index
    %221 = vector.load %arg22[%c3_151, %c0_152, %c0_153] : memref<8x128x128xbf16, #tpu.memory_space<vmem>>, vector<1x128x128xbf16>
    %222 = vector.shape_cast %221 : vector<1x128x128xbf16> to vector<128x128xbf16>
    %223 = arith.truncf %184 : vector<32x128xf32> to vector<32x128xbf16>
    %cst_154 = arith.constant dense<0.000000e+00> : vector<32x128xf32>
    %224 = tpu.matmul %223, %222, %cst_154 {dimension_numbers = #tpu.dot_dimension_numbers<[1], [0], [0], [1], [0, 0, 1, 1], [], []>} : vector<32x128xbf16>, vector<128x128xbf16>, vector<32x128xf32> -> vector<32x128xf32>
    %225 = arith.truncf %224 : vector<32x128xf32> to vector<32x128xbf16>
    %cst_155 = arith.constant dense<0.000000e+00> : vector<32x128xf32>
    %226 = tpu.matmul %220, %225, %cst_155 {dimension_numbers = #tpu.dot_dimension_numbers<[1], [0], [0], [1], [0, 0, 1, 1], [], []>} : vector<32x32xbf16>, vector<32x128xbf16>, vector<32x128xf32> -> vector<32x128xf32>
    %227 = arith.addf %218, %226 : vector<32x128xf32>
    %c4_156 = arith.constant 4 : index
    %c0_157 = arith.constant 0 : index
    %c0_158 = arith.constant 0 : index
    %228 = vector.load %arg6[%c4_156, %c0_157, %c0_158] : memref<8x32x32xbf16, #tpu.memory_space<vmem>>, vector<1x32x32xbf16>
    %229 = vector.shape_cast %228 : vector<1x32x32xbf16> to vector<32x32xbf16>
    %c4_159 = arith.constant 4 : index
    %c0_160 = arith.constant 0 : index
    %c0_161 = arith.constant 0 : index
    %230 = vector.load %arg22[%c4_159, %c0_160, %c0_161] : memref<8x128x128xbf16, #tpu.memory_space<vmem>>, vector<1x128x128xbf16>
    %231 = vector.shape_cast %230 : vector<1x128x128xbf16> to vector<128x128xbf16>
    %232 = arith.truncf %184 : vector<32x128xf32> to vector<32x128xbf16>
    %cst_162 = arith.constant dense<0.000000e+00> : vector<32x128xf32>
    %233 = tpu.matmul %232, %231, %cst_162 {dimension_numbers = #tpu.dot_dimension_numbers<[1], [0], [0], [1], [0, 0, 1, 1], [], []>} : vector<32x128xbf16>, vector<128x128xbf16>, vector<32x128xf32> -> vector<32x128xf32>
    %234 = arith.truncf %233 : vector<32x128xf32> to vector<32x128xbf16>
    %cst_163 = arith.constant dense<0.000000e+00> : vector<32x128xf32>
    %235 = tpu.matmul %229, %234, %cst_163 {dimension_numbers = #tpu.dot_dimension_numbers<[1], [0], [0], [1], [0, 0, 1, 1], [], []>} : vector<32x32xbf16>, vector<32x128xbf16>, vector<32x128xf32> -> vector<32x128xf32>
    %236 = arith.addf %227, %235 : vector<32x128xf32>
    %c5_164 = arith.constant 5 : index
    %c0_165 = arith.constant 0 : index
    %c0_166 = arith.constant 0 : index
    %237 = vector.load %arg6[%c5_164, %c0_165, %c0_166] : memref<8x32x32xbf16, #tpu.memory_space<vmem>>, vector<1x32x32xbf16>
    %238 = vector.shape_cast %237 : vector<1x32x32xbf16> to vector<32x32xbf16>
    %c5_167 = arith.constant 5 : index
    %c0_168 = arith.constant 0 : index
    %c0_169 = arith.constant 0 : index
    %239 = vector.load %arg22[%c5_167, %c0_168, %c0_169] : memref<8x128x128xbf16, #tpu.memory_space<vmem>>, vector<1x128x128xbf16>
    %240 = vector.shape_cast %239 : vector<1x128x128xbf16> to vector<128x128xbf16>
    %241 = arith.truncf %184 : vector<32x128xf32> to vector<32x128xbf16>
    %cst_170 = arith.constant dense<0.000000e+00> : vector<32x128xf32>
    %242 = tpu.matmul %241, %240, %cst_170 {dimension_numbers = #tpu.dot_dimension_numbers<[1], [0], [0], [1], [0, 0, 1, 1], [], []>} : vector<32x128xbf16>, vector<128x128xbf16>, vector<32x128xf32> -> vector<32x128xf32>
    %243 = arith.truncf %242 : vector<32x128xf32> to vector<32x128xbf16>
    %cst_171 = arith.constant dense<0.000000e+00> : vector<32x128xf32>
    %244 = tpu.matmul %238, %243, %cst_171 {dimension_numbers = #tpu.dot_dimension_numbers<[1], [0], [0], [1], [0, 0, 1, 1], [], []>} : vector<32x32xbf16>, vector<32x128xbf16>, vector<32x128xf32> -> vector<32x128xf32>
    %245 = arith.addf %236, %244 : vector<32x128xf32>
    %c6_172 = arith.constant 6 : index
    %c0_173 = arith.constant 0 : index
    %c0_174 = arith.constant 0 : index
    %246 = vector.load %arg6[%c6_172, %c0_173, %c0_174] : memref<8x32x32xbf16, #tpu.memory_space<vmem>>, vector<1x32x32xbf16>
    %247 = vector.shape_cast %246 : vector<1x32x32xbf16> to vector<32x32xbf16>
    %c6_175 = arith.constant 6 : index
    %c0_176 = arith.constant 0 : index
    %c0_177 = arith.constant 0 : index
    %248 = vector.load %arg22[%c6_175, %c0_176, %c0_177] : memref<8x128x128xbf16, #tpu.memory_space<vmem>>, vector<1x128x128xbf16>
    %249 = vector.shape_cast %248 : vector<1x128x128xbf16> to vector<128x128xbf16>
    %250 = arith.truncf %184 : vector<32x128xf32> to vector<32x128xbf16>
    %cst_178 = arith.constant dense<0.000000e+00> : vector<32x128xf32>
    %251 = tpu.matmul %250, %249, %cst_178 {dimension_numbers = #tpu.dot_dimension_numbers<[1], [0], [0], [1], [0, 0, 1, 1], [], []>} : vector<32x128xbf16>, vector<128x128xbf16>, vector<32x128xf32> -> vector<32x128xf32>
    %252 = arith.truncf %251 : vector<32x128xf32> to vector<32x128xbf16>
    %cst_179 = arith.constant dense<0.000000e+00> : vector<32x128xf32>
    %253 = tpu.matmul %247, %252, %cst_179 {dimension_numbers = #tpu.dot_dimension_numbers<[1], [0], [0], [1], [0, 0, 1, 1], [], []>} : vector<32x32xbf16>, vector<32x128xbf16>, vector<32x128xf32> -> vector<32x128xf32>
    %254 = arith.addf %245, %253 : vector<32x128xf32>
    %c7_180 = arith.constant 7 : index
    %c0_181 = arith.constant 0 : index
    %c0_182 = arith.constant 0 : index
    %255 = vector.load %arg6[%c7_180, %c0_181, %c0_182] : memref<8x32x32xbf16, #tpu.memory_space<vmem>>, vector<1x32x32xbf16>
    %256 = vector.shape_cast %255 : vector<1x32x32xbf16> to vector<32x32xbf16>
    %c7_183 = arith.constant 7 : index
    %c0_184 = arith.constant 0 : index
    %c0_185 = arith.constant 0 : index
    %257 = vector.load %arg22[%c7_183, %c0_184, %c0_185] : memref<8x128x128xbf16, #tpu.memory_space<vmem>>, vector<1x128x128xbf16>
    %258 = vector.shape_cast %257 : vector<1x128x128xbf16> to vector<128x128xbf16>
    %259 = arith.truncf %184 : vector<32x128xf32> to vector<32x128xbf16>
    %cst_186 = arith.constant dense<0.000000e+00> : vector<32x128xf32>
    %260 = tpu.matmul %259, %258, %cst_186 {dimension_numbers = #tpu.dot_dimension_numbers<[1], [0], [0], [1], [0, 0, 1, 1], [], []>} : vector<32x128xbf16>, vector<128x128xbf16>, vector<32x128xf32> -> vector<32x128xf32>
    %261 = arith.truncf %260 : vector<32x128xf32> to vector<32x128xbf16>
    %cst_187 = arith.constant dense<0.000000e+00> : vector<32x128xf32>
    %262 = tpu.matmul %256, %261, %cst_187 {dimension_numbers = #tpu.dot_dimension_numbers<[1], [0], [0], [1], [0, 0, 1, 1], [], []>} : vector<32x32xbf16>, vector<32x128xbf16>, vector<32x128xf32> -> vector<32x128xf32>
    %263 = arith.addf %254, %262 : vector<32x128xf32>
    %264 = vector.broadcast %187 : vector<1x128xf32> to vector<32x128xf32>
    %265 = arith.mulf %263, %264 : vector<32x128xf32>
    %266 = vector.broadcast %188 : vector<1x128xf32> to vector<32x128xf32>
    %267 = arith.addf %265, %266 : vector<32x128xf32>
    %cst_188 = arith.constant 0.000000e+00 : f32
    %268 = vector.broadcast %cst_188 : f32 to vector<32x128xf32>
    %269 = arith.maximumf %267, %268 : vector<32x128xf32>
    %c0_189 = arith.constant 0 : index
    %c0_190 = arith.constant 0 : index
    %270 = vector.load %arg17[%c0_189, %c0_190] : memref<128x128xbf16, #tpu.memory_space<vmem>>, vector<128x128xbf16>
    %271 = arith.truncf %269 : vector<32x128xf32> to vector<32x128xbf16>
    %cst_191 = arith.constant dense<0.000000e+00> : vector<32x128xf32>
    %272 = tpu.matmul %271, %270, %cst_191 {dimension_numbers = #tpu.dot_dimension_numbers<[1], [0], [0], [1], [0, 0, 1, 1], [], []>} : vector<32x128xbf16>, vector<128x128xbf16>, vector<32x128xf32> -> vector<32x128xf32>
    %c14 = arith.constant 14 : index
    %c0_192 = arith.constant 0 : index
    %273 = vector.load %arg7[%c14, %c0_192] : memref<24x128xf32, #tpu.memory_space<vmem>>, vector<1x128xf32>
    %274 = vector.broadcast %273 : vector<1x128xf32> to vector<32x128xf32>
    %275 = arith.mulf %272, %274 : vector<32x128xf32>
    %c15 = arith.constant 15 : index
    %c0_193 = arith.constant 0 : index
    %276 = vector.load %arg7[%c15, %c0_193] : memref<24x128xf32, #tpu.memory_space<vmem>>, vector<1x128xf32>
    %277 = vector.broadcast %276 : vector<1x128xf32> to vector<32x128xf32>
    %278 = arith.addf %275, %277 : vector<32x128xf32>
    %cst_194 = arith.constant 0.000000e+00 : f32
    %279 = vector.broadcast %cst_194 : f32 to vector<32x128xf32>
    %280 = arith.maximumf %278, %279 : vector<32x128xf32>
    %c0_195 = arith.constant 0 : index
    %c0_196 = arith.constant 0 : index
    %281 = vector.load %arg18[%c0_195, %c0_196] : memref<128x128xbf16, #tpu.memory_space<vmem>>, vector<128x128xbf16>
    %282 = arith.truncf %280 : vector<32x128xf32> to vector<32x128xbf16>
    %cst_197 = arith.constant dense<0.000000e+00> : vector<32x128xf32>
    %283 = tpu.matmul %282, %281, %cst_197 {dimension_numbers = #tpu.dot_dimension_numbers<[1], [0], [0], [1], [0, 0, 1, 1], [], []>} : vector<32x128xbf16>, vector<128x128xbf16>, vector<32x128xf32> -> vector<32x128xf32>
    %c16 = arith.constant 16 : index
    %c0_198 = arith.constant 0 : index
    %284 = vector.load %arg7[%c16, %c0_198] : memref<24x128xf32, #tpu.memory_space<vmem>>, vector<1x128xf32>
    %285 = vector.broadcast %284 : vector<1x128xf32> to vector<32x128xf32>
    %286 = arith.addf %283, %285 : vector<32x128xf32>
    %cst_199 = arith.constant dense<0xFF800000> : vector<32xf32>
    %287 = vector.multi_reduction <maximumf>, %286, %cst_199 [1] : vector<32x128xf32> to vector<32xf32>
    %288 = vector.shape_cast %287 : vector<32xf32> to vector<32x1xf32>
    %289 = vector.broadcast %288 : vector<32x1xf32> to vector<32x128xf32>
    %290 = arith.subf %286, %289 : vector<32x128xf32>
    %291 = math.exp %290 : vector<32x128xf32>
    %cst_200 = arith.constant dense<0.000000e+00> : vector<32xf32>
    %292 = vector.multi_reduction <add>, %291, %cst_200 [1] : vector<32x128xf32> to vector<32xf32>
    %293 = vector.shape_cast %292 : vector<32xf32> to vector<32x1xf32>
    %294 = math.log %293 : vector<32x1xf32>
    %295 = vector.broadcast %294 : vector<32x1xf32> to vector<32x128xf32>
    %296 = arith.subf %290, %295 : vector<32x128xf32>
    %c0_201 = arith.constant 0 : index
    %c0_202 = arith.constant 0 : index
    %297 = vector.load %arg19[%c0_201, %c0_202] : memref<32x128xf32, #tpu.memory_space<vmem>>, vector<32x128xf32>
    tpu.vector_store %arg19[%c0_201, %c0_202], %296 {strides = array<i32>} : memref<32x128xf32, #tpu.memory_space<vmem>>, vector<32x128xf32>,
    return
  }
  func.func @transform_0(%arg0: i32) -> (i32, i32) {
    %c0_i32 = arith.constant 0 : i32
    %c0_i32_0 = arith.constant 0 : i32
    %c0_i32_1 = arith.constant 0 : i32
    return %c0_i32, %c0_i32_0 : i32, i32
  }
  func.func @transform_1(%arg0: i32) -> (i32, i32) {
    %c0_i32 = arith.constant 0 : i32
    %c0_i32_0 = arith.constant 0 : i32
    %c0_i32_1 = arith.constant 0 : i32
    return %c0_i32, %c0_i32_0 : i32, i32
  }
  func.func @transform_2(%arg0: i32) -> (i32, i32) {
    %c0_i32 = arith.constant 0 : i32
    %c0_i32_0 = arith.constant 0 : i32
    %c0_i32_1 = arith.constant 0 : i32
    return %c0_i32, %c0_i32_0 : i32, i32
  }
  func.func @transform_3(%arg0: i32) -> (i32, i32) {
    %c0_i32 = arith.constant 0 : i32
    %c0_i32_0 = arith.constant 0 : i32
    %c0_i32_1 = arith.constant 0 : i32
    return %c0_i32, %c0_i32_0 : i32, i32
  }
  func.func @transform_4(%arg0: i32) -> (i32, i32) {
    %c0_i32 = arith.constant 0 : i32
    %c0_i32_0 = arith.constant 0 : i32
    %c0_i32_1 = arith.constant 0 : i32
    return %c0_i32, %c0_i32_0 : i32, i32
  }
  func.func @transform_5(%arg0: i32) -> (i32, i32, i32) {
    %c0_i32 = arith.constant 0 : i32
    %c0_i32_0 = arith.constant 0 : i32
    %c0_i32_1 = arith.constant 0 : i32
    %c0_i32_2 = arith.constant 0 : i32
    return %c0_i32, %c0_i32_0, %c0_i32_1 : i32, i32, i32
  }
  func.func @transform_6(%arg0: i32) -> (i32, i32) {
    %c0_i32 = arith.constant 0 : i32
    %c0_i32_0 = arith.constant 0 : i32
    %c0_i32_1 = arith.constant 0 : i32
    return %c0_i32, %c0_i32_0 : i32, i32
  }
  func.func @transform_7(%arg0: i32) -> (i32, i32) {
    %c0_i32 = arith.constant 0 : i32
    %c0_i32_0 = arith.constant 0 : i32
    %c0_i32_1 = arith.constant 0 : i32
    return %c0_i32, %c0_i32_0 : i32, i32
  }
  func.func @transform_8(%arg0: i32) -> (i32, i32) {
    %c0_i32 = arith.constant 0 : i32
    %c0_i32_0 = arith.constant 0 : i32
    %c0_i32_1 = arith.constant 0 : i32
    return %c0_i32, %c0_i32_0 : i32, i32
  }
  func.func @transform_9(%arg0: i32) -> (i32, i32) {
    %c0_i32 = arith.constant 0 : i32
    %c0_i32_0 = arith.constant 0 : i32
    %c0_i32_1 = arith.constant 0 : i32
    return %c0_i32, %c0_i32_0 : i32, i32
  }
  func.func @transform_10(%arg0: i32) -> (i32, i32) {
    %c0_i32 = arith.constant 0 : i32
    %c0_i32_0 = arith.constant 0 : i32
    %c0_i32_1 = arith.constant 0 : i32
    return %c0_i32, %c0_i32_0 : i32, i32
  }
  func.func @transform_11(%arg0: i32) -> (i32, i32) {
    %c0_i32 = arith.constant 0 : i32
    %c0_i32_0 = arith.constant 0 : i32
    %c0_i32_1 = arith.constant 0 : i32
    return %c0_i32, %c0_i32_0 : i32, i32
  }
  func.func @transform_13(%arg0: i32) -> (i32, i32) {
    %c0_i32 = arith.constant 0 : i32
    %c0_i32_0 = arith.constant 0 : i32
    %c0_i32_1 = arith.constant 0 : i32
    return %c0_i32, %c0_i32_0 : i32, i32
  }
  func.func @transform_15(%arg0: i32) -> (i32, i32) {
    %c0_i32 = arith.constant 0 : i32
    %c0_i32_0 = arith.constant 0 : i32
    %c0_i32_1 = arith.constant 0 : i32
    return %c0_i32, %c0_i32_0 : i32, i32
  }
  func.func @transform_16(%arg0: i32) -> (i32, i32) {
    %c0_i32 = arith.constant 0 : i32
    %c0_i32_0 = arith.constant 0 : i32
    %c0_i32_1 = arith.constant 0 : i32
    return %c0_i32, %c0_i32_0 : i32, i32
  }
  func.func @transform_17(%arg0: i32) -> (i32, i32) {
    %c0_i32 = arith.constant 0 : i32
    %c0_i32_0 = arith.constant 0 : i32
    %c0_i32_1 = arith.constant 0 : i32
    return %c0_i32, %c0_i32_0 : i32, i32
  }
  func.func @transform_18(%arg0: i32) -> (i32, i32) {
    %c0_i32 = arith.constant 0 : i32
    %c0_i32_0 = arith.constant 0 : i32
    %c0_i32_1 = arith.constant 0 : i32
    return %c0_i32, %c0_i32_0 : i32, i32
  }
  func.func @transform_19(%arg0: i32) -> (i32, i32) {
    %c0_i32 = arith.constant 0 : i32
    %c0_i32_0 = arith.constant 0 : i32
    %c0_i32_1 = arith.constant 0 : i32
    return %c0_i32, %c0_i32_0 : i32, i32
  }
}

</mosaic_0001>

<bundles_post_ra>
// kernel: mol_fpkg_forward.1
= control target key start
LH: loop header
LB: loop body
LE: loop exit
PB: predicated region body
PF: predicated region fallthrough
CT: control target
= control target key end

     0   :  { %s7230_s0 = inlined_call_operand.vmem [shape: bf16[8,64], index: 0, kind: input, shape index: {}]   ;;  %s7231_s1 = inlined_call_operand.vmem [shape: bf16[32,32], index: 1, kind: input, shape index: {}]   ;;  %s7232_s2 = inlined_call_operand.vmem [shape: bf16[32,32], index: 2, kind: input, shape index: {}]   ;;  %s7233_s3 = inlined_call_operand.vmem [shape: bf16[8,32], index: 3, kind: input, shape index: {}]   ;;  %s7234_s4 = inlined_call_operand.hbm [shape: f32[24,128], index: 4, kind: input, shape index: {}]   ;;  %s7235_s5 = inlined_call_operand.vmem [shape: bf16[8,32,32], index: 5, kind: input, shape index: {}]   ;;  %s7236_s6 = inlined_call_operand.hbm [shape: f32[24,128], index: 6, kind: input, shape index: {}]   ;;  %s7237_s7 = inlined_call_operand.hbm [shape: bf16[64,128], index: 7, kind: input, shape index: {}]   ;;  %s7238_s8 = inlined_call_operand.hbm [shape: bf16[128,128], index: 8, kind: input, shape index: {}]   ;;  %s7239_s9 = inlined_call_operand.hbm [shape: bf16[32,128], index: 9, kind: input, shape index: {}]   ;;  %s7240_s10 = inlined_call_operand.hbm [shape: bf16[128,128], index: 10, kind: input, shape index: {}]   ;;  %s7241_s11 = inlined_call_operand.hbm [shape: bf16[128,128], index: 11, kind: input, shape index: {}]   ;;  %s7242_s12 = inlined_call_operand.vmem [shape: bf16[8,128,128], index: 12, kind: input, shape index: {}]   ;;  %s7243_s13 = inlined_call_operand.hbm [shape: bf16[128,128], index: 13, kind: input, shape index: {}]   ;;  %s7244_s14 = inlined_call_operand.hbm [shape: bf16[8,128,128], index: 14, kind: input, shape index: {}]   ;;  %s7245_s15 = inlined_call_operand.hbm [shape: bf16[128,128], index: 15, kind: input, shape index: {}]   ;;  %s7246_s16 = inlined_call_operand.hbm [shape: bf16[128,128], index: 16, kind: input, shape index: {}]   ;;  %s7247_s17 = inlined_call_operand.hbm [shape: bf16[128,128], index: 17, kind: input, shape index: {}]   ;;  %s7248_s18 = inlined_call_operand.vmem [shape: f32[32,128], index: 18, kind: output, shape index: {0}]   ;;  %s7249_s19 = inlined_call_operand.vmem [shape: f32[8,128], index: 19, kind: output, shape index: {1}]  }
   0x1   :  { %7252 = sst [smem:[#allocation35_spill]] %s7230_s0 }
   0x2   :  { %7253 = sst [smem:[#allocation36_spill]] %s7231_s1 }
   0x3   :  { %7254 = sst [smem:[#allocation37_spill]] %s7232_s2 }
   0x4   :  { %7255 = sst [smem:[#allocation38_spill]] %s7233_s3 }
   0x5   :  { %25 = vsyncpa [#allocation6], 0 }
   0x6   :  { %26 = vsyncpa [#allocation8], 0 }
   0x7   :  { %27 = vsyncpa [#allocation11], 0 }
   0x8   :  { %28 = vsyncpa [#allocation14], 0 }
   0x9   :  { %29 = vsyncpa [#allocation17], 0 }
   0xa   :  { %30 = vsyncpa [#allocation20], 0  ;;  %s6606_s0 = smov [#allocation7]  }
   0xb   :  { %s58_s30 = sshll.u32 %s6606_s0, 4  ;;  %s59_s30 = int_to_ptr.vmem [resolvable:$true] %s58_s30 }
   0xc   :  { %s6358_s20 = scalar_lea.vmem %s59_s30, 384  ;;  %p6363_p1 = scmp.lt.s32.totalorder %s59_s30, %s59_s30 }
   0xd   :  { %p6359_p0 = scmp.ne.s32.totalorder %s59_s30, %s6358_s20  ;;  %p6364_p2 = scmp.lt.s32.totalorder %s6358_s20, %s6358_s20 }
   0xf   :  { %p6365_p3 = por %p6364_p2, %p6363_p1 }
  0x11   :  { %p6366_p4 = pnand %p6365_p3, %p6359_p0 }
  0x13   :  { %6369 = shalt.err (!%p6366_p4)
}
  0x14   :  { %s6607_s21 = smov 128   ;;  %s6608_s1 = smov 8  }
  0x15   :  { %64 = dma.hbm_to_vmem [thread:$0]  %s7236_s6, 384, %s59_s30, [#allocation8], %s6607_s21, %s6607_s21, %s6608_s1  }
  0x16   :  { %s6609_s23 = smov [#allocation10]   ;;  %s6610_s25 = smov [#allocation13]  }
  0x17   :  { %s82_s24 = sshll.u32 %s6609_s23, 4  ;;  %s106_s3 = sshll.u32 %s6610_s25, 4  ;;  %s83_s24 = int_to_ptr.vmem [resolvable:$true] %s82_s24  ;;  %s107_s3 = int_to_ptr.vmem [resolvable:$true] %s106_s3 }
  0x18   :  { %s6378_s26 = scalar_lea.vmem %s83_s24, 1024  ;;  %p6383_p6 = scmp.lt.s32.totalorder %s83_s24, %s83_s24 }
  0x19   :  { %p6379_p5 = scmp.ne.s32.totalorder %s83_s24, %s6378_s26  ;;  %p6384_p7 = scmp.lt.s32.totalorder %s6378_s26, %s6378_s26 }
  0x1b   :  { %p6385_p8 = por %p6384_p7, %p6383_p6 }
  0x1d   :  { %p6386_p9 = pnand %p6385_p8, %p6379_p5 }
  0x1f   :  { %6389 = shalt.err (!%p6386_p9)
}
  0x20   :  { %s6611_s27 = smov 64   ;;  %s6612_s28 = smov 4  }
  0x21   :  { %88 = dma.hbm_to_vmem [thread:$0]  %s7238_s8, 1024, %s83_s24, [#allocation11], %s6611_s27, %s6611_s27, %s6612_s28  }
  0x22   :  { %s6398_s6 = scalar_lea.vmem %s107_s3, 1024  ;;  %p6403_p11 = scmp.lt.s32.totalorder %s107_s3, %s107_s3 }
  0x23   :  { %p6399_p10 = scmp.ne.s32.totalorder %s107_s3, %s6398_s6  ;;  %p6404_p12 = scmp.lt.s32.totalorder %s6398_s6, %s6398_s6 }
  0x25   :  { %p6405_p13 = por %p6404_p12, %p6403_p11 }
  0x27   :  { %p6406_p0 = pnand %p6405_p13, %p6399_p10 }
  0x29   :  { %6409 = shalt.err (!%p6406_p0)
}
  0x2a   :  { %112 = dma.hbm_to_vmem [thread:$0]  %s7240_s10, 1024, %s107_s3, [#allocation14], %s6611_s27, %s6611_s27, %s6612_s28  }
  0x2b   :  { %s6613_s22 = smov [#allocation16]   ;;  %s6614_s23 = smov [#allocation19]  }
  0x2c   :  { %s130_s2 = sshll.u32 %s6613_s22, 4  ;;  %s154_s8 = sshll.u32 %s6614_s23, 4  ;;  %s131_s2 = int_to_ptr.vmem [resolvable:$true] %s130_s2  ;;  %s155_s8 = int_to_ptr.vmem [resolvable:$true] %s154_s8 }
  0x2d   :  { %s6418_s24 = scalar_lea.vmem %s131_s2, 1024  ;;  %p6423_p2 = scmp.lt.s32.totalorder %s131_s2, %s131_s2 }
  0x2e   :  { %p6419_p1 = scmp.ne.s32.totalorder %s131_s2, %s6418_s24  ;;  %p6424_p3 = scmp.lt.s32.totalorder %s6418_s24, %s6418_s24 }
  0x30   :  { %p6425_p4 = por %p6424_p3, %p6423_p2 }
  0x32   :  { %p6426_p5 = pnand %p6425_p4, %p6419_p1 }
  0x34   :  { %6429 = shalt.err (!%p6426_p5)
}
  0x35   :  { %136 = dma.hbm_to_vmem [thread:$0]  %s7243_s13, 1024, %s131_s2, [#allocation17], %s6611_s27, %s6611_s27, %s6612_s28  }
  0x36   :  { %s6438_s10 = scalar_lea.vmem %s155_s8, 1024  ;;  %p6443_p7 = scmp.lt.s32.totalorder %s155_s8, %s155_s8 }
  0x37   :  { %p6439_p6 = scmp.ne.s32.totalorder %s155_s8, %s6438_s10  ;;  %p6444_p8 = scmp.lt.s32.totalorder %s6438_s10, %s6438_s10 }
  0x39   :  { %p6445_p9 = por %p6444_p8, %p6443_p7 }
  0x3b   :  { %p6446_p10 = pnand %p6445_p9, %p6439_p6 }
  0x3d   :  { %6449 = shalt.err (!%p6446_p10)
}
  0x3e   :  { %160 = dma.hbm_to_vmem [thread:$0]  %s7246_s16, 1024, %s155_s8, [#allocation20], %s6611_s27, %s6611_s27, %s6612_s28  }
  0x3f   :  { %s6615_s0 = smov [#allocation5]   ;;  %s6616_s30 = smov [#allocation9]  }
  0x40   :  { %s44_s6 = sshll.u32 %s6615_s0, 4  ;;  %s70_s13 = sshll.u32 %s6616_s30, 4  ;;  %s45_s6 = int_to_ptr.vmem [resolvable:$true] %s44_s6  ;;  %s71_s13 = int_to_ptr.vmem [resolvable:$true] %s70_s13 }
  0x41   :  { %s6458_s20 = scalar_lea.vmem %s45_s6, 384  ;;  %p6463_p12 = scmp.lt.s32.totalorder %s45_s6, %s45_s6 }
  0x42   :  { %p6459_p11 = scmp.ne.s32.totalorder %s45_s6, %s6458_s20  ;;  %p6464_p13 = scmp.lt.s32.totalorder %s6458_s20, %s6458_s20 }
  0x44   :  { %p6465_p0 = por %p6464_p13, %p6463_p12 }
  0x46   :  { %p6466_p1 = pnand %p6465_p0, %p6459_p11 }
  0x48   :  { %6469 = shalt.err (!%p6466_p1)
}
  0x49   :  { %50 = dma.hbm_to_vmem [thread:$0]  %s7234_s4, 384, %s45_s6, [#allocation6], %s6607_s21, %s6607_s21, %s6608_s1  }
  0x4a   :  { %s6478_s16 = scalar_lea.vmem %s71_s13, 512  ;;  %p6483_p3 = scmp.lt.s32.totalorder %s71_s13, %s71_s13 }
  0x4b   :  { %p6479_p2 = scmp.ne.s32.totalorder %s71_s13, %s6478_s16  ;;  %p6484_p4 = scmp.lt.s32.totalorder %s6478_s16, %s6478_s16 }
  0x4d   :  { %p6485_p5 = por %p6484_p4, %p6483_p3 }
  0x4f   :  { %p6486_p6 = pnand %p6485_p5, %p6479_p2 }
  0x51   :  { %6489 = shalt.err (!%p6486_p6)
}
  0x52   :  { %76 = dma.hbm_to_vmem [thread:$0]  %s7237_s7, 512, %s71_s13, [#allocation8], %s6611_s27, %s6611_s27, %s6612_s28  }
  0x53   :  { %s6617_s24 = smov [#allocation12]   ;;  %s6618_s26 = smov [#allocation15]  }
  0x54   :  { %s94_s25 = sshll.u32 %s6617_s24, 4  ;;  %s118_s4 = sshll.u32 %s6618_s26, 4  ;;  %s95_s25 = int_to_ptr.vmem [resolvable:$true] %s94_s25  ;;  %s119_s4 = int_to_ptr.vmem [resolvable:$true] %s118_s4 }
  0x55   :  { %s6498_s21 = scalar_lea.vmem %s95_s25, 256  ;;  %p6503_p8 = scmp.lt.s32.totalorder %s95_s25, %s95_s25 }
  0x56   :  { %p6499_p7 = scmp.ne.s32.totalorder %s95_s25, %s6498_s21  ;;  %p6504_p9 = scmp.lt.s32.totalorder %s6498_s21, %s6498_s21 }
  0x58   :  { %p6505_p10 = por %p6504_p9, %p6503_p8 }
  0x5a   :  { %p6506_p11 = pnand %p6505_p10, %p6499_p7 }
  0x5c   :  { %6509 = shalt.err (!%p6506_p11)
}
  0x5d   :  { %100 = dma.hbm_to_vmem [thread:$0]  %s7239_s9, 256, %s95_s25, [#allocation11], %s6611_s27, %s6611_s27, %s6612_s28  }
  0x5e   :  { %s6518_s7 = scalar_lea.vmem %s119_s4, 1024  ;;  %p6523_p13 = scmp.lt.s32.totalorder %s119_s4, %s119_s4 }
  0x5f   :  { %p6519_p12 = scmp.ne.s32.totalorder %s119_s4, %s6518_s7  ;;  %p6524_p0 = scmp.lt.s32.totalorder %s6518_s7, %s6518_s7 }
  0x61   :  { %p6525_p1 = por %p6524_p0, %p6523_p13 }
  0x63   :  { %p6526_p2 = pnand %p6525_p1, %p6519_p12 }
  0x65   :  { %6529 = shalt.err (!%p6526_p2)
}
  0x66   :  { %124 = dma.hbm_to_vmem [thread:$0]  %s7241_s11, 1024, %s119_s4, [#allocation14], %s6611_s27, %s6611_s27, %s6612_s28  }
  0x67   :  { %s6619_s0 = smov [#allocation18]   ;;  %s6620_s30 = smov [#allocation21]  }
  0x68   :  { %s142_s6 = sshll.u32 %s6619_s0, 4  ;;  %s166_s9 = sshll.u32 %s6620_s30, 4  ;;  %s143_s6 = int_to_ptr.vmem [resolvable:$true] %s142_s6  ;;  %s167_s9 = int_to_ptr.vmem [resolvable:$true] %s166_s9 }
  0x69   :  { %s6538_s13 = scalar_lea.vmem %s143_s6, 1024  ;;  %p6543_p4 = scmp.lt.s32.totalorder %s143_s6, %s143_s6 }
  0x6a   :  { %p6539_p3 = scmp.ne.s32.totalorder %s143_s6, %s6538_s13  ;;  %p6544_p5 = scmp.lt.s32.totalorder %s6538_s13, %s6538_s13 }
  0x6c   :  { %p6545_p6 = por %p6544_p5, %p6543_p4 }
  0x6e   :  { %p6546_p7 = pnand %p6545_p6, %p6539_p3 }
  0x70   :  { %6549 = shalt.err (!%p6546_p7)
}
  0x71   :  { %148 = dma.hbm_to_vmem [thread:$0]  %s7245_s15, 1024, %s143_s6, [#allocation17], %s6611_s27, %s6611_s27, %s6612_s28  }
  0x72   :  { %s6558_s11 = scalar_lea.vmem %s167_s9, 1024  ;;  %p6563_p9 = scmp.lt.s32.totalorder %s167_s9, %s167_s9 }
  0x73   :  { %p6559_p8 = scmp.ne.s32.totalorder %s167_s9, %s6558_s11  ;;  %p6564_p10 = scmp.lt.s32.totalorder %s6558_s11, %s6558_s11 }
  0x75   :  { %p6565_p11 = por %p6564_p10, %p6563_p9 }
  0x77   :  { %p6566_p12 = pnand %p6565_p11, %p6559_p8 }
  0x79   :  { %6569 = shalt.err (!%p6566_p12)
}
  0x7a   :  { %172 = dma.hbm_to_vmem [thread:$0]  %s7247_s17, 1024, %s167_s9, [#allocation20], %s6611_s27, %s6611_s27, %s6612_s28  }
  0x7b   :  { %6590 = dma.done.wait [#allocation6], 384  }
  0x7c   :  { %6591 = vsyncadd [#allocation6], 4294966912 }
  0x7d   :  { %6592 = dma.done.wait [#allocation8], 896  }
  0x7e   :  { %6593 = vsyncadd [#allocation8], 4294966400 }
  0x7f   :  { %6594 = dma.done.wait [#allocation11], 1280  }
  0x80   :  { %6595 = vsyncadd [#allocation11], 4294966016 }
  0x81   :  { %6596 = dma.done.wait [#allocation14], 2048  }
  0x82   :  { %6597 = vsyncadd [#allocation14], 4294965248 }
  0x83   :  { %6598 = dma.done.wait [#allocation17], 2048  }
  0x84   :  { %6599 = vsyncadd [#allocation17], 4294965248 }
  0x85   :  { %6600 = dma.done.wait [#allocation20], 2048  }
  0x86   :  { %6601 = vsyncadd [#allocation20], 4294965248  ;;  %v240_v0 = vld [vmem:[%s7242_s12] sm:$0xff]  ;;  %v242_v1 = vld [vmem:[%s7242_s12 + $0x8] sm:$0xff]  ;;  %vm6622_vm0 = vmmov 0   ;;  %vm421_vm1 = vcmask 523264  }
  0x87   :  { %v244_v2 = vld [vmem:[%s7242_s12 + $0x10] sm:$0xff]  ;;  %241 = vst [vmem:[#allocation2] sm:$0xff] %v240_v0  ;;  %243 = vst [vmem:[#allocation2 + $0x8] sm:$0xff] %v242_v1  ;;  %v246_v3 = vld [vmem:[%s7242_s12 + $0x18] sm:$0xff]  ;;  %v6621_v1 = vmov 0.0   ;;  %s7256_s16 = sld [smem:[#allocation35_spill]] }
  0x88   :  { %245 = vst [vmem:[#allocation2 + $0x10] sm:$0xff] %v244_v2  ;;  %v248_v4 = vld [vmem:[%s7242_s12 + $0x20] sm:$0xff]  ;;  %v250_v5 = vld [vmem:[%s7242_s12 + $0x28] sm:$0xff]  ;;  %247 = vst [vmem:[#allocation2 + $0x18] sm:$0xff] %v246_v3  ;;  %5448 = vmatprep.subr.bf16.mxu0 %v6621_v1  ;;  %5460 = vmatprep.subr.bf16.mxu1 %v6621_v1 }
  0x89   :  { %249 = vst [vmem:[#allocation2 + $0x20] sm:$0xff] %v248_v4  ;;  %251 = vst [vmem:[#allocation2 + $0x28] sm:$0xff] %v250_v5  ;;  %v252_v6 = vld [vmem:[%s7242_s12 + $0x30] sm:$0xff]  ;;  %v254_v7 = vld [vmem:[%s7242_s12 + $0x38] sm:$0xff]  ;;  %5456 = vmatprep.mubr.msk.bf16.mxu0 %vm6622_vm0, %v6621_v1  ;;  %5476 = vmatprep.mubr.msk.bf16.mxu1 %vm6622_vm0, %v6621_v1 }
  0x8a   :  { %v256_v8 = vld [vmem:[%s7242_s12 + $0x40] sm:$0xff]  ;;  %253 = vst [vmem:[#allocation2 + $0x30] sm:$0xff] %v252_v6  ;;  %255 = vst [vmem:[#allocation2 + $0x38] sm:$0xff] %v254_v7  ;;  %v258_v9 = vld [vmem:[%s7242_s12 + $0x48] sm:$0xff] }
  0x8b   :  { %257 = vst [vmem:[#allocation2 + $0x40] sm:$0xff] %v256_v8  ;;  %v260_v10 = vld [vmem:[%s7242_s12 + $0x50] sm:$0xff]  ;;  %v262_v11 = vld [vmem:[%s7242_s12 + $0x58] sm:$0xff]  ;;  %259 = vst [vmem:[#allocation2 + $0x48] sm:$0xff] %v258_v9 }
  0x8c   :  { %261 = vst [vmem:[#allocation2 + $0x50] sm:$0xff] %v260_v10  ;;  %263 = vst [vmem:[#allocation2 + $0x58] sm:$0xff] %v262_v11  ;;  %v264_v12 = vld [vmem:[%s7242_s12 + $0x60] sm:$0xff]  ;;  %v266_v13 = vld [vmem:[%s7242_s12 + $0x68] sm:$0xff] }
  0x8d   :  { %v268_v14 = vld [vmem:[%s7242_s12 + $0x70] sm:$0xff]  ;;  %265 = vst [vmem:[#allocation2 + $0x60] sm:$0xff] %v264_v12  ;;  %267 = vst [vmem:[#allocation2 + $0x68] sm:$0xff] %v266_v13  ;;  %v270_v15 = vld [vmem:[%s7242_s12 + $0x78] sm:$0xff] }
  0x8e   :  { %269 = vst [vmem:[#allocation2 + $0x70] sm:$0xff] %v268_v14  ;;  %v272_v16 = vld [vmem:[%s7242_s12 + $0x80] sm:$0xff]  ;;  %v274_v17 = vld [vmem:[%s7242_s12 + $0x88] sm:$0xff]  ;;  %271 = vst [vmem:[#allocation2 + $0x78] sm:$0xff] %v270_v15 }
  0x8f   :  { %273 = vst [vmem:[#allocation2 + $0x80] sm:$0xff] %v272_v16  ;;  %275 = vst [vmem:[#allocation2 + $0x88] sm:$0xff] %v274_v17  ;;  %v276_v18 = vld [vmem:[%s7242_s12 + $0x90] sm:$0xff]  ;;  %v278_v19 = vld [vmem:[%s7242_s12 + $0x98] sm:$0xff] }
  0x90   :  { %v280_v20 = vld [vmem:[%s7242_s12 + $0xa0] sm:$0xff]  ;;  %277 = vst [vmem:[#allocation2 + $0x90] sm:$0xff] %v276_v18  ;;  %279 = vst [vmem:[#allocation2 + $0x98] sm:$0xff] %v278_v19  ;;  %v282_v21 = vld [vmem:[%s7242_s12 + $0xa8] sm:$0xff] }
  0x91   :  { %281 = vst [vmem:[#allocation2 + $0xa0] sm:$0xff] %v280_v20  ;;  %v284_v22 = vld [vmem:[%s7242_s12 + $0xb0] sm:$0xff]  ;;  %v286_v23 = vld [vmem:[%s7242_s12 + $0xb8] sm:$0xff]  ;;  %283 = vst [vmem:[#allocation2 + $0xa8] sm:$0xff] %v282_v21 }
  0x92   :  { %285 = vst [vmem:[#allocation2 + $0xb0] sm:$0xff] %v284_v22  ;;  %287 = vst [vmem:[#allocation2 + $0xb8] sm:$0xff] %v286_v23  ;;  %v288_v24 = vld [vmem:[%s7242_s12 + $0xc0] sm:$0xff]  ;;  %v290_v25 = vld [vmem:[%s7242_s12 + $0xc8] sm:$0xff] }
  0x93   :  { %v292_v26 = vld [vmem:[%s7242_s12 + $0xd0] sm:$0xff]  ;;  %289 = vst [vmem:[#allocation2 + $0xc0] sm:$0xff] %v288_v24  ;;  %291 = vst [vmem:[#allocation2 + $0xc8] sm:$0xff] %v290_v25  ;;  %v294_v27 = vld [vmem:[%s7242_s12 + $0xd8] sm:$0xff] }
  0x94   :  { %293 = vst [vmem:[#allocation2 + $0xd0] sm:$0xff] %v292_v26  ;;  %v296_v28 = vld [vmem:[%s7242_s12 + $0xe0] sm:$0xff]  ;;  %v298_v29 = vld [vmem:[%s7242_s12 + $0xe8] sm:$0xff]  ;;  %295 = vst [vmem:[#allocation2 + $0xd8] sm:$0xff] %v294_v27 }
  0x95   :  { %297 = vst [vmem:[#allocation2 + $0xe0] sm:$0xff] %v296_v28  ;;  %299 = vst [vmem:[#allocation2 + $0xe8] sm:$0xff] %v298_v29  ;;  %v300_v30 = vld [vmem:[%s7242_s12 + $0xf0] sm:$0xff]  ;;  %v302_v31 = vld [vmem:[%s7242_s12 + $0xf8] sm:$0xff] }
  0x96   :  { %v304_v32 = vld [vmem:[%s7242_s12 + $0x100] sm:$0xff]  ;;  %301 = vst [vmem:[#allocation2 + $0xf0] sm:$0xff] %v300_v30  ;;  %303 = vst [vmem:[#allocation2 + $0xf8] sm:$0xff] %v302_v31  ;;  %v306_v33 = vld [vmem:[%s7242_s12 + $0x108] sm:$0xff] }
  0x97   :  { %305 = vst [vmem:[#allocation2 + $0x100] sm:$0xff] %v304_v32  ;;  %v308_v34 = vld [vmem:[%s7242_s12 + $0x110] sm:$0xff]  ;;  %v310_v35 = vld [vmem:[%s7242_s12 + $0x118] sm:$0xff]  ;;  %307 = vst [vmem:[#allocation2 + $0x108] sm:$0xff] %v306_v33 }
  0x98   :  { %309 = vst [vmem:[#allocation2 + $0x110] sm:$0xff] %v308_v34  ;;  %311 = vst [vmem:[#allocation2 + $0x118] sm:$0xff] %v310_v35  ;;  %v312_v36 = vld [vmem:[%s7242_s12 + $0x120] sm:$0xff]  ;;  %v314_v37 = vld [vmem:[%s7242_s12 + $0x128] sm:$0xff] }
  0x99   :  { %v316_v38 = vld [vmem:[%s7242_s12 + $0x130] sm:$0xff]  ;;  %313 = vst [vmem:[#allocation2 + $0x120] sm:$0xff] %v312_v36  ;;  %315 = vst [vmem:[#allocation2 + $0x128] sm:$0xff] %v314_v37  ;;  %v318_v39 = vld [vmem:[%s7242_s12 + $0x138] sm:$0xff] }
  0x9a   :  { %317 = vst [vmem:[#allocation2 + $0x130] sm:$0xff] %v316_v38  ;;  %v320_v40 = vld [vmem:[%s7242_s12 + $0x140] sm:$0xff]  ;;  %v322_v41 = vld [vmem:[%s7242_s12 + $0x148] sm:$0xff]  ;;  %319 = vst [vmem:[#allocation2 + $0x138] sm:$0xff] %v318_v39 }
  0x9b   :  { %321 = vst [vmem:[#allocation2 + $0x140] sm:$0xff] %v320_v40  ;;  %323 = vst [vmem:[#allocation2 + $0x148] sm:$0xff] %v322_v41  ;;  %v324_v42 = vld [vmem:[%s7242_s12 + $0x150] sm:$0xff]  ;;  %v326_v43 = vld [vmem:[%s7242_s12 + $0x158] sm:$0xff] }
  0x9c   :  { %v328_v44 = vld [vmem:[%s7242_s12 + $0x160] sm:$0xff]  ;;  %325 = vst [vmem:[#allocation2 + $0x150] sm:$0xff] %v324_v42  ;;  %327 = vst [vmem:[#allocation2 + $0x158] sm:$0xff] %v326_v43  ;;  %v330_v45 = vld [vmem:[%s7242_s12 + $0x168] sm:$0xff] }
  0x9d   :  { %329 = vst [vmem:[#allocation2 + $0x160] sm:$0xff] %v328_v44  ;;  %v332_v46 = vld [vmem:[%s7242_s12 + $0x170] sm:$0xff]  ;;  %v334_v47 = vld [vmem:[%s7242_s12 + $0x178] sm:$0xff]  ;;  %331 = vst [vmem:[#allocation2 + $0x168] sm:$0xff] %v330_v45 }
  0x9e   :  { %333 = vst [vmem:[#allocation2 + $0x170] sm:$0xff] %v332_v46  ;;  %335 = vst [vmem:[#allocation2 + $0x178] sm:$0xff] %v334_v47  ;;  %v336_v48 = vld [vmem:[%s7242_s12 + $0x180] sm:$0xff]  ;;  %v338_v49 = vld [vmem:[%s7242_s12 + $0x188] sm:$0xff] }
  0x9f   :  { %v340_v50 = vld [vmem:[%s7242_s12 + $0x190] sm:$0xff]  ;;  %337 = vst [vmem:[#allocation2 + $0x180] sm:$0xff] %v336_v48  ;;  %339 = vst [vmem:[#allocation2 + $0x188] sm:$0xff] %v338_v49  ;;  %v342_v51 = vld [vmem:[%s7242_s12 + $0x198] sm:$0xff] }
  0xa0   :  { %341 = vst [vmem:[#allocation2 + $0x190] sm:$0xff] %v340_v50  ;;  %v344_v52 = vld [vmem:[%s7242_s12 + $0x1a0] sm:$0xff]  ;;  %v346_v53 = vld [vmem:[%s7242_s12 + $0x1a8] sm:$0xff]  ;;  %343 = vst [vmem:[#allocation2 + $0x198] sm:$0xff] %v342_v51 }
  0xa1   :  { %345 = vst [vmem:[#allocation2 + $0x1a0] sm:$0xff] %v344_v52  ;;  %347 = vst [vmem:[#allocation2 + $0x1a8] sm:$0xff] %v346_v53  ;;  %v348_v54 = vld [vmem:[%s7242_s12 + $0x1b0] sm:$0xff]  ;;  %v350_v55 = vld [vmem:[%s7242_s12 + $0x1b8] sm:$0xff] }
  0xa2   :  { %v352_v56 = vld [vmem:[%s7242_s12 + $0x1c0] sm:$0xff]  ;;  %349 = vst [vmem:[#allocation2 + $0x1b0] sm:$0xff] %v348_v54  ;;  %351 = vst [vmem:[#allocation2 + $0x1b8] sm:$0xff] %v350_v55  ;;  %v354_v57 = vld [vmem:[%s7242_s12 + $0x1c8] sm:$0xff] }
  0xa3   :  { %353 = vst [vmem:[#allocation2 + $0x1c0] sm:$0xff] %v352_v56  ;;  %v356_v58 = vld [vmem:[%s7242_s12 + $0x1d0] sm:$0xff]  ;;  %v358_v59 = vld [vmem:[%s7242_s12 + $0x1d8] sm:$0xff]  ;;  %355 = vst [vmem:[#allocation2 + $0x1c8] sm:$0xff] %v354_v57 }
  0xa4   :  { %357 = vst [vmem:[#allocation2 + $0x1d0] sm:$0xff] %v356_v58  ;;  %359 = vst [vmem:[#allocation2 + $0x1d8] sm:$0xff] %v358_v59  ;;  %v360_v60 = vld [vmem:[%s7242_s12 + $0x1e0] sm:$0xff]  ;;  %v362_v61 = vld [vmem:[%s7242_s12 + $0x1e8] sm:$0xff] }
  0xa5   :  { %v364_v62 = vld [vmem:[%s7242_s12 + $0x1f0] sm:$0xff]  ;;  %361 = vst [vmem:[#allocation2 + $0x1e0] sm:$0xff] %v360_v60  ;;  %363 = vst [vmem:[#allocation2 + $0x1e8] sm:$0xff] %v362_v61  ;;  %v366_v63 = vld [vmem:[%s7242_s12 + $0x1f8] sm:$0xff] }
  0xa6   :  { %365 = vst [vmem:[#allocation2 + $0x1f0] sm:$0xff] %v364_v62  ;;  %367 = vst [vmem:[#allocation2 + $0x1f8] sm:$0xff] %v366_v63  ;;  %v6098_v0 = vld [vmem:[#allocation9 + $0x18] sm:$0xff]   ;;  %v6099_v2 = vld [vmem:[#allocation9 + $0x10] sm:$0xff]  }
  0xa7   :  { %5449 = vmatpush3.bf16.msra.mxu0 %v6098_v0  ;;  %v6102_v3 = vld [vmem:[#allocation10 + $0x38] sm:$0xff]   ;;  %v6100_v4 = vld [vmem:[#allocation9 + $0x8] sm:$0xff]   ;;  %v6103_v5 = vld [vmem:[#allocation10 + $0x30] sm:$0xff]  }
  0xa8   :  { %5450 = vmatprep.subr.bf16.mxu0 %v6621_v1  ;;  %5461 = vmatpush3.bf16.msra.mxu1 %v6102_v3  ;;  %v6101_v6 = vld [vmem:[#allocation9] sm:$0xff]   ;;  %v6104_v7 = vld [vmem:[#allocation10 + $0x28] sm:$0xff]   ;;  %v388_v8 = vld [vmem:[%s7256_s16] sm:$0xf] }
  0xa9   :  { %5462 = vmatprep.subr.bf16.mxu1 %v6621_v1  ;;  %v6105_v9 = vld [vmem:[#allocation10 + $0x20] sm:$0xff]   ;;  %v6106_v10 = vld [vmem:[#allocation10 + $0x18] sm:$0xff]   ;;  %v6107_v11 = vld [vmem:[#allocation10 + $0x10] sm:$0xff]  }
  0xab   :  { %5451 = vmatpush3.bf16.msra.mxu0 %v6099_v2 }
  0xac   :  { %5452 = vmatprep.subr.bf16.mxu0 %v6621_v1  ;;  %5463 = vmatpush3.bf16.msra.mxu1 %v6103_v5 }
  0xad   :  { %5464 = vmatprep.subr.bf16.mxu1 %v6621_v1 }
  0xaf   :  { %5453 = vmatpush3.bf16.msra.mxu0 %v6100_v4 }
  0xb0   :  { %5454 = vmatprep.subr.bf16.mxu0 %v6621_v1  ;;  %5465 = vmatpush3.bf16.msra.mxu1 %v6104_v7 }
  0xb1   :  { %5466 = vmatprep.subr.bf16.mxu1 %v6621_v1 }
  0xb3   :  { %5455 = vmatpush3.bf16.msra.mxu0 %v6101_v6 }
  0xb4   :  { %5467 = vmatpush3.bf16.msra.mxu1 %v6105_v9 }
  0xb5   :  { %5468 = vmatprep.subr.bf16.mxu1 %v6621_v1 }
  0xb6   :  { %5457 = vmatmul.mubr.msk.bf16.vlgmr.msra.gmra.mxu0 %vm421_vm1, %v388_v8 }
  0xb8   :  { %5469 = vmatpush3.bf16.msra.mxu1 %v6106_v10 }
  0xb9   :  { %5470 = vmatprep.subr.bf16.mxu1 %v6621_v1 }
  0xba   :  { %375 = vsyncadd [#allocation4], 8192  ;;  %v6108_v12 = vld [vmem:[#allocation10 + $0x8] sm:$0xff]   ;;  %v6109_v13 = vld [vmem:[#allocation10] sm:$0xff]   ;;  %s7257_s8 = sld [smem:[#allocation36_spill]]  ;;  %vm630_vm2 = vcmask 261120  }
  0xbb   :  { %v6110_v14 = vld [vmem:[#allocation12 + $0x8] sm:$0xff]   ;;  %v6111_v26 = vld [vmem:[#allocation12] sm:$0xff]   ;;  %s7258_s25 = sld [smem:[#allocation37_spill]]  ;;  %v6118_v42 = vld [vmem:[#allocation13 + $0x28] sm:$0xff]   ;;  %s6623_s7 = smov [#allocation3]  }
  0xbc   :  { %5471 = vmatpush3.bf16.msra.mxu1 %v6107_v11  ;;  %v4800_v15 = vld [vmem:[#allocation7] ss:$0 sm:$0xff]  ;;  %v4801_v17 = vld [vmem:[#allocation7 + $0x1] ss:$0 sm:$0xff]  ;;  %v6117_v41 = vld [vmem:[#allocation13 + $0x30] sm:$0xff]   ;;  %s7259_s10 = sld [smem:[#allocation38_spill]] }
  0xbd   :  { %5472 = vmatprep.subr.bf16.mxu1 %v6621_v1  ;;  %v6116_v39 = vld [vmem:[#allocation13 + $0x38] sm:$0xff]   ;;  %v6119_v43 = vld [vmem:[#allocation13 + $0x20] sm:$0xff]   ;;  %v6121_v45 = vld [vmem:[#allocation13 + $0x10] sm:$0xff]   ;;  %s384_s3 = sshll.u32 %s6623_s7, 4  ;;  %s385_s3 = int_to_ptr.vmem [resolvable:$true] %s384_s3 }
  0xbe   :  { %v6120_v44 = vld [vmem:[#allocation13 + $0x18] sm:$0xff]   ;;  %v6122_v46 = vld [vmem:[#allocation13 + $0x8] sm:$0xff]   ;;  %v6123_v47 = vld [vmem:[#allocation13] sm:$0xff]   ;;  %s6578_s29 = scalar_lea.vmem %s385_s3, 8192  ;;  %p6583_p0 = scmp.lt.s32.totalorder %s385_s3, %s385_s3 }
  0xbf   :  { %v4822_v49 = vld [vmem:[#allocation7 + $0x4] ss:$0 sm:$0xff]  ;;  %v4823_v54 = vld [vmem:[#allocation7 + $0x5] ss:$0 sm:$0xff]  ;;  %v4834_v11 = vld [vmem:[#allocation7 + $0x6] ss:$0 sm:$0xff]  ;;  %p6579_p13 = scmp.ne.s32.totalorder %s385_s3, %s6578_s29  ;;  %p6584_p1 = scmp.lt.s32.totalorder %s6578_s29, %s6578_s29 }
  0xc0   :  { %5473 = vmatpush3.bf16.msra.mxu1 %v6108_v12  ;;  %v6112_v24 = vld [vmem:[%s7257_s8] sm:$0xff]   ;;  %v6113_v27 = vld [vmem:[%s7257_s8 + $0x8] sm:$0xff]  }
  0xc1   :  { %5474 = vmatprep.subr.bf16.mxu1 %v6621_v1  ;;  %v6114_v28 = vld [vmem:[%s7258_s25] sm:$0xff]   ;;  %v6115_v40 = vld [vmem:[%s7258_s25 + $0x8] sm:$0xff]   ;;  %p6585_p2 = por %p6584_p1, %p6583_p0 }
  0xc2   :  { %5492 = vmatprep.mubr.msk.bf16.mxu0 %vm630_vm2, %v6114_v28 }
  0xc3   :  { %p6586_p3 = pnand %p6585_p2, %p6579_p13 }
  0xc4   :  { %5475 = vmatpush3.bf16.msra.mxu1 %v6109_v13 }
  0xc5   :  { %5480 = vmatprep.subr.bf16.mxu1 %v6110_v14 }
 0x176   :  { %v459_v16 = vpop.f32.mrf.mxu0 }
 0x177   :  { %v470_v18 = vmul.f32 %v4800_v15, %v459_v16 }
 0x178   :  { %v5458_v19 = vpop.f32.mrf.mxu0 }
 0x179   :  { %v476_v20 = vadd.f32 %v4801_v17, %v470_v18 }
 0x17a   :  { %v462_v21 = vpop.f32.mrf.mxu0 }
 0x17b   :  { %v477_v22 = vmax.f32 %v476_v20, 0.0 }
 0x17c   :  { %v5459_v23 = vpop.f32.mrf.mxu0 }
 0x17d   :  { %v494_v25 = vpack.c.bf16 %v477_v22, %v477_v22 }
 0x17f   :  { %5477 = vmatmul.mubr.bf16.vlgmr.msra.gmra.mxu1 %v494_v25 }
 0x180   :  { %5481 = vmatpush3.bf16.msra.mxu1 %v6110_v14  ;;  %5484 = vmatprep.mubr.msk.bf16.mxu1 %vm630_vm2, %v6112_v24  ;;  %v4835_v14 = vld [vmem:[#allocation7 + $0x7] ss:$0 sm:$0xff] }
 0x181   :  { %5482 = vmatprep.subr.bf16.mxu1 %v6111_v26 }
 0x184   :  { %5483 = vmatpush3.bf16.msra.mxu1 %v6111_v26 }
 0x187   :  { %5485 = vmatmul.mubr.msk.bf16.vlgmr.msra.gmra.mxu1 %vm630_vm2, %v6113_v27 }
 0x188   :  { %5520 = vmatprep.mubr.msk.bf16.mxu1 %vm630_vm2, %v6114_v28 }
 0x23f   :  { %v7014_v29 = vpop.f32.mrf.mxu1 }
 0x241   :  { %v5478_v30 = vpop.f32.mrf.mxu1 }
 0x243   :  { %v580_v31 = vpop.f32.mrf.mxu1 }
 0x245   :  { %v5479_v32 = vpop.f32.mrf.mxu1 }
 0x246   :  { %v963_v32 = vld [vmem:[%s7259_s10] sm:$0xf] }
 0x247   :  { %v5486_v33 = vpop.f32.mrf.mxu1 }
 0x249   :  { %v671_v34 = vpop.f32.mrf.mxu1 }
 0x24b   :  { %v5487_v35 = vpop.f32.mrf.mxu1 }
 0x24c   :  { %v687_v36 = vpack.c.bf16 %v5487_v35, %v5486_v33  ;;  %v6124_v33 = vld [vmem:[#allocation15 + $0x38] sm:$0xff]   ;;  %v6126_v35 = vld [vmem:[#allocation15 + $0x28] sm:$0xff]  }
 0x24d   :  { %v674_v37 = vpop.f32.mrf.mxu1 }
 0x24e   :  { %v686_v38 = vpack.c.bf16 %v674_v37, %v671_v34  ;;  %5488 = vmatprep.subr.bf16.mxu0 %v687_v36  ;;  %v6125_v34 = vld [vmem:[#allocation15 + $0x30] sm:$0xff]   ;;  %v6128_v37 = vld [vmem:[#allocation15 + $0x18] sm:$0xff]  }
 0x24f   :  { %5489 = vmatpush3.bf16.msra.mxu0 %v687_v36  ;;  %v6127_v36 = vld [vmem:[#allocation15 + $0x20] sm:$0xff]  }
 0x250   :  { %5490 = vmatprep.subr.bf16.mxu0 %v686_v38 }
 0x253   :  { %5491 = vmatpush3.bf16.msra.mxu0 %v686_v38  ;;  %v6129_v38 = vld [vmem:[#allocation15 + $0x10] sm:$0xff]  }
 0x254   :  { %5496 = vmatprep.subr.bf16.mxu0 %v6116_v39 }
 0x256   :  { %5493 = vmatmul.mubr.msk.bf16.vlgmr.msra.gmra.mxu0 %vm630_vm2, %v6115_v40 }
 0x257   :  { %5497 = vmatpush3.bf16.msra.mxu0 %v6116_v39  ;;  %v6130_v39 = vld [vmem:[#allocation15 + $0x8] sm:$0xff]  }
 0x258   :  { %5498 = vmatprep.subr.bf16.mxu0 %v6117_v41 }
 0x25b   :  { %5499 = vmatpush3.bf16.msra.mxu0 %v6117_v41  ;;  %v4810_v41 = vld [vmem:[#allocation7 + $0x2] ss:$0 sm:$0xff] }
 0x25c   :  { %5500 = vmatprep.subr.bf16.mxu0 %v6118_v42 }
 0x25f   :  { %5501 = vmatpush3.bf16.msra.mxu0 %v6118_v42  ;;  %v588_v42 = vmul.f32 %v4810_v41, %v7014_v29 }
 0x260   :  { %5502 = vmatprep.subr.bf16.mxu0 %v6119_v43 }
 0x263   :  { %5503 = vmatpush3.bf16.msra.mxu0 %v6119_v43  ;;  %v4811_v43 = vld [vmem:[#allocation7 + $0x3] ss:$0 sm:$0xff] }
 0x264   :  { %5504 = vmatprep.subr.bf16.mxu0 %v6120_v44 }
 0x267   :  { %5505 = vmatpush3.bf16.msra.mxu0 %v6120_v44  ;;  %v594_v44 = vadd.f32 %v4811_v43, %v588_v42 }
 0x268   :  { %5506 = vmatprep.subr.bf16.mxu0 %v6121_v45 }
 0x26b   :  { %5507 = vmatpush3.bf16.msra.mxu0 %v6121_v45  ;;  %v595_v45 = vmax.f32 %v594_v44, 0.0 }
 0x26c   :  { %5508 = vmatprep.subr.bf16.mxu0 %v6122_v46 }
 0x26f   :  { %5509 = vmatpush3.bf16.msra.mxu0 %v6122_v46 }
 0x270   :  { %5510 = vmatprep.subr.bf16.mxu0 %v6123_v47 }
 0x273   :  { %5511 = vmatpush3.bf16.msra.mxu0 %v6123_v47 }
 0x316   :  { %v5494_v48 = vpop.f32.mrf.mxu0 }
 0x317   :  { %v760_v52 = vmul.f32 %v5494_v48, %v4822_v49 }
 0x318   :  { %v738_v50 = vpop.f32.mrf.mxu0 }
 0x319   :  { %v758_v51 = vmul.f32 %v4822_v49, %v738_v50  ;;  %v769_v60 = vadd.f32 %v4823_v54, %v760_v52 }
 0x31a   :  { %v5495_v53 = vpop.f32.mrf.mxu0 }
 0x31b   :  { %v761_v55 = vmul.f32 %v5495_v53, %v4822_v49  ;;  %v767_v57 = vadd.f32 %v4823_v54, %v758_v51  ;;  %v773_v2 = vmax.f32 %v769_v60, 0.0  ;;  %v4837_v51 = vld [vmem:[#allocation7 + $0x8] ss:$0 sm:$0xff] }
 0x31c   :  { %v741_v56 = vpop.f32.mrf.mxu0 }
 0x31d   :  { %v770_v58 = vadd.f32 %v4823_v54, %v761_v55  ;;  %v759_v59 = vmul.f32 %v4822_v49, %v741_v56  ;;  %v771_v63 = vmax.f32 %v767_v57, 0.0  ;;  %v4846_v57 = vld [vmem:[#allocation7 + $0x9] ss:$0 sm:$0xff] }
 0x31f   :  { %v768_v61 = vadd.f32 %v4823_v54, %v759_v59  ;;  %v774_v62 = vmax.f32 %v770_v58, 0.0 }
 0x321   :  { %v772_v0 = vmax.f32 %v768_v61, 0.0  ;;  %v792_v4 = vpack.c.bf16 %v774_v62, %v773_v2 }
 0x323   :  { %v791_v3 = vpack.c.bf16 %v772_v0, %v771_v63 }
 0x325   :  { %5512 = vmatprep.mubr.bf16.mxu0 %v791_v3 }
 0x326   :  { %5513 = vmatmul.mubr.bf16.vlgmr.msra.gmra.mxu0 %v792_v4 }
 0x3e6   :  { %v5514_v5 = vpop.f32.mrf.mxu0 }
 0x3e8   :  { %v875_v6 = vpop.f32.mrf.mxu0 }
 0x3ea   :  { %v5515_v7 = vpop.f32.mrf.mxu0 }
 0x3eb   :  { %v891_v8 = vpack.c.bf16 %v5515_v7, %v5514_v5 }
 0x3ec   :  { %v878_v9 = vpop.f32.mrf.mxu0 }
 0x3ed   :  { %v890_v10 = vpack.c.bf16 %v878_v9, %v875_v6  ;;  %5516 = vmatprep.subr.bf16.mxu1 %v891_v8 }
 0x3ee   :  { %5517 = vmatpush3.bf16.msra.mxu1 %v891_v8 }
 0x3ef   :  { %5518 = vmatprep.subr.bf16.mxu1 %v890_v10 }
 0x3f2   :  { %5519 = vmatpush3.bf16.msra.mxu1 %v890_v10 }
 0x3f3   :  { %5524 = vmatprep.subr.bf16.mxu1 %v6621_v1 }
 0x3f5   :  { %5521 = vmatmul.mubr.msk.bf16.vlgmr.msra.gmra.mxu1 %vm630_vm2, %v6115_v40  ;;  %v6131_v40 = vld [vmem:[#allocation15] sm:$0xff]  }
 0x3f6   :  { %5528 = vmatprep.mubr.msk.bf16.mxu1 %vm6622_vm0, %v6621_v1 }
 0x4b5   :  { %v5522_v12 = vpop.f32.mrf.mxu1 }
 0x4b6   :  { %v948_v13 = vmul.f32 %v5522_v12, %v4834_v11 }
 0x4b7   :  { %v926_v15 = vpop.f32.mrf.mxu1 }
 0x4b8   :  { %v957_v17 = vadd.f32 %v4835_v14, %v948_v13  ;;  %v946_v18 = vmul.f32 %v4834_v11, %v926_v15 }
 0x4b9   :  { %v5523_v16 = vpop.f32.mrf.mxu1 }
 0x4ba   :  { %v949_v19 = vmul.f32 %v5523_v16, %v4834_v11  ;;  %v961_v23 = vmax.f32 %v957_v17, 0.0  ;;  %v955_v24 = vadd.f32 %v4835_v14, %v946_v18 }
 0x4bb   :  { %v929_v20 = vpop.f32.mrf.mxu1 }
 0x4bc   :  { %v958_v21 = vadd.f32 %v4835_v14, %v949_v19  ;;  %v947_v22 = vmul.f32 %v4834_v11, %v929_v20  ;;  %v959_v30 = vmax.f32 %v955_v24, 0.0 }
 0x4be   :  { %v962_v25 = vmax.f32 %v958_v21, 0.0  ;;  %v956_v26 = vadd.f32 %v4835_v14, %v947_v22 }
 0x4c0   :  { %v965_v27 = vpack.c.bf16 %v962_v25, %v961_v23  ;;  %v960_v28 = vmax.f32 %v956_v26, 0.0 }
 0x4c2   :  { %5525 = vmatpush3.bf16.msra.mxu1 %v965_v27  ;;  %v964_v31 = vpack.c.bf16 %v960_v28, %v959_v30 }
 0x4c3   :  { %5526 = vmatprep.subr.bf16.mxu1 %v6621_v1 }
 0x4c6   :  { %5527 = vmatpush3.bf16.msra.mxu1 %v964_v31 }
 0x4c7   :  { %5532 = vmatprep.subr.bf16.mxu1 %v6621_v1 }
 0x4c9   :  { %5529 = vmatmul.mubr.msk.bf16.vlgmr.msra.gmra.mxu1 %vm630_vm2, %v963_v32 }
 0x4ca   :  { %5533 = vmatpush3.bf16.msra.mxu1 %v6124_v33  ;;  %5548 = vmatprep.mubr.msk.bf16.mxu1 %vm6622_vm0, %v6621_v1 }
 0x4cb   :  { %5534 = vmatprep.subr.bf16.mxu1 %v6621_v1 }
 0x4ce   :  { %5535 = vmatpush3.bf16.msra.mxu1 %v6125_v34 }
 0x4cf   :  { %5536 = vmatprep.subr.bf16.mxu1 %v6621_v1 }
 0x4d2   :  { %5537 = vmatpush3.bf16.msra.mxu1 %v6126_v35 }
 0x4d3   :  { %5538 = vmatprep.subr.bf16.mxu1 %v6621_v1 }
 0x4d6   :  { %5539 = vmatpush3.bf16.msra.mxu1 %v6127_v36 }
 0x4d7   :  { %5540 = vmatprep.subr.bf16.mxu1 %v6621_v1 }
 0x4da   :  { %5541 = vmatpush3.bf16.msra.mxu1 %v6128_v37 }
 0x4db   :  { %5542 = vmatprep.subr.bf16.mxu1 %v6621_v1 }
 0x4de   :  { %5543 = vmatpush3.bf16.msra.mxu1 %v6129_v38 }
 0x4df   :  { %5544 = vmatprep.subr.bf16.mxu1 %v6621_v1 }
 0x4e2   :  { %5545 = vmatpush3.bf16.msra.mxu1 %v6130_v39 }
 0x4e3   :  { %5546 = vmatprep.subr.bf16.mxu1 %v6621_v1 }
 0x4e6   :  { %5547 = vmatpush3.bf16.msra.mxu1 %v6131_v40 }
 0x589   :  { %v1003_v46 = vpop.f32.mrf.mxu1 }
 0x58a   :  { %v1025_v47 = vpack.c.bf16 %v595_v45, %v1003_v46 }
 0x58b   :  { %v5530_v48 = vpop.f32.mrf.mxu1 }
 0x58c   :  { %5549 = vmatmul.mubr.bf16.vlgmr.msra.gmra.mxu1 %v1025_v47 }
 0x58d   :  { %v1006_v49 = vpop.f32.mrf.mxu1 }
 0x58f   :  { %v5531_v50 = vpop.f32.mrf.mxu1 }
 0x64c   :  { %v1113_v52 = vpop.f32.mrf.mxu1 }
 0x64d   :  { %v1114_v53 = vadd.f32 %v4837_v51, %v1113_v52 }
 0x64e   :  { %v5550_v54 = vpop.f32.mrf.mxu1 }
 0x64f   :  { %6132 = vtanh.f32 %v1114_v53 }
 0x650   :  { %v1116_v1 = vpop.f32.mrf.mxu1 }
 0x651   :  { %v1117_v55 = vadd.f32 %v4837_v51, %v1116_v1 }
 0x652   :  { %v5551_v56 = vpop.f32.mrf.mxu1 }
 0x653   :  { %6134 = vtanh.f32 %v1117_v55 }
 0x65c   :  { %v6133_v29 = vpop.eup %6132 }
 0x65d   :  { %v1127_v58 = vmul.f32 %v6133_v29, %v4846_v57 }
 0x65f   :  { %1129 = vadd.xlane.f32.xlu0 %v1127_v58 }
 0x660   :  { %v6135_v59 = vpop.eup %6134 }
 0x661   :  { %v1128_v60 = vmul.f32 %v6135_v59, %v4846_v57 }
 0x663   :  { %1131 = vadd.xlane.f32.xlu0 %v1128_v60 }
 0x664   :  { %6589 = shalt.err (!%p6586_p3)  }
 0x665   :  { %387 = dma.hbm_to_vmem [thread:$0]  %s7244_s14, 8192, %s385_s3, [#allocation4 + $0x1]  ;;  %v1154_v61 = vld [vmem:[#allocation5] sm:$0xff]  ;;  %v1155_v62 = vld [vmem:[#allocation5 + $0x8] sm:$0xff]  ;;  %v1156_v63 = vld [vmem:[#allocation5 + $0x10] sm:$0xff]  ;;  %v1147_v11 = vlaneseq }
 0x667   :  { %v1148_v12 = vand.u32 127, %v1147_v11 }
 0x669   :  { %vm1150_vm3 = vcmp.eq.s32.totalorder %v1148_v12, 1  ;;  %vm1149_vm4 = vcmp.eq.s32.totalorder %v1148_v12, 0 }
 0x6e8   :  { %v1130_v0 = vpop.xlane.xlu0 %1129 }
 0x6ec   :  { %v1132_v2 = vpop.xlane.xlu0 %1131 }
 0x6ed   :  { %v1133_v3 = vmax.f32 %v1130_v0, %v1132_v2 }
 0x6ef   :  { %v1134_v4 = vsub.f32 %v1130_v0, %v1133_v3  ;;  %v1137_v5 = vsub.f32 %v1132_v2, %v1133_v3 }
 0x6f1   :  { %v1135_v6 = vmul.f32 1.442695, %v1134_v4  ;;  %v1138_v7 = vmul.f32 1.442695, %v1137_v5 }
 0x6f3   :  { %6136 = vpow2.f32 %v1135_v6 }
 0x6f4   :  { %6138 = vpow2.f32 %v1138_v7 }
 0x700   :  { %v6137_v8 = vpop.eup %6136 }
 0x701   :  { %v6139_v9 = vpop.eup %6138 }
 0x702   :  { %v1140_v10 = vadd.f32 %v6139_v9, %v6137_v8 }
 0x704   :  { %6140 = vrcp.f32 %v1140_v10 }
 0x711   :  { %v6141_v13 = vpop.eup %6140 }
 0x712   :  { %v1142_v14 = vmul.f32 %v6141_v13, %v6137_v8  ;;  %v1143_v15 = vmul.f32 %v6141_v13, %v6139_v9 }
 0x714   :  { %v1144_v16 = vmul.f32 %v1142_v14, %v1003_v46  ;;  %v1145_v17 = vmul.f32 %v1143_v15, %v595_v45  ;;  %v1151_v18 = vsel %vm1150_vm3, %v1143_v15, 0.0 }
 0x715   :  { %v1152_v19 = vsel %vm1149_vm4, %v1142_v14, %v1151_v18 }
 0x716   :  { %v1146_v20 = vadd.f32 %v1145_v17, %v1144_v16  ;;  %1153 = vst [vmem:[%s7249_s19] sm:$0xff] %v1152_v19 }
 0x717   :  { %6602 = dma.done.wait [#allocation4], 8192 }
 0x718   :  { %6603 = vsyncadd [#allocation4], 4294959104  ;;  %v7046_v21 = vpack.c.bf16 %v1154_v61, %v1146_v20  ;;  %v6142_v22 = vld [vmem:[#allocation2 + $0x38] sm:$0xff]   ;;  %v6143_v23 = vld [vmem:[#allocation2 + $0x30] sm:$0xff]   ;;  %v7049_v32 = vpack.c.bf16 %v1156_v63, %v1155_v62 }
 0x719   :  { %5552 = vmatprep.subr.bf16.mxu0 %v6142_v22  ;;  %v6144_v24 = vld [vmem:[#allocation2 + $0x28] sm:$0xff]   ;;  %v6145_v25 = vld [vmem:[#allocation2 + $0x20] sm:$0xff]   ;;  %v6146_v26 = vld [vmem:[#allocation2 + $0x18] sm:$0xff]  }
 0x71a   :  { %5568 = vmatprep.mubr.bf16.mxu0 %v7046_v21  ;;  %5553 = vmatpush3.bf16.msra.mxu0 %v6142_v22  ;;  %v6147_v27 = vld [vmem:[#allocation2 + $0x10] sm:$0xff]   ;;  %v6148_v28 = vld [vmem:[#allocation2 + $0x8] sm:$0xff]   ;;  %v6149_v30 = vld [vmem:[#allocation2] sm:$0xff]  }
 0x71b   :  { %5554 = vmatprep.subr.bf16.mxu0 %v6143_v23  ;;  %v6150_v31 = vld [vmem:[#allocation2 + $0x78] sm:$0xff]   ;;  %v6151_v33 = vld [vmem:[#allocation2 + $0x70] sm:$0xff]   ;;  %v6152_v34 = vld [vmem:[#allocation2 + $0x68] sm:$0xff]  }
 0x71c   :  { %v6153_v35 = vld [vmem:[#allocation2 + $0x60] sm:$0xff]   ;;  %v6154_v36 = vld [vmem:[#allocation2 + $0x58] sm:$0xff]   ;;  %v6155_v37 = vld [vmem:[#allocation2 + $0x50] sm:$0xff]  }
 0x71d   :  { %v6156_v38 = vld [vmem:[#allocation2 + $0x48] sm:$0xff]   ;;  %v6157_v39 = vld [vmem:[#allocation2 + $0x40] sm:$0xff]   ;;  %v6158_v40 = vld [vmem:[#allocation2 + $0xb8] sm:$0xff]  }
 0x71e   :  { %5555 = vmatpush3.bf16.msra.mxu0 %v6143_v23  ;;  %v6159_v41 = vld [vmem:[#allocation2 + $0xb0] sm:$0xff]   ;;  %v6160_v42 = vld [vmem:[#allocation2 + $0xa8] sm:$0xff]   ;;  %v6161_v43 = vld [vmem:[#allocation2 + $0xa0] sm:$0xff]  }
 0x71f   :  { %5556 = vmatprep.subr.bf16.mxu0 %v6144_v24  ;;  %v6162_v44 = vld [vmem:[#allocation2 + $0x98] sm:$0xff]   ;;  %v6163_v45 = vld [vmem:[#allocation2 + $0x90] sm:$0xff]   ;;  %v6164_v46 = vld [vmem:[#allocation2 + $0x88] sm:$0xff]  }
 0x720   :  { %v6165_v47 = vld [vmem:[#allocation2 + $0x80] sm:$0xff]   ;;  %v6167_v1 = vld [vmem:[#allocation16 + $0x38] sm:$0xff]   ;;  %v6168_v55 = vld [vmem:[%s7235_s5 + $0x8] sm:$0xff]  }
 0x721   :  { %v6166_v48 = vld [vmem:[%s7235_s5] sm:$0xff]   ;;  %v6169_v56 = vld [vmem:[#allocation16 + $0x30] sm:$0xff]   ;;  %v6170_v57 = vld [vmem:[#allocation16 + $0x28] sm:$0xff]  }
 0x722   :  { %5557 = vmatpush3.bf16.msra.mxu0 %v6144_v24  ;;  %5576 = vmatprep.mubr.msk.bf16.mxu1 %vm630_vm2, %v6166_v48  ;;  %v6171_v29 = vld [vmem:[#allocation16 + $0x20] sm:$0xff]   ;;  %v6172_v58 = vld [vmem:[#allocation16 + $0x18] sm:$0xff]   ;;  %v6173_v59 = vld [vmem:[#allocation16 + $0x10] sm:$0xff]  }
 0x723   :  { %5558 = vmatprep.subr.bf16.mxu0 %v6145_v25  ;;  %v6174_v61 = vld [vmem:[#allocation16 + $0x8] sm:$0xff]   ;;  %v6175_v63 = vld [vmem:[#allocation16] sm:$0xff]   ;;  %v6176_v4 = vld [vmem:[%s7235_s5 + $0x10] sm:$0xff]  }
 0x724   :  { %v6177_v6 = vld [vmem:[%s7235_s5 + $0x18] sm:$0xff]   ;;  %v6178_v7 = vld [vmem:[%s7235_s5 + $0x20] sm:$0xff]   ;;  %v6179_v15 = vld [vmem:[%s7235_s5 + $0x28] sm:$0xff]  }
 0x725   :  { %v6180_v14 = vld [vmem:[#allocation2 + $0xf8] sm:$0xff]   ;;  %v6181_v16 = vld [vmem:[#allocation2 + $0xf0] sm:$0xff]   ;;  %v6182_v17 = vld [vmem:[#allocation2 + $0xe8] sm:$0xff]  }
 0x726   :  { %5559 = vmatpush3.bf16.msra.mxu0 %v6145_v25  ;;  %v6183_v18 = vld [vmem:[#allocation2 + $0xe0] sm:$0xff]   ;;  %v6184_v19 = vld [vmem:[#allocation2 + $0xd8] sm:$0xff]   ;;  %v6185_v20 = vld [vmem:[#allocation2 + $0xd0] sm:$0xff]  }
 0x727   :  { %5560 = vmatprep.subr.bf16.mxu0 %v6146_v26  ;;  %v6186_v22 = vld [vmem:[#allocation2 + $0xc8] sm:$0xff]   ;;  %v6187_v23 = vld [vmem:[#allocation2 + $0xc0] sm:$0xff]   ;;  %v6188_v24 = vld [vmem:[%s7235_s5 + $0x30] sm:$0xff]  }
 0x72a   :  { %5561 = vmatpush3.bf16.msra.mxu0 %v6146_v26 }
 0x72b   :  { %5562 = vmatprep.subr.bf16.mxu0 %v6147_v27 }
 0x72e   :  { %5563 = vmatpush3.bf16.msra.mxu0 %v6147_v27 }
 0x72f   :  { %5564 = vmatprep.subr.bf16.mxu0 %v6148_v28 }
 0x732   :  { %5565 = vmatpush3.bf16.msra.mxu0 %v6148_v28 }
 0x733   :  { %5566 = vmatprep.subr.bf16.mxu0 %v6149_v30 }
 0x736   :  { %5567 = vmatpush3.bf16.msra.mxu0 %v6149_v30 }
 0x737   :  { %5600 = vmatprep.subr.bf16.mxu0 %v6150_v31 }
 0x739   :  { %5569 = vmatmul.mubr.bf16.vlgmr.msra.gmra.mxu0 %v7049_v32 }
 0x73a   :  { %5601 = vmatpush3.bf16.msra.mxu0 %v6150_v31  ;;  %5616 = vmatprep.mubr.bf16.mxu0 %v7046_v21 }
 0x73b   :  { %5602 = vmatprep.subr.bf16.mxu0 %v6151_v33 }
 0x73e   :  { %5603 = vmatpush3.bf16.msra.mxu0 %v6151_v33 }
 0x73f   :  { %5604 = vmatprep.subr.bf16.mxu0 %v6152_v34 }
 0x742   :  { %5605 = vmatpush3.bf16.msra.mxu0 %v6152_v34 }
 0x743   :  { %5606 = vmatprep.subr.bf16.mxu0 %v6153_v35 }
 0x746   :  { %5607 = vmatpush3.bf16.msra.mxu0 %v6153_v35 }
 0x747   :  { %5608 = vmatprep.subr.bf16.mxu0 %v6154_v36 }
 0x74a   :  { %5609 = vmatpush3.bf16.msra.mxu0 %v6154_v36 }
 0x74b   :  { %5610 = vmatprep.subr.bf16.mxu0 %v6155_v37 }
 0x74e   :  { %5611 = vmatpush3.bf16.msra.mxu0 %v6155_v37 }
 0x74f   :  { %5612 = vmatprep.subr.bf16.mxu0 %v6156_v38 }
 0x752   :  { %5613 = vmatpush3.bf16.msra.mxu0 %v6156_v38 }
 0x753   :  { %5614 = vmatprep.subr.bf16.mxu0 %v6157_v39 }
 0x756   :  { %5615 = vmatpush3.bf16.msra.mxu0 %v6157_v39 }
 0x757   :  { %5628 = vmatprep.subr.bf16.mxu0 %v6158_v40 }
 0x759   :  { %5617 = vmatmul.mubr.bf16.vlgmr.msra.gmra.mxu0 %v7049_v32 }
 0x75a   :  { %5629 = vmatpush3.bf16.msra.mxu0 %v6158_v40  ;;  %5644 = vmatprep.mubr.bf16.mxu0 %v7046_v21 }
 0x75b   :  { %5630 = vmatprep.subr.bf16.mxu0 %v6159_v41 }
 0x75e   :  { %5631 = vmatpush3.bf16.msra.mxu0 %v6159_v41 }
 0x75f   :  { %5632 = vmatprep.subr.bf16.mxu0 %v6160_v42 }
 0x762   :  { %5633 = vmatpush3.bf16.msra.mxu0 %v6160_v42 }
 0x763   :  { %5634 = vmatprep.subr.bf16.mxu0 %v6161_v43 }
 0x766   :  { %5635 = vmatpush3.bf16.msra.mxu0 %v6161_v43 }
 0x767   :  { %5636 = vmatprep.subr.bf16.mxu0 %v6162_v44 }
 0x76a   :  { %5637 = vmatpush3.bf16.msra.mxu0 %v6162_v44 }
 0x76b   :  { %5638 = vmatprep.subr.bf16.mxu0 %v6163_v45 }
 0x76e   :  { %5639 = vmatpush3.bf16.msra.mxu0 %v6163_v45 }
 0x76f   :  { %5640 = vmatprep.subr.bf16.mxu0 %v6164_v46 }
 0x772   :  { %5641 = vmatpush3.bf16.msra.mxu0 %v6164_v46 }
 0x773   :  { %5642 = vmatprep.subr.bf16.mxu0 %v6165_v47 }
 0x776   :  { %5643 = vmatpush3.bf16.msra.mxu0 %v6165_v47 }
 0x779   :  { %5645 = vmatmul.mubr.bf16.vlgmr.msra.gmra.mxu0 %v7049_v32 }
 0x77a   :  { %5680 = vmatprep.mubr.msk.bf16.mxu0 %vm630_vm2, %v6188_v24  ;;  %v6202_v24 = vld [vmem:[#allocation2 + $0x168] sm:$0xff]  }
 0x7f9   :  { %v5570_v49 = vpop.f32.mrf.mxu0 }
 0x7fb   :  { %v1284_v50 = vpop.f32.mrf.mxu0 }
 0x7fd   :  { %v5571_v51 = vpop.f32.mrf.mxu0 }
 0x7fe   :  { %v1300_v52 = vpack.c.bf16 %v5571_v51, %v5570_v49 }
 0x7ff   :  { %v1287_v53 = vpop.f32.mrf.mxu0 }
 0x800   :  { %v1299_v54 = vpack.c.bf16 %v1287_v53, %v1284_v50  ;;  %5572 = vmatprep.subr.bf16.mxu1 %v1300_v52 }
 0x801   :  { %5573 = vmatpush3.bf16.msra.mxu1 %v1300_v52 }
 0x802   :  { %5574 = vmatprep.subr.bf16.mxu1 %v1299_v54 }
 0x805   :  { %5575 = vmatpush3.bf16.msra.mxu1 %v1299_v54 }
 0x806   :  { %5580 = vmatprep.subr.bf16.mxu1 %v6167_v1 }
 0x808   :  { %5577 = vmatmul.mubr.msk.bf16.vlgmr.msra.gmra.mxu1 %vm630_vm2, %v6168_v55 }
 0x809   :  { %5581 = vmatpush3.bf16.msra.mxu1 %v6167_v1  ;;  %5596 = vmatprep.mubr.bf16.mxu1 %v7046_v21 }
 0x80a   :  { %5582 = vmatprep.subr.bf16.mxu1 %v6169_v56 }
 0x80d   :  { %5583 = vmatpush3.bf16.msra.mxu1 %v6169_v56 }
 0x80e   :  { %5584 = vmatprep.subr.bf16.mxu1 %v6170_v57 }
 0x811   :  { %5585 = vmatpush3.bf16.msra.mxu1 %v6170_v57 }
 0x812   :  { %5586 = vmatprep.subr.bf16.mxu1 %v6171_v29 }
 0x815   :  { %5587 = vmatpush3.bf16.msra.mxu1 %v6171_v29 }
 0x816   :  { %5588 = vmatprep.subr.bf16.mxu1 %v6172_v58 }
 0x819   :  { %5589 = vmatpush3.bf16.msra.mxu1 %v6172_v58  ;;  %v5618_v60 = vpop.f32.mrf.mxu0 }
 0x81a   :  { %5590 = vmatprep.subr.bf16.mxu1 %v6173_v59 }
 0x81b   :  { %v1567_v62 = vpop.f32.mrf.mxu0 }
 0x81d   :  { %5591 = vmatpush3.bf16.msra.mxu1 %v6173_v59  ;;  %v5619_v0 = vpop.f32.mrf.mxu0  ;;  %v6190_v59 = vld [vmem:[#allocation2 + $0x138] sm:$0xff]  }
 0x81e   :  { %5592 = vmatprep.subr.bf16.mxu1 %v6174_v61  ;;  %v1583_v2 = vpack.c.bf16 %v5619_v0, %v5618_v60  ;;  %v6189_v60 = vld [vmem:[%s7235_s5 + $0x38] sm:$0xff]  }
 0x81f   :  { %v1570_v3 = vpop.f32.mrf.mxu0  ;;  %v6194_v0 = vld [vmem:[#allocation2 + $0x118] sm:$0xff]  }
 0x820   :  { %v1582_v5 = vpack.c.bf16 %v1570_v3, %v1567_v62  ;;  %v6192_v62 = vld [vmem:[#allocation2 + $0x128] sm:$0xff]  }
 0x821   :  { %5593 = vmatpush3.bf16.msra.mxu1 %v6174_v61  ;;  %v6191_v61 = vld [vmem:[#allocation2 + $0x130] sm:$0xff]   ;;  %v6196_v3 = vld [vmem:[#allocation2 + $0x108] sm:$0xff]  }
 0x822   :  { %5594 = vmatprep.subr.bf16.mxu1 %v6175_v63 }
 0x825   :  { %5595 = vmatpush3.bf16.msra.mxu1 %v6175_v63  ;;  %v6193_v63 = vld [vmem:[#allocation2 + $0x120] sm:$0xff]  }
 0x826   :  { %5620 = vmatprep.subr.bf16.mxu1 %v1583_v2 }
 0x828   :  { %5597 = vmatmul.mubr.bf16.vlgmr.msra.gmra.mxu1 %v7049_v32 }
 0x829   :  { %5621 = vmatpush3.bf16.msra.mxu1 %v1583_v2  ;;  %5624 = vmatprep.mubr.msk.bf16.mxu1 %vm630_vm2, %v6176_v4  ;;  %v6195_v2 = vld [vmem:[#allocation2 + $0x110] sm:$0xff]   ;;  %v6197_v4 = vld [vmem:[#allocation2 + $0x100] sm:$0xff]  }
 0x82a   :  { %5622 = vmatprep.subr.bf16.mxu1 %v1582_v5 }
 0x82d   :  { %5623 = vmatpush3.bf16.msra.mxu1 %v1582_v5  ;;  %v6198_v5 = vld [vmem:[%s7235_s5 + $0x40] sm:$0xff]  }
 0x830   :  { %5625 = vmatmul.mubr.msk.bf16.vlgmr.msra.gmra.mxu1 %vm630_vm2, %v6177_v6 }
 0x831   :  { %5652 = vmatprep.mubr.msk.bf16.mxu1 %vm630_vm2, %v6178_v7 }
 0x839   :  { %v5646_v8 = vpop.f32.mrf.mxu0 }
 0x83b   :  { %v1757_v9 = vpop.f32.mrf.mxu0 }
 0x83d   :  { %v5647_v10 = vpop.f32.mrf.mxu0 }
 0x83e   :  { %v1773_v11 = vpack.c.bf16 %v5647_v10, %v5646_v8 }
 0x83f   :  { %v1760_v12 = vpop.f32.mrf.mxu0 }
 0x840   :  { %v1772_v13 = vpack.c.bf16 %v1760_v12, %v1757_v9  ;;  %5648 = vmatprep.subr.bf16.mxu1 %v1773_v11 }
 0x841   :  { %5649 = vmatpush3.bf16.msra.mxu1 %v1773_v11 }
 0x842   :  { %5650 = vmatprep.subr.bf16.mxu1 %v1772_v13 }
 0x845   :  { %5651 = vmatpush3.bf16.msra.mxu1 %v1772_v13 }
 0x846   :  { %5656 = vmatprep.subr.bf16.mxu1 %v6180_v14 }
 0x848   :  { %5653 = vmatmul.mubr.msk.bf16.vlgmr.msra.gmra.mxu1 %vm630_vm2, %v6179_v15 }
 0x849   :  { %5657 = vmatpush3.bf16.msra.mxu1 %v6180_v14  ;;  %5672 = vmatprep.mubr.bf16.mxu1 %v7046_v21 }
 0x84a   :  { %5658 = vmatprep.subr.bf16.mxu1 %v6181_v16 }
 0x84d   :  { %5659 = vmatpush3.bf16.msra.mxu1 %v6181_v16 }
 0x84e   :  { %5660 = vmatprep.subr.bf16.mxu1 %v6182_v17 }
 0x851   :  { %5661 = vmatpush3.bf16.msra.mxu1 %v6182_v17 }
 0x852   :  { %5662 = vmatprep.subr.bf16.mxu1 %v6183_v18 }
 0x855   :  { %5663 = vmatpush3.bf16.msra.mxu1 %v6183_v18 }
 0x856   :  { %5664 = vmatprep.subr.bf16.mxu1 %v6184_v19 }
 0x859   :  { %5665 = vmatpush3.bf16.msra.mxu1 %v6184_v19 }
 0x85a   :  { %5666 = vmatprep.subr.bf16.mxu1 %v6185_v20 }
 0x85d   :  { %5667 = vmatpush3.bf16.msra.mxu1 %v6185_v20  ;;  %v6200_v20 = vld [vmem:[#allocation2 + $0x178] sm:$0xff]  }
 0x85e   :  { %5668 = vmatprep.subr.bf16.mxu1 %v6186_v22 }
 0x861   :  { %5669 = vmatpush3.bf16.msra.mxu1 %v6186_v22  ;;  %v6199_v22 = vld [vmem:[%s7235_s5 + $0x48] sm:$0xff]  }
 0x862   :  { %5670 = vmatprep.subr.bf16.mxu1 %v6187_v23 }
 0x865   :  { %5671 = vmatpush3.bf16.msra.mxu1 %v6187_v23  ;;  %v6201_v23 = vld [vmem:[#allocation2 + $0x170] sm:$0xff]  }
 0x868   :  { %5673 = vmatmul.mubr.bf16.vlgmr.msra.gmra.mxu1 %v7049_v32 }
 0x869   :  { %5708 = vmatprep.mubr.msk.bf16.mxu1 %vm630_vm2, %v6198_v5 }
 0x8c8   :  { %v5578_v25 = vpop.f32.mrf.mxu1 }
 0x8ca   :  { %v1351_v26 = vpop.f32.mrf.mxu1 }
 0x8cc   :  { %v5579_v27 = vpop.f32.mrf.mxu1 }
 0x8ce   :  { %v1354_v28 = vpop.f32.mrf.mxu1 }
 0x8e8   :  { %v5598_v30 = vpop.f32.mrf.mxu1 }
 0x8e9   :  { %v1457_v31 = vadd.f32 %v5598_v30, %v5578_v25  ;;  %v6203_v25 = vld [vmem:[#allocation2 + $0x160] sm:$0xff]  }
 0x8ea   :  { %v1448_v33 = vpop.f32.mrf.mxu1  ;;  %v6207_v30 = vld [vmem:[#allocation2 + $0x140] sm:$0xff]  }
 0x8eb   :  { %v1449_v34 = vadd.f32 %v1448_v33, %v1351_v26  ;;  %v6204_v26 = vld [vmem:[#allocation2 + $0x158] sm:$0xff]  }
 0x8ec   :  { %v5599_v35 = vpop.f32.mrf.mxu1 }
 0x8ed   :  { %v1460_v36 = vadd.f32 %v5599_v35, %v5579_v27  ;;  %v6205_v27 = vld [vmem:[#allocation2 + $0x150] sm:$0xff]  }
 0x8ee   :  { %v1451_v37 = vpop.f32.mrf.mxu1 }
 0x8ef   :  { %v1452_v38 = vadd.f32 %v1451_v37, %v1354_v28  ;;  %v6206_v28 = vld [vmem:[#allocation2 + $0x148] sm:$0xff]  }
 0x8f0   :  { %v5626_v39 = vpop.f32.mrf.mxu1 }
 0x8f1   :  { %v1651_v40 = vadd.f32 %v5626_v39, %v1457_v31  ;;  %v6208_v31 = vld [vmem:[%s7235_s5 + $0x50] sm:$0xff]  }
 0x8f2   :  { %v1634_v41 = vpop.f32.mrf.mxu1 }
 0x8f3   :  { %v1649_v42 = vadd.f32 %v1634_v41, %v1449_v34 }
 0x8f4   :  { %v5627_v43 = vpop.f32.mrf.mxu1 }
 0x8f5   :  { %v1652_v44 = vadd.f32 %v5627_v43, %v1460_v36 }
 0x8f6   :  { %v1637_v45 = vpop.f32.mrf.mxu1 }
 0x8f7   :  { %v1650_v46 = vadd.f32 %v1637_v45, %v1452_v38 }
 0x908   :  { %v5654_v47 = vpop.f32.mrf.mxu1 }
 0x909   :  { %v1841_v48 = vadd.f32 %v5654_v47, %v1651_v40  ;;  %v6210_v47 = vld [vmem:[#allocation2 + $0x1b8] sm:$0xff]  }
 0x90a   :  { %v1824_v49 = vpop.f32.mrf.mxu1 }
 0x90b   :  { %v1839_v50 = vadd.f32 %v1824_v49, %v1649_v42  ;;  %v6211_v49 = vld [vmem:[#allocation2 + $0x1b0] sm:$0xff]  }
 0x90c   :  { %v5655_v51 = vpop.f32.mrf.mxu1 }
 0x90d   :  { %v1842_v52 = vadd.f32 %v5655_v51, %v1652_v44  ;;  %v6213_v51 = vld [vmem:[#allocation2 + $0x1a0] sm:$0xff]  }
 0x90e   :  { %v1827_v53 = vpop.f32.mrf.mxu1 }
 0x90f   :  { %v1840_v54 = vadd.f32 %v1827_v53, %v1650_v46  ;;  %v6215_v53 = vld [vmem:[#allocation2 + $0x190] sm:$0xff]  }
 0x928   :  { %v5674_v1 = vpop.f32.mrf.mxu1 }
 0x92a   :  { %v1947_v55 = vpop.f32.mrf.mxu1 }
 0x92c   :  { %v5675_v56 = vpop.f32.mrf.mxu1 }
 0x92d   :  { %v1963_v57 = vpack.c.bf16 %v5675_v56, %v5674_v1  ;;  %v6217_v1 = vld [vmem:[#allocation2 + $0x180] sm:$0xff]  }
 0x92e   :  { %v1950_v29 = vpop.f32.mrf.mxu1 }
 0x92f   :  { %v1962_v58 = vpack.c.bf16 %v1950_v29, %v1947_v55  ;;  %5676 = vmatprep.subr.bf16.mxu0 %v1963_v57  ;;  %v6218_v55 = vld [vmem:[%s7235_s5 + $0x60] sm:$0xff]  }
 0x930   :  { %5677 = vmatpush3.bf16.msra.mxu0 %v1963_v57 }
 0x931   :  { %5678 = vmatprep.subr.bf16.mxu0 %v1962_v58 }
 0x934   :  { %5679 = vmatpush3.bf16.msra.mxu0 %v1962_v58 }
 0x935   :  { %5684 = vmatprep.subr.bf16.mxu0 %v6190_v59 }
 0x937   :  { %5681 = vmatmul.mubr.msk.bf16.vlgmr.msra.gmra.mxu0 %vm630_vm2, %v6189_v60 }
 0x938   :  { %5685 = vmatpush3.bf16.msra.mxu0 %v6190_v59  ;;  %5700 = vmatprep.mubr.bf16.mxu0 %v7046_v21 }
 0x939   :  { %5686 = vmatprep.subr.bf16.mxu0 %v6191_v61 }
 0x93c   :  { %5687 = vmatpush3.bf16.msra.mxu0 %v6191_v61 }
 0x93d   :  { %5688 = vmatprep.subr.bf16.mxu0 %v6192_v62 }
 0x940   :  { %5689 = vmatpush3.bf16.msra.mxu0 %v6192_v62 }
 0x941   :  { %5690 = vmatprep.subr.bf16.mxu0 %v6193_v63 }
 0x944   :  { %5691 = vmatpush3.bf16.msra.mxu0 %v6193_v63 }
 0x945   :  { %5692 = vmatprep.subr.bf16.mxu0 %v6194_v0 }
 0x948   :  { %5693 = vmatpush3.bf16.msra.mxu0 %v6194_v0 }
 0x949   :  { %5694 = vmatprep.subr.bf16.mxu0 %v6195_v2 }
 0x94c   :  { %5695 = vmatpush3.bf16.msra.mxu0 %v6195_v2 }
 0x94d   :  { %5696 = vmatprep.subr.bf16.mxu0 %v6196_v3 }
 0x950   :  { %5697 = vmatpush3.bf16.msra.mxu0 %v6196_v3 }
 0x951   :  { %5698 = vmatprep.subr.bf16.mxu0 %v6197_v4 }
 0x954   :  { %5699 = vmatpush3.bf16.msra.mxu0 %v6197_v4 }
 0x957   :  { %5701 = vmatmul.mubr.bf16.vlgmr.msra.gmra.mxu0 %v7049_v32 }
 0x958   :  { %5736 = vmatprep.mubr.msk.bf16.mxu0 %vm630_vm2, %v6208_v31  ;;  %v4979_v31 = vld [vmem:[#allocation7 + $0xa] ss:$0 sm:$0xff] }
 0x9f7   :  { %v5682_v6 = vpop.f32.mrf.mxu0 }
 0x9f8   :  { %v2031_v7 = vadd.f32 %v5682_v6, %v1841_v48  ;;  %v6209_v48 = vld [vmem:[%s7235_s5 + $0x58] sm:$0xff]  }
 0x9f9   :  { %v2014_v8 = vpop.f32.mrf.mxu0  ;;  %v6220_v6 = vld [vmem:[#allocation2 + $0x1f8] sm:$0xff]  }
 0x9fa   :  { %v2029_v9 = vadd.f32 %v2014_v8, %v1839_v50  ;;  %v6212_v50 = vld [vmem:[#allocation2 + $0x1a8] sm:$0xff]   ;;  %v6221_v8 = vld [vmem:[#allocation2 + $0x1f0] sm:$0xff]  }
 0x9fb   :  { %v5683_v10 = vpop.f32.mrf.mxu0 }
 0x9fc   :  { %v2032_v11 = vadd.f32 %v5683_v10, %v1842_v52  ;;  %v6214_v52 = vld [vmem:[#allocation2 + $0x198] sm:$0xff]   ;;  %v6223_v10 = vld [vmem:[#allocation2 + $0x1e0] sm:$0xff]  }
 0x9fd   :  { %v2017_v12 = vpop.f32.mrf.mxu0 }
 0x9fe   :  { %v2030_v13 = vadd.f32 %v2017_v12, %v1840_v54  ;;  %v6216_v54 = vld [vmem:[#allocation2 + $0x188] sm:$0xff]   ;;  %v6225_v12 = vld [vmem:[#allocation2 + $0x1d0] sm:$0xff]  }
 0xa17   :  { %v5702_v14 = vpop.f32.mrf.mxu0 }
 0xa19   :  { %v2137_v15 = vpop.f32.mrf.mxu0 }
 0xa1b   :  { %v5703_v16 = vpop.f32.mrf.mxu0 }
 0xa1c   :  { %v2153_v17 = vpack.c.bf16 %v5703_v16, %v5702_v14  ;;  %v6227_v14 = vld [vmem:[#allocation2 + $0x1c0] sm:$0xff]  }
 0xa1d   :  { %v2140_v18 = vpop.f32.mrf.mxu0 }
 0xa1e   :  { %v2152_v19 = vpack.c.bf16 %v2140_v18, %v2137_v15  ;;  %5704 = vmatprep.subr.bf16.mxu1 %v2153_v17 }
 0xa1f   :  { %5705 = vmatpush3.bf16.msra.mxu1 %v2153_v17 }
 0xa20   :  { %5706 = vmatprep.subr.bf16.mxu1 %v2152_v19 }
 0xa23   :  { %5707 = vmatpush3.bf16.msra.mxu1 %v2152_v19 }
 0xa24   :  { %5712 = vmatprep.subr.bf16.mxu1 %v6200_v20 }
 0xa26   :  { %5709 = vmatmul.mubr.msk.bf16.vlgmr.msra.gmra.mxu1 %vm630_vm2, %v6199_v22 }
 0xa27   :  { %5713 = vmatpush3.bf16.msra.mxu1 %v6200_v20  ;;  %5728 = vmatprep.mubr.bf16.mxu1 %v7046_v21 }
 0xa28   :  { %5714 = vmatprep.subr.bf16.mxu1 %v6201_v23 }
 0xa2b   :  { %5715 = vmatpush3.bf16.msra.mxu1 %v6201_v23 }
 0xa2c   :  { %5716 = vmatprep.subr.bf16.mxu1 %v6202_v24 }
 0xa2f   :  { %5717 = vmatpush3.bf16.msra.mxu1 %v6202_v24 }
 0xa30   :  { %5718 = vmatprep.subr.bf16.mxu1 %v6203_v25 }
 0xa33   :  { %5719 = vmatpush3.bf16.msra.mxu1 %v6203_v25 }
 0xa34   :  { %5720 = vmatprep.subr.bf16.mxu1 %v6204_v26 }
 0xa37   :  { %5721 = vmatpush3.bf16.msra.mxu1 %v6204_v26 }
 0xa38   :  { %5722 = vmatprep.subr.bf16.mxu1 %v6205_v27 }
 0xa3b   :  { %5723 = vmatpush3.bf16.msra.mxu1 %v6205_v27 }
 0xa3c   :  { %5724 = vmatprep.subr.bf16.mxu1 %v6206_v28 }
 0xa3f   :  { %5725 = vmatpush3.bf16.msra.mxu1 %v6206_v28 }
 0xa40   :  { %5726 = vmatprep.subr.bf16.mxu1 %v6207_v30 }
 0xa43   :  { %5727 = vmatpush3.bf16.msra.mxu1 %v6207_v30  ;;  %v6229_v30 = vld [vmem:[%s7235_s5 + $0x78] sm:$0xff]  }
 0xa46   :  { %5729 = vmatmul.mubr.bf16.vlgmr.msra.gmra.mxu1 %v7049_v32 }
 0xa47   :  { %5764 = vmatprep.mubr.msk.bf16.mxu1 %vm630_vm2, %v6218_v55 }
 0xae6   :  { %v5710_v33 = vpop.f32.mrf.mxu1 }
 0xae7   :  { %v2221_v34 = vadd.f32 %v5710_v33, %v2031_v7  ;;  %v6219_v7 = vld [vmem:[%s7235_s5 + $0x68] sm:$0xff]  }
 0xae8   :  { %v2204_v35 = vpop.f32.mrf.mxu1 }
 0xae9   :  { %v2219_v36 = vadd.f32 %v2204_v35, %v2029_v9  ;;  %v6222_v9 = vld [vmem:[#allocation2 + $0x1e8] sm:$0xff]   ;;  %v4980_v35 = vld [vmem:[#allocation7 + $0xb] ss:$0 sm:$0xff] }
 0xaea   :  { %v5711_v37 = vpop.f32.mrf.mxu1 }
 0xaeb   :  { %v2222_v38 = vadd.f32 %v5711_v37, %v2032_v11  ;;  %v6224_v11 = vld [vmem:[#allocation2 + $0x1d8] sm:$0xff]  }
 0xaec   :  { %v2207_v39 = vpop.f32.mrf.mxu1 }
 0xaed   :  { %v2220_v40 = vadd.f32 %v2207_v39, %v2030_v13  ;;  %v6226_v13 = vld [vmem:[#allocation2 + $0x1c8] sm:$0xff]  }
 0xb06   :  { %v5730_v41 = vpop.f32.mrf.mxu1 }
 0xb08   :  { %v2327_v42 = vpop.f32.mrf.mxu1 }
 0xb0a   :  { %v5731_v43 = vpop.f32.mrf.mxu1 }
 0xb0b   :  { %v2343_v44 = vpack.c.bf16 %v5731_v43, %v5730_v41 }
 0xb0c   :  { %v2330_v45 = vpop.f32.mrf.mxu1 }
 0xb0d   :  { %v2342_v46 = vpack.c.bf16 %v2330_v45, %v2327_v42  ;;  %5732 = vmatprep.subr.bf16.mxu0 %v2343_v44 }
 0xb0e   :  { %5733 = vmatpush3.bf16.msra.mxu0 %v2343_v44 }
 0xb0f   :  { %5734 = vmatprep.subr.bf16.mxu0 %v2342_v46 }
 0xb12   :  { %5735 = vmatpush3.bf16.msra.mxu0 %v2342_v46 }
 0xb13   :  { %5740 = vmatprep.subr.bf16.mxu0 %v6210_v47 }
 0xb15   :  { %5737 = vmatmul.mubr.msk.bf16.vlgmr.msra.gmra.mxu0 %vm630_vm2, %v6209_v48 }
 0xb16   :  { %5741 = vmatpush3.bf16.msra.mxu0 %v6210_v47  ;;  %5756 = vmatprep.mubr.bf16.mxu0 %v7046_v21 }
 0xb17   :  { %5742 = vmatprep.subr.bf16.mxu0 %v6211_v49 }
 0xb1a   :  { %5743 = vmatpush3.bf16.msra.mxu0 %v6211_v49 }
 0xb1b   :  { %5744 = vmatprep.subr.bf16.mxu0 %v6212_v50 }
 0xb1e   :  { %5745 = vmatpush3.bf16.msra.mxu0 %v6212_v50 }
 0xb1f   :  { %5746 = vmatprep.subr.bf16.mxu0 %v6213_v51 }
 0xb22   :  { %5747 = vmatpush3.bf16.msra.mxu0 %v6213_v51 }
 0xb23   :  { %5748 = vmatprep.subr.bf16.mxu0 %v6214_v52 }
 0xb26   :  { %5749 = vmatpush3.bf16.msra.mxu0 %v6214_v52 }
 0xb27   :  { %5750 = vmatprep.subr.bf16.mxu0 %v6215_v53 }
 0xb2a   :  { %5751 = vmatpush3.bf16.msra.mxu0 %v6215_v53 }
 0xb2b   :  { %5752 = vmatprep.subr.bf16.mxu0 %v6216_v54 }
 0xb2e   :  { %5753 = vmatpush3.bf16.msra.mxu0 %v6216_v54 }
 0xb2f   :  { %5754 = vmatprep.subr.bf16.mxu0 %v6217_v1 }
 0xb32   :  { %5755 = vmatpush3.bf16.msra.mxu0 %v6217_v1 }
 0xb35   :  { %5757 = vmatmul.mubr.bf16.vlgmr.msra.gmra.mxu0 %v7049_v32 }
 0xbd5   :  { %v5738_v56 = vpop.f32.mrf.mxu0 }
 0xbd6   :  { %v2411_v57 = vadd.f32 %v5738_v56, %v2221_v34 }
 0xbd7   :  { %v2394_v29 = vpop.f32.mrf.mxu0 }
 0xbd8   :  { %v2409_v58 = vadd.f32 %v2394_v29, %v2219_v36 }
 0xbd9   :  { %v5739_v59 = vpop.f32.mrf.mxu0 }
 0xbda   :  { %v2412_v60 = vadd.f32 %v5739_v59, %v2222_v38 }
 0xbdb   :  { %v2397_v61 = vpop.f32.mrf.mxu0 }
 0xbdc   :  { %v2410_v62 = vadd.f32 %v2397_v61, %v2220_v40 }
 0xbf5   :  { %v5758_v63 = vpop.f32.mrf.mxu0 }
 0xbf7   :  { %v2517_v0 = vpop.f32.mrf.mxu0 }
 0xbf9   :  { %v5759_v2 = vpop.f32.mrf.mxu0 }
 0xbfa   :  { %v2533_v3 = vpack.c.bf16 %v5759_v2, %v5758_v63 }
 0xbfb   :  { %v2520_v4 = vpop.f32.mrf.mxu0 }
 0xbfc   :  { %v2532_v5 = vpack.c.bf16 %v2520_v4, %v2517_v0  ;;  %5760 = vmatprep.subr.bf16.mxu1 %v2533_v3 }
 0xbfd   :  { %5761 = vmatpush3.bf16.msra.mxu1 %v2533_v3 }
 0xbfe   :  { %5762 = vmatprep.subr.bf16.mxu1 %v2532_v5 }
 0xc01   :  { %5763 = vmatpush3.bf16.msra.mxu1 %v2532_v5 }
 0xc02   :  { %5768 = vmatprep.subr.bf16.mxu1 %v6220_v6 }
 0xc04   :  { %5765 = vmatmul.mubr.msk.bf16.vlgmr.msra.gmra.mxu1 %vm630_vm2, %v6219_v7 }
 0xc05   :  { %5769 = vmatpush3.bf16.msra.mxu1 %v6220_v6  ;;  %5784 = vmatprep.mubr.bf16.mxu1 %v7046_v21  ;;  %v6228_v21 = vld [vmem:[%s7235_s5 + $0x70] sm:$0xff]  }
 0xc06   :  { %5770 = vmatprep.subr.bf16.mxu1 %v6221_v8  ;;  %5792 = vmatprep.mubr.msk.bf16.mxu0 %vm630_vm2, %v6228_v21 }
 0xc09   :  { %5771 = vmatpush3.bf16.msra.mxu1 %v6221_v8 }
 0xc0a   :  { %5772 = vmatprep.subr.bf16.mxu1 %v6222_v9 }
 0xc0d   :  { %5773 = vmatpush3.bf16.msra.mxu1 %v6222_v9 }
 0xc0e   :  { %5774 = vmatprep.subr.bf16.mxu1 %v6223_v10 }
 0xc11   :  { %5775 = vmatpush3.bf16.msra.mxu1 %v6223_v10 }
 0xc12   :  { %5776 = vmatprep.subr.bf16.mxu1 %v6224_v11 }
 0xc15   :  { %5777 = vmatpush3.bf16.msra.mxu1 %v6224_v11 }
 0xc16   :  { %5778 = vmatprep.subr.bf16.mxu1 %v6225_v12 }
 0xc19   :  { %5779 = vmatpush3.bf16.msra.mxu1 %v6225_v12 }
 0xc1a   :  { %5780 = vmatprep.subr.bf16.mxu1 %v6226_v13 }
 0xc1d   :  { %5781 = vmatpush3.bf16.msra.mxu1 %v6226_v13 }
 0xc1e   :  { %5782 = vmatprep.subr.bf16.mxu1 %v6227_v14 }
 0xc21   :  { %5783 = vmatpush3.bf16.msra.mxu1 %v6227_v14 }
 0xc24   :  { %5785 = vmatmul.mubr.bf16.vlgmr.msra.gmra.mxu1 %v7049_v32 }
 0xcc4   :  { %v5766_v15 = vpop.f32.mrf.mxu1 }
 0xcc5   :  { %v2601_v16 = vadd.f32 %v5766_v15, %v2411_v57 }
 0xcc6   :  { %v2584_v17 = vpop.f32.mrf.mxu1 }
 0xcc7   :  { %v2599_v18 = vadd.f32 %v2584_v17, %v2409_v58 }
 0xcc8   :  { %v5767_v19 = vpop.f32.mrf.mxu1 }
 0xcc9   :  { %v2602_v20 = vadd.f32 %v5767_v19, %v2412_v60 }
 0xcca   :  { %v2587_v22 = vpop.f32.mrf.mxu1 }
 0xccb   :  { %v2600_v23 = vadd.f32 %v2587_v22, %v2410_v62 }
 0xce4   :  { %v5786_v24 = vpop.f32.mrf.mxu1 }
 0xce6   :  { %v2707_v25 = vpop.f32.mrf.mxu1 }
 0xce8   :  { %v5787_v26 = vpop.f32.mrf.mxu1 }
 0xce9   :  { %v2723_v27 = vpack.c.bf16 %v5787_v26, %v5786_v24 }
 0xcea   :  { %v2710_v28 = vpop.f32.mrf.mxu1 }
 0xceb   :  { %v2722_v32 = vpack.c.bf16 %v2710_v28, %v2707_v25  ;;  %5788 = vmatprep.subr.bf16.mxu0 %v2723_v27 }
 0xcec   :  { %5789 = vmatpush3.bf16.msra.mxu0 %v2723_v27 }
 0xced   :  { %5790 = vmatprep.subr.bf16.mxu0 %v2722_v32 }
 0xcf0   :  { %5791 = vmatpush3.bf16.msra.mxu0 %v2722_v32 }
 0xcf3   :  { %5793 = vmatmul.mubr.msk.bf16.vlgmr.msra.gmra.mxu0 %vm630_vm2, %v6229_v30 }
 0xdb3   :  { %v5794_v33 = vpop.f32.mrf.mxu0 }
 0xdb4   :  { %v2791_v34 = vadd.f32 %v5794_v33, %v2601_v16 }
 0xdb5   :  { %v2774_v36 = vpop.f32.mrf.mxu0 }
 0xdb6   :  { %v2799_v37 = vmul.f32 %v4979_v31, %v2791_v34  ;;  %v2789_v38 = vadd.f32 %v2774_v36, %v2599_v18 }
 0xdb7   :  { %v5795_v39 = vpop.f32.mrf.mxu0 }
 0xdb8   :  { %v2807_v40 = vadd.f32 %v4980_v35, %v2799_v37  ;;  %v2797_v41 = vmul.f32 %v4979_v31, %v2789_v38  ;;  %v2792_v42 = vadd.f32 %v5795_v39, %v2602_v20 }
 0xdb9   :  { %v2777_v43 = vpop.f32.mrf.mxu0 }
 0xdba   :  { %v2811_v44 = vmax.f32 %v2807_v40, 0.0  ;;  %v2805_v45 = vadd.f32 %v4980_v35, %v2797_v41  ;;  %v2800_v46 = vmul.f32 %v4979_v31, %v2792_v42  ;;  %v2790_v47 = vadd.f32 %v2777_v43, %v2600_v23 }
 0xdbc   :  { %v2809_v48 = vmax.f32 %v2805_v45, 0.0  ;;  %v2808_v49 = vadd.f32 %v4980_v35, %v2800_v46  ;;  %v2798_v50 = vmul.f32 %v4979_v31, %v2790_v47 }
 0xdbe   :  { %v2812_v51 = vmax.f32 %v2808_v49, 0.0  ;;  %v2806_v52 = vadd.f32 %v4980_v35, %v2798_v50 }
 0xdc0   :  { %v2810_v53 = vmax.f32 %v2806_v52, 0.0 }
 0xdc1   :  { %6604 = dma.done.wait [#allocation4 + $0x1], 8192 }
 0xdc2   :  { %6605 = vsyncadd [#allocation4 + $0x1], 4294959104  ;;  %v7132_v54 = vpack.c.bf16 %v2810_v53, %v2809_v48  ;;  %v6230_v1 = vld [vmem:[#allocation3 + $0x38] sm:$0xff]   ;;  %v6231_v55 = vld [vmem:[#allocation3 + $0x30] sm:$0xff]   ;;  %v7135_v62 = vpack.c.bf16 %v2812_v51, %v2811_v44 }
 0xdc3   :  { %5796 = vmatprep.subr.bf16.mxu0 %v6230_v1  ;;  %v6232_v56 = vld [vmem:[#allocation3 + $0x28] sm:$0xff]   ;;  %v6233_v57 = vld [vmem:[#allocation3 + $0x20] sm:$0xff]   ;;  %v6234_v29 = vld [vmem:[#allocation3 + $0x18] sm:$0xff]  }
 0xdc4   :  { %5812 = vmatprep.mubr.bf16.mxu0 %v7132_v54  ;;  %5797 = vmatpush3.bf16.msra.mxu0 %v6230_v1  ;;  %v6235_v58 = vld [vmem:[#allocation3 + $0x10] sm:$0xff]   ;;  %v6236_v59 = vld [vmem:[#allocation3 + $0x8] sm:$0xff]   ;;  %v6237_v60 = vld [vmem:[#allocation3] sm:$0xff]  }
 0xdc5   :  { %5798 = vmatprep.subr.bf16.mxu0 %v6231_v55  ;;  %v6238_v61 = vld [vmem:[#allocation3 + $0x78] sm:$0xff]   ;;  %v6239_v63 = vld [vmem:[#allocation3 + $0x70] sm:$0xff]   ;;  %v6240_v0 = vld [vmem:[#allocation3 + $0x68] sm:$0xff]  }
 0xdc6   :  { %v6241_v2 = vld [vmem:[#allocation3 + $0x60] sm:$0xff]   ;;  %v6242_v3 = vld [vmem:[#allocation3 + $0x58] sm:$0xff]   ;;  %v6243_v4 = vld [vmem:[#allocation3 + $0x50] sm:$0xff]  }
 0xdc7   :  { %v6244_v5 = vld [vmem:[#allocation3 + $0x48] sm:$0xff]   ;;  %v6245_v6 = vld [vmem:[#allocation3 + $0x40] sm:$0xff]   ;;  %v6248_v14 = vld [vmem:[#allocation18 + $0x38] sm:$0xff]  }
 0xdc8   :  { %5799 = vmatpush3.bf16.msra.mxu0 %v6231_v55  ;;  %v6246_v7 = vld [vmem:[%s7235_s5] sm:$0xff]   ;;  %v6247_v21 = vld [vmem:[%s7235_s5 + $0x8] sm:$0xff]   ;;  %v6249_v15 = vld [vmem:[#allocation18 + $0x30] sm:$0xff]  }
 0xdc9   :  { %5800 = vmatprep.subr.bf16.mxu0 %v6232_v56  ;;  %5820 = vmatprep.mubr.msk.bf16.mxu1 %vm630_vm2, %v6246_v7  ;;  %v6250_v16 = vld [vmem:[#allocation18 + $0x28] sm:$0xff]   ;;  %v6251_v17 = vld [vmem:[#allocation18 + $0x20] sm:$0xff]   ;;  %v6252_v18 = vld [vmem:[#allocation18 + $0x18] sm:$0xff]  }
 0xdca   :  { %v6253_v19 = vld [vmem:[#allocation18 + $0x10] sm:$0xff]   ;;  %v6254_v22 = vld [vmem:[#allocation18 + $0x8] sm:$0xff]   ;;  %v6255_v24 = vld [vmem:[#allocation18] sm:$0xff]  }
 0xdcb   :  { %v6256_v28 = vld [vmem:[%s7235_s5 + $0x10] sm:$0xff]   ;;  %v6258_v30 = vld [vmem:[#allocation3 + $0xb8] sm:$0xff]   ;;  %v6260_v34 = vld [vmem:[#allocation3 + $0xa8] sm:$0xff]  }
 0xdcc   :  { %5801 = vmatpush3.bf16.msra.mxu0 %v6232_v56  ;;  %v6257_v31 = vld [vmem:[%s7235_s5 + $0x18] sm:$0xff]   ;;  %v6259_v33 = vld [vmem:[#allocation3 + $0xb0] sm:$0xff]   ;;  %v6261_v35 = vld [vmem:[#allocation3 + $0xa0] sm:$0xff]  }
 0xdcd   :  { %5802 = vmatprep.subr.bf16.mxu0 %v6233_v57  ;;  %v6262_v36 = vld [vmem:[#allocation3 + $0x98] sm:$0xff]   ;;  %v6263_v37 = vld [vmem:[#allocation3 + $0x90] sm:$0xff]   ;;  %v6264_v38 = vld [vmem:[#allocation3 + $0x88] sm:$0xff]  }
 0xdce   :  { %v6265_v39 = vld [vmem:[#allocation3 + $0x80] sm:$0xff]   ;;  %v6270_v7 = vld [vmem:[#allocation3 + $0xe8] sm:$0xff]  }
 0xdcf   :  { %v6266_v40 = vld [vmem:[%s7235_s5 + $0x20] sm:$0xff]  }
 0xdd0   :  { %5803 = vmatpush3.bf16.msra.mxu0 %v6233_v57 }
 0xdd1   :  { %5804 = vmatprep.subr.bf16.mxu0 %v6234_v29 }
 0xdd4   :  { %5805 = vmatpush3.bf16.msra.mxu0 %v6234_v29 }
 0xdd5   :  { %5806 = vmatprep.subr.bf16.mxu0 %v6235_v58 }
 0xdd8   :  { %5807 = vmatpush3.bf16.msra.mxu0 %v6235_v58 }
 0xdd9   :  { %5808 = vmatprep.subr.bf16.mxu0 %v6236_v59 }
 0xddc   :  { %5809 = vmatpush3.bf16.msra.mxu0 %v6236_v59 }
 0xddd   :  { %5810 = vmatprep.subr.bf16.mxu0 %v6237_v60 }
 0xde0   :  { %5811 = vmatpush3.bf16.msra.mxu0 %v6237_v60 }
 0xde1   :  { %5844 = vmatprep.subr.bf16.mxu0 %v6238_v61 }
 0xde3   :  { %5813 = vmatmul.mubr.bf16.vlgmr.msra.gmra.mxu0 %v7135_v62 }
 0xde4   :  { %5845 = vmatpush3.bf16.msra.mxu0 %v6238_v61  ;;  %5860 = vmatprep.mubr.bf16.mxu0 %v7132_v54 }
 0xde5   :  { %5846 = vmatprep.subr.bf16.mxu0 %v6239_v63 }
 0xde8   :  { %5847 = vmatpush3.bf16.msra.mxu0 %v6239_v63 }
 0xde9   :  { %5848 = vmatprep.subr.bf16.mxu0 %v6240_v0 }
 0xdec   :  { %5849 = vmatpush3.bf16.msra.mxu0 %v6240_v0 }
 0xded   :  { %5850 = vmatprep.subr.bf16.mxu0 %v6241_v2 }
 0xdf0   :  { %5851 = vmatpush3.bf16.msra.mxu0 %v6241_v2 }
 0xdf1   :  { %5852 = vmatprep.subr.bf16.mxu0 %v6242_v3 }
 0xdf4   :  { %5853 = vmatpush3.bf16.msra.mxu0 %v6242_v3 }
 0xdf5   :  { %5854 = vmatprep.subr.bf16.mxu0 %v6243_v4 }
 0xdf8   :  { %5855 = vmatpush3.bf16.msra.mxu0 %v6243_v4  ;;  %v6268_v4 = vld [vmem:[#allocation3 + $0xf8] sm:$0xff]  }
 0xdf9   :  { %5856 = vmatprep.subr.bf16.mxu0 %v6244_v5 }
 0xdfc   :  { %5857 = vmatpush3.bf16.msra.mxu0 %v6244_v5  ;;  %v6267_v5 = vld [vmem:[%s7235_s5 + $0x28] sm:$0xff]  }
 0xdfd   :  { %5858 = vmatprep.subr.bf16.mxu0 %v6245_v6 }
 0xe00   :  { %5859 = vmatpush3.bf16.msra.mxu0 %v6245_v6  ;;  %v6269_v6 = vld [vmem:[#allocation3 + $0xf0] sm:$0xff]  }
 0xe03   :  { %5861 = vmatmul.mubr.bf16.vlgmr.msra.gmra.mxu0 %v7135_v62 }
 0xe04   :  { %5896 = vmatprep.mubr.msk.bf16.mxu0 %vm630_vm2, %v6266_v40 }
 0xea3   :  { %v5814_v8 = vpop.f32.mrf.mxu0 }
 0xea5   :  { %v2937_v9 = vpop.f32.mrf.mxu0 }
 0xea7   :  { %v5815_v10 = vpop.f32.mrf.mxu0 }
 0xea8   :  { %v2953_v11 = vpack.c.bf16 %v5815_v10, %v5814_v8  ;;  %v6271_v8 = vld [vmem:[#allocation3 + $0xe0] sm:$0xff]   ;;  %v6273_v10 = vld [vmem:[#allocation3 + $0xd0] sm:$0xff]  }
 0xea9   :  { %v2940_v12 = vpop.f32.mrf.mxu0 }
 0xeaa   :  { %v2952_v13 = vpack.c.bf16 %v2940_v12, %v2937_v9  ;;  %5816 = vmatprep.subr.bf16.mxu1 %v2953_v11  ;;  %v6272_v9 = vld [vmem:[#allocation3 + $0xd8] sm:$0xff]   ;;  %v6275_v12 = vld [vmem:[#allocation3 + $0xc0] sm:$0xff]  }
 0xeab   :  { %5817 = vmatpush3.bf16.msra.mxu1 %v2953_v11  ;;  %v6274_v11 = vld [vmem:[#allocation3 + $0xc8] sm:$0xff]  }
 0xeac   :  { %5818 = vmatprep.subr.bf16.mxu1 %v2952_v13 }
 0xeaf   :  { %5819 = vmatpush3.bf16.msra.mxu1 %v2952_v13  ;;  %v6276_v13 = vld [vmem:[%s7235_s5 + $0x30] sm:$0xff]  }
 0xeb0   :  { %5824 = vmatprep.subr.bf16.mxu1 %v6248_v14 }
 0xeb2   :  { %5821 = vmatmul.mubr.msk.bf16.vlgmr.msra.gmra.mxu1 %vm630_vm2, %v6247_v21 }
 0xeb3   :  { %5825 = vmatpush3.bf16.msra.mxu1 %v6248_v14  ;;  %5840 = vmatprep.mubr.bf16.mxu1 %v7132_v54 }
 0xeb4   :  { %5826 = vmatprep.subr.bf16.mxu1 %v6249_v15 }
 0xeb7   :  { %5827 = vmatpush3.bf16.msra.mxu1 %v6249_v15 }
 0xeb8   :  { %5828 = vmatprep.subr.bf16.mxu1 %v6250_v16 }
 0xebb   :  { %5829 = vmatpush3.bf16.msra.mxu1 %v6250_v16 }
 0xebc   :  { %5830 = vmatprep.subr.bf16.mxu1 %v6251_v17 }
 0xebf   :  { %5831 = vmatpush3.bf16.msra.mxu1 %v6251_v17 }
 0xec0   :  { %5832 = vmatprep.subr.bf16.mxu1 %v6252_v18 }
 0xec3   :  { %5833 = vmatpush3.bf16.msra.mxu1 %v6252_v18  ;;  %v5862_v20 = vpop.f32.mrf.mxu0 }
 0xec4   :  { %5834 = vmatprep.subr.bf16.mxu1 %v6253_v19 }
 0xec5   :  { %v3219_v23 = vpop.f32.mrf.mxu0 }
 0xec7   :  { %5835 = vmatpush3.bf16.msra.mxu1 %v6253_v19  ;;  %v5863_v25 = vpop.f32.mrf.mxu0 }
 0xec8   :  { %5836 = vmatprep.subr.bf16.mxu1 %v6254_v22  ;;  %v3235_v26 = vpack.c.bf16 %v5863_v25, %v5862_v20 }
 0xec9   :  { %v3222_v27 = vpop.f32.mrf.mxu0 }
 0xeca   :  { %v3234_v32 = vpack.c.bf16 %v3222_v27, %v3219_v23 }
 0xecb   :  { %5837 = vmatpush3.bf16.msra.mxu1 %v6254_v22 }
 0xecc   :  { %5838 = vmatprep.subr.bf16.mxu1 %v6255_v24 }
 0xecf   :  { %5839 = vmatpush3.bf16.msra.mxu1 %v6255_v24 }
 0xed0   :  { %5864 = vmatprep.subr.bf16.mxu1 %v3235_v26 }
 0xed2   :  { %5841 = vmatmul.mubr.bf16.vlgmr.msra.gmra.mxu1 %v7135_v62 }
 0xed3   :  { %5865 = vmatpush3.bf16.msra.mxu1 %v3235_v26  ;;  %5868 = vmatprep.mubr.msk.bf16.mxu1 %vm630_vm2, %v6256_v28  ;;  %v6278_v28 = vld [vmem:[#allocation3 + $0x138] sm:$0xff]  }
 0xed4   :  { %5866 = vmatprep.subr.bf16.mxu1 %v3234_v32 }
 0xed7   :  { %5867 = vmatpush3.bf16.msra.mxu1 %v3234_v32  ;;  %v6277_v32 = vld [vmem:[%s7235_s5 + $0x38] sm:$0xff]  }
 0xed8   :  { %5872 = vmatprep.subr.bf16.mxu1 %v6258_v30 }
 0xeda   :  { %5869 = vmatmul.mubr.msk.bf16.vlgmr.msra.gmra.mxu1 %vm630_vm2, %v6257_v31  ;;  %v6280_v31 = vld [vmem:[#allocation3 + $0x128] sm:$0xff]  }
 0xedb   :  { %5873 = vmatpush3.bf16.msra.mxu1 %v6258_v30  ;;  %5888 = vmatprep.mubr.bf16.mxu1 %v7132_v54  ;;  %v6279_v30 = vld [vmem:[#allocation3 + $0x130] sm:$0xff]  }
 0xedc   :  { %5874 = vmatprep.subr.bf16.mxu1 %v6259_v33 }
 0xedf   :  { %5875 = vmatpush3.bf16.msra.mxu1 %v6259_v33  ;;  %v6281_v33 = vld [vmem:[#allocation3 + $0x120] sm:$0xff]  }
 0xee0   :  { %5876 = vmatprep.subr.bf16.mxu1 %v6260_v34 }
 0xee3   :  { %5877 = vmatpush3.bf16.msra.mxu1 %v6260_v34  ;;  %v6282_v34 = vld [vmem:[#allocation3 + $0x118] sm:$0xff]  }
 0xee4   :  { %5878 = vmatprep.subr.bf16.mxu1 %v6261_v35 }
 0xee7   :  { %5879 = vmatpush3.bf16.msra.mxu1 %v6261_v35  ;;  %v6283_v35 = vld [vmem:[#allocation3 + $0x110] sm:$0xff]  }
 0xee8   :  { %5880 = vmatprep.subr.bf16.mxu1 %v6262_v36 }
 0xeeb   :  { %5881 = vmatpush3.bf16.msra.mxu1 %v6262_v36  ;;  %v6284_v36 = vld [vmem:[#allocation3 + $0x108] sm:$0xff]  }
 0xeec   :  { %5882 = vmatprep.subr.bf16.mxu1 %v6263_v37 }
 0xeef   :  { %5883 = vmatpush3.bf16.msra.mxu1 %v6263_v37  ;;  %v6285_v37 = vld [vmem:[#allocation3 + $0x100] sm:$0xff]  }
 0xef0   :  { %5884 = vmatprep.subr.bf16.mxu1 %v6264_v38 }
 0xef3   :  { %5885 = vmatpush3.bf16.msra.mxu1 %v6264_v38  ;;  %v6286_v38 = vld [vmem:[%s7235_s5 + $0x40] sm:$0xff]  }
 0xef4   :  { %5886 = vmatprep.subr.bf16.mxu1 %v6265_v39 }
 0xef7   :  { %5887 = vmatpush3.bf16.msra.mxu1 %v6265_v39 }
 0xefa   :  { %5889 = vmatmul.mubr.bf16.vlgmr.msra.gmra.mxu1 %v7135_v62 }
 0xefb   :  { %5924 = vmatprep.mubr.msk.bf16.mxu1 %vm630_vm2, %v6276_v13 }
 0xf72   :  { %v5822_v41 = vpop.f32.mrf.mxu1 }
 0xf74   :  { %v3004_v42 = vpop.f32.mrf.mxu1 }
 0xf76   :  { %v5823_v43 = vpop.f32.mrf.mxu1 }
 0xf78   :  { %v3007_v44 = vpop.f32.mrf.mxu1 }
 0xf92   :  { %v5842_v45 = vpop.f32.mrf.mxu1 }
 0xf93   :  { %v3110_v46 = vadd.f32 %v5842_v45, %v5822_v41 }
 0xf94   :  { %v3101_v47 = vpop.f32.mrf.mxu1 }
 0xf95   :  { %v3102_v48 = vadd.f32 %v3101_v47, %v3004_v42 }
 0xf96   :  { %v5843_v49 = vpop.f32.mrf.mxu1 }
 0xf97   :  { %v3113_v50 = vadd.f32 %v5843_v49, %v5823_v43 }
 0xf98   :  { %v3104_v51 = vpop.f32.mrf.mxu1 }
 0xf99   :  { %v3105_v52 = vadd.f32 %v3104_v51, %v3007_v44 }
 0xf9a   :  { %v5870_v53 = vpop.f32.mrf.mxu1 }
 0xf9b   :  { %v3303_v1 = vadd.f32 %v5870_v53, %v3110_v46  ;;  %v6288_v53 = vld [vmem:[#allocation3 + $0x178] sm:$0xff]  }
 0xf9c   :  { %v3286_v55 = vpop.f32.mrf.mxu1 }
 0xf9d   :  { %v3301_v56 = vadd.f32 %v3286_v55, %v3102_v48  ;;  %v6289_v55 = vld [vmem:[#allocation3 + $0x170] sm:$0xff]  }
 0xf9e   :  { %v5871_v57 = vpop.f32.mrf.mxu1 }
 0xf9f   :  { %v3304_v29 = vadd.f32 %v5871_v57, %v3113_v50  ;;  %v6291_v57 = vld [vmem:[#allocation3 + $0x160] sm:$0xff]  }
 0xfa0   :  { %v3289_v58 = vpop.f32.mrf.mxu1 }
 0xfa1   :  { %v3302_v59 = vadd.f32 %v3289_v58, %v3105_v52  ;;  %v6293_v58 = vld [vmem:[#allocation3 + $0x150] sm:$0xff]  }
 0xfba   :  { %v5890_v60 = vpop.f32.mrf.mxu1 }
 0xfbc   :  { %v3408_v61 = vpop.f32.mrf.mxu1 }
 0xfbe   :  { %v5891_v63 = vpop.f32.mrf.mxu1 }
 0xfbf   :  { %v3424_v0 = vpack.c.bf16 %v5891_v63, %v5890_v60  ;;  %v6295_v60 = vld [vmem:[#allocation3 + $0x140] sm:$0xff]  }
 0xfc0   :  { %v3411_v2 = vpop.f32.mrf.mxu1 }
 0xfc1   :  { %v3423_v3 = vpack.c.bf16 %v3411_v2, %v3408_v61  ;;  %5892 = vmatprep.subr.bf16.mxu0 %v3424_v0  ;;  %v6296_v61 = vld [vmem:[%s7235_s5 + $0x50] sm:$0xff]  }
 0xfc2   :  { %5893 = vmatpush3.bf16.msra.mxu0 %v3424_v0 }
 0xfc3   :  { %5894 = vmatprep.subr.bf16.mxu0 %v3423_v3 }
 0xfc6   :  { %5895 = vmatpush3.bf16.msra.mxu0 %v3423_v3 }
 0xfc7   :  { %5900 = vmatprep.subr.bf16.mxu0 %v6268_v4 }
 0xfc9   :  { %5897 = vmatmul.mubr.msk.bf16.vlgmr.msra.gmra.mxu0 %vm630_vm2, %v6267_v5 }
 0xfca   :  { %5901 = vmatpush3.bf16.msra.mxu0 %v6268_v4  ;;  %5916 = vmatprep.mubr.bf16.mxu0 %v7132_v54 }
 0xfcb   :  { %5902 = vmatprep.subr.bf16.mxu0 %v6269_v6 }
 0xfce   :  { %5903 = vmatpush3.bf16.msra.mxu0 %v6269_v6 }
 0xfcf   :  { %5904 = vmatprep.subr.bf16.mxu0 %v6270_v7 }
 0xfd2   :  { %5905 = vmatpush3.bf16.msra.mxu0 %v6270_v7 }
 0xfd3   :  { %5906 = vmatprep.subr.bf16.mxu0 %v6271_v8 }
 0xfd6   :  { %5907 = vmatpush3.bf16.msra.mxu0 %v6271_v8 }
 0xfd7   :  { %5908 = vmatprep.subr.bf16.mxu0 %v6272_v9 }
 0xfda   :  { %5909 = vmatpush3.bf16.msra.mxu0 %v6272_v9 }
 0xfdb   :  { %5910 = vmatprep.subr.bf16.mxu0 %v6273_v10 }
 0xfde   :  { %5911 = vmatpush3.bf16.msra.mxu0 %v6273_v10 }
 0xfdf   :  { %5912 = vmatprep.subr.bf16.mxu0 %v6274_v11 }
 0xfe2   :  { %5913 = vmatpush3.bf16.msra.mxu0 %v6274_v11 }
 0xfe3   :  { %5914 = vmatprep.subr.bf16.mxu0 %v6275_v12 }
 0xfe6   :  { %5915 = vmatpush3.bf16.msra.mxu0 %v6275_v12 }
 0xfe9   :  { %5917 = vmatmul.mubr.bf16.vlgmr.msra.gmra.mxu0 %v7135_v62 }
 0xfea   :  { %5952 = vmatprep.mubr.msk.bf16.mxu0 %vm630_vm2, %v6286_v38 }
0x1089   :  { %v5898_v14 = vpop.f32.mrf.mxu0 }
0x108a   :  { %v3492_v21 = vadd.f32 %v5898_v14, %v3303_v1  ;;  %v6287_v1 = vld [vmem:[%s7235_s5 + $0x48] sm:$0xff]   ;;  %v6298_v14 = vld [vmem:[#allocation3 + $0x1b8] sm:$0xff]  }
0x108b   :  { %v3475_v15 = vpop.f32.mrf.mxu0 }
0x108c   :  { %v3490_v16 = vadd.f32 %v3475_v15, %v3301_v56  ;;  %v6290_v56 = vld [vmem:[#allocation3 + $0x168] sm:$0xff]   ;;  %v6299_v15 = vld [vmem:[#allocation3 + $0x1b0] sm:$0xff]  }
0x108d   :  { %v5899_v17 = vpop.f32.mrf.mxu0 }
0x108e   :  { %v3493_v18 = vadd.f32 %v5899_v17, %v3304_v29  ;;  %v6292_v29 = vld [vmem:[#allocation3 + $0x158] sm:$0xff]   ;;  %v6301_v17 = vld [vmem:[#allocation3 + $0x1a0] sm:$0xff]  }
0x108f   :  { %v3478_v19 = vpop.f32.mrf.mxu0 }
0x1090   :  { %v3491_v20 = vadd.f32 %v3478_v19, %v3302_v59  ;;  %v6294_v59 = vld [vmem:[#allocation3 + $0x148] sm:$0xff]   ;;  %v6303_v19 = vld [vmem:[#allocation3 + $0x190] sm:$0xff]  }
0x10a9   :  { %v5918_v22 = vpop.f32.mrf.mxu0 }
0x10ab   :  { %v3597_v23 = vpop.f32.mrf.mxu0 }
0x10ad   :  { %v5919_v24 = vpop.f32.mrf.mxu0 }
0x10ae   :  { %v3613_v25 = vpack.c.bf16 %v5919_v24, %v5918_v22  ;;  %v6305_v22 = vld [vmem:[#allocation3 + $0x180] sm:$0xff]  }
0x10af   :  { %v3600_v26 = vpop.f32.mrf.mxu0 }
0x10b0   :  { %v3612_v27 = vpack.c.bf16 %v3600_v26, %v3597_v23  ;;  %5920 = vmatprep.subr.bf16.mxu1 %v3613_v25  ;;  %v6306_v23 = vld [vmem:[%s7235_s5 + $0x60] sm:$0xff]  }
0x10b1   :  { %5921 = vmatpush3.bf16.msra.mxu1 %v3613_v25 }
0x10b2   :  { %5922 = vmatprep.subr.bf16.mxu1 %v3612_v27 }
0x10b5   :  { %5923 = vmatpush3.bf16.msra.mxu1 %v3612_v27 }
0x10b6   :  { %5928 = vmatprep.subr.bf16.mxu1 %v6278_v28 }
0x10b8   :  { %5925 = vmatmul.mubr.msk.bf16.vlgmr.msra.gmra.mxu1 %vm630_vm2, %v6277_v32 }
0x10b9   :  { %5929 = vmatpush3.bf16.msra.mxu1 %v6278_v28  ;;  %5944 = vmatprep.mubr.bf16.mxu1 %v7132_v54 }
0x10ba   :  { %5930 = vmatprep.subr.bf16.mxu1 %v6279_v30 }
0x10bd   :  { %5931 = vmatpush3.bf16.msra.mxu1 %v6279_v30 }
0x10be   :  { %5932 = vmatprep.subr.bf16.mxu1 %v6280_v31 }
0x10c1   :  { %5933 = vmatpush3.bf16.msra.mxu1 %v6280_v31 }
0x10c2   :  { %5934 = vmatprep.subr.bf16.mxu1 %v6281_v33 }
0x10c5   :  { %5935 = vmatpush3.bf16.msra.mxu1 %v6281_v33 }
0x10c6   :  { %5936 = vmatprep.subr.bf16.mxu1 %v6282_v34 }
0x10c9   :  { %5937 = vmatpush3.bf16.msra.mxu1 %v6282_v34 }
0x10ca   :  { %5938 = vmatprep.subr.bf16.mxu1 %v6283_v35 }
0x10cd   :  { %5939 = vmatpush3.bf16.msra.mxu1 %v6283_v35 }
0x10ce   :  { %5940 = vmatprep.subr.bf16.mxu1 %v6284_v36 }
0x10d1   :  { %5941 = vmatpush3.bf16.msra.mxu1 %v6284_v36 }
0x10d2   :  { %5942 = vmatprep.subr.bf16.mxu1 %v6285_v37 }
0x10d5   :  { %5943 = vmatpush3.bf16.msra.mxu1 %v6285_v37 }
0x10d8   :  { %5945 = vmatmul.mubr.bf16.vlgmr.msra.gmra.mxu1 %v7135_v62 }
0x10d9   :  { %5980 = vmatprep.mubr.msk.bf16.mxu1 %vm630_vm2, %v6296_v61  ;;  %v6317_v61 = vld [vmem:[%s7235_s5 + $0x78] sm:$0xff]  }
0x1178   :  { %v5926_v39 = vpop.f32.mrf.mxu1 }
0x1179   :  { %v3681_v40 = vadd.f32 %v5926_v39, %v3492_v21  ;;  %v6297_v21 = vld [vmem:[%s7235_s5 + $0x58] sm:$0xff]  }
0x117a   :  { %v3664_v41 = vpop.f32.mrf.mxu1  ;;  %v6308_v39 = vld [vmem:[#allocation3 + $0x1f8] sm:$0xff]  }
0x117b   :  { %v3679_v42 = vadd.f32 %v3664_v41, %v3490_v16  ;;  %v6300_v16 = vld [vmem:[#allocation3 + $0x1a8] sm:$0xff]   ;;  %v6309_v41 = vld [vmem:[#allocation3 + $0x1f0] sm:$0xff]  }
0x117c   :  { %v5927_v43 = vpop.f32.mrf.mxu1 }
0x117d   :  { %v3682_v44 = vadd.f32 %v5927_v43, %v3493_v18  ;;  %v6302_v18 = vld [vmem:[#allocation3 + $0x198] sm:$0xff]   ;;  %v6311_v43 = vld [vmem:[#allocation3 + $0x1e0] sm:$0xff]  }
0x117e   :  { %v3667_v45 = vpop.f32.mrf.mxu1 }
0x117f   :  { %v3680_v46 = vadd.f32 %v3667_v45, %v3491_v20  ;;  %v6304_v20 = vld [vmem:[#allocation3 + $0x188] sm:$0xff]   ;;  %v6313_v45 = vld [vmem:[#allocation3 + $0x1d0] sm:$0xff]  }
0x1198   :  { %v5946_v47 = vpop.f32.mrf.mxu1 }
0x119a   :  { %v3786_v48 = vpop.f32.mrf.mxu1 }
0x119c   :  { %v5947_v49 = vpop.f32.mrf.mxu1 }
0x119d   :  { %v3802_v50 = vpack.c.bf16 %v5947_v49, %v5946_v47  ;;  %v6315_v47 = vld [vmem:[#allocation3 + $0x1c0] sm:$0xff]  }
0x119e   :  { %v3789_v51 = vpop.f32.mrf.mxu1 }
0x119f   :  { %v3801_v52 = vpack.c.bf16 %v3789_v51, %v3786_v48  ;;  %5948 = vmatprep.subr.bf16.mxu0 %v3802_v50 }
0x11a0   :  { %5949 = vmatpush3.bf16.msra.mxu0 %v3802_v50 }
0x11a1   :  { %5950 = vmatprep.subr.bf16.mxu0 %v3801_v52 }
0x11a4   :  { %5951 = vmatpush3.bf16.msra.mxu0 %v3801_v52 }
0x11a5   :  { %5956 = vmatprep.subr.bf16.mxu0 %v6288_v53 }
0x11a7   :  { %5953 = vmatmul.mubr.msk.bf16.vlgmr.msra.gmra.mxu0 %vm630_vm2, %v6287_v1 }
0x11a8   :  { %5957 = vmatpush3.bf16.msra.mxu0 %v6288_v53  ;;  %5972 = vmatprep.mubr.bf16.mxu0 %v7132_v54 }
0x11a9   :  { %5958 = vmatprep.subr.bf16.mxu0 %v6289_v55 }
0x11ac   :  { %5959 = vmatpush3.bf16.msra.mxu0 %v6289_v55 }
0x11ad   :  { %5960 = vmatprep.subr.bf16.mxu0 %v6290_v56 }
0x11b0   :  { %5961 = vmatpush3.bf16.msra.mxu0 %v6290_v56 }
0x11b1   :  { %5962 = vmatprep.subr.bf16.mxu0 %v6291_v57 }
0x11b4   :  { %5963 = vmatpush3.bf16.msra.mxu0 %v6291_v57 }
0x11b5   :  { %5964 = vmatprep.subr.bf16.mxu0 %v6292_v29 }
0x11b8   :  { %5965 = vmatpush3.bf16.msra.mxu0 %v6292_v29 }
0x11b9   :  { %5966 = vmatprep.subr.bf16.mxu0 %v6293_v58 }
0x11bc   :  { %5967 = vmatpush3.bf16.msra.mxu0 %v6293_v58 }
0x11bd   :  { %5968 = vmatprep.subr.bf16.mxu0 %v6294_v59 }
0x11c0   :  { %5969 = vmatpush3.bf16.msra.mxu0 %v6294_v59 }
0x11c1   :  { %5970 = vmatprep.subr.bf16.mxu0 %v6295_v60 }
0x11c4   :  { %5971 = vmatpush3.bf16.msra.mxu0 %v6295_v60  ;;  %v6318_v60 = vld [vmem:[#allocation19 + $0x38] sm:$0xff]  }
0x11c7   :  { %5973 = vmatmul.mubr.bf16.vlgmr.msra.gmra.mxu0 %v7135_v62 }
0x11c8   :  { %6008 = vmatprep.mubr.msk.bf16.mxu0 %vm630_vm2, %v6306_v23 }
0x1267   :  { %v5954_v63 = vpop.f32.mrf.mxu0 }
0x1268   :  { %v3870_v0 = vadd.f32 %v5954_v63, %v3681_v40  ;;  %v6307_v40 = vld [vmem:[%s7235_s5 + $0x68] sm:$0xff]   ;;  %v6319_v63 = vld [vmem:[#allocation19 + $0x30] sm:$0xff]  }
0x1269   :  { %v3853_v2 = vpop.f32.mrf.mxu0 }
0x126a   :  { %v3868_v3 = vadd.f32 %v3853_v2, %v3679_v42  ;;  %v6310_v42 = vld [vmem:[#allocation3 + $0x1e8] sm:$0xff]   ;;  %v6321_v2 = vld [vmem:[#allocation19 + $0x20] sm:$0xff]  }
0x126b   :  { %v5955_v4 = vpop.f32.mrf.mxu0 }
0x126c   :  { %v3871_v5 = vadd.f32 %v5955_v4, %v3682_v44  ;;  %v6312_v44 = vld [vmem:[#allocation3 + $0x1d8] sm:$0xff]   ;;  %v6323_v4 = vld [vmem:[#allocation19 + $0x10] sm:$0xff]  }
0x126d   :  { %v3856_v6 = vpop.f32.mrf.mxu0 }
0x126e   :  { %v3869_v7 = vadd.f32 %v3856_v6, %v3680_v46  ;;  %v6314_v46 = vld [vmem:[#allocation3 + $0x1c8] sm:$0xff]   ;;  %v6325_v6 = vld [vmem:[#allocation19] sm:$0xff]  }
0x1287   :  { %v5974_v8 = vpop.f32.mrf.mxu0 }
0x1289   :  { %v3975_v9 = vpop.f32.mrf.mxu0 }
0x128b   :  { %v5975_v10 = vpop.f32.mrf.mxu0 }
0x128c   :  { %v3991_v11 = vpack.c.bf16 %v5975_v10, %v5974_v8  ;;  %v6327_v8 = vld [vmem:[#allocation21 + $0x30] sm:$0xff]   ;;  %v6329_v10 = vld [vmem:[#allocation21 + $0x20] sm:$0xff]  }
0x128d   :  { %v3978_v12 = vpop.f32.mrf.mxu0 }
0x128e   :  { %v3990_v13 = vpack.c.bf16 %v3978_v12, %v3975_v9  ;;  %5976 = vmatprep.subr.bf16.mxu1 %v3991_v11  ;;  %v6328_v9 = vld [vmem:[#allocation21 + $0x28] sm:$0xff]  }
0x128f   :  { %5977 = vmatpush3.bf16.msra.mxu1 %v3991_v11  ;;  %v5113_v11 = vld [vmem:[#allocation7 + $0xc] ss:$0 sm:$0xff] }
0x1290   :  { %5978 = vmatprep.subr.bf16.mxu1 %v3990_v13 }
0x1293   :  { %5979 = vmatpush3.bf16.msra.mxu1 %v3990_v13 }
0x1294   :  { %5984 = vmatprep.subr.bf16.mxu1 %v6298_v14 }
0x1296   :  { %5981 = vmatmul.mubr.msk.bf16.vlgmr.msra.gmra.mxu1 %vm630_vm2, %v6297_v21 }
0x1297   :  { %5985 = vmatpush3.bf16.msra.mxu1 %v6298_v14  ;;  %6000 = vmatprep.mubr.bf16.mxu1 %v7132_v54 }
0x1298   :  { %5986 = vmatprep.subr.bf16.mxu1 %v6299_v15 }
0x129b   :  { %5987 = vmatpush3.bf16.msra.mxu1 %v6299_v15 }
0x129c   :  { %5988 = vmatprep.subr.bf16.mxu1 %v6300_v16 }
0x129f   :  { %5989 = vmatpush3.bf16.msra.mxu1 %v6300_v16  ;;  %v5114_v16 = vld [vmem:[#allocation7 + $0xd] ss:$0 sm:$0xff] }
0x12a0   :  { %5990 = vmatprep.subr.bf16.mxu1 %v6301_v17 }
0x12a3   :  { %5991 = vmatpush3.bf16.msra.mxu1 %v6301_v17 }
0x12a4   :  { %5992 = vmatprep.subr.bf16.mxu1 %v6302_v18 }
0x12a7   :  { %5993 = vmatpush3.bf16.msra.mxu1 %v6302_v18 }
0x12a8   :  { %5994 = vmatprep.subr.bf16.mxu1 %v6303_v19 }
0x12ab   :  { %5995 = vmatpush3.bf16.msra.mxu1 %v6303_v19 }
0x12ac   :  { %5996 = vmatprep.subr.bf16.mxu1 %v6304_v20 }
0x12af   :  { %5997 = vmatpush3.bf16.msra.mxu1 %v6304_v20 }
0x12b0   :  { %5998 = vmatprep.subr.bf16.mxu1 %v6305_v22 }
0x12b3   :  { %5999 = vmatpush3.bf16.msra.mxu1 %v6305_v22 }
0x12b6   :  { %6001 = vmatmul.mubr.bf16.vlgmr.msra.gmra.mxu1 %v7135_v62 }
0x1356   :  { %v5982_v24 = vpop.f32.mrf.mxu1 }
0x1357   :  { %v4059_v25 = vadd.f32 %v5982_v24, %v3870_v0  ;;  %v6320_v0 = vld [vmem:[#allocation19 + $0x28] sm:$0xff]  }
0x1358   :  { %v4042_v26 = vpop.f32.mrf.mxu1 }
0x1359   :  { %v4057_v27 = vadd.f32 %v4042_v26, %v3868_v3  ;;  %v6322_v3 = vld [vmem:[#allocation19 + $0x18] sm:$0xff]  }
0x135a   :  { %v5983_v28 = vpop.f32.mrf.mxu1 }
0x135b   :  { %v4060_v32 = vadd.f32 %v5983_v28, %v3871_v5  ;;  %v6324_v5 = vld [vmem:[#allocation19 + $0x8] sm:$0xff]  }
0x135c   :  { %v4045_v30 = vpop.f32.mrf.mxu1 }
0x135d   :  { %v4058_v31 = vadd.f32 %v4045_v30, %v3869_v7  ;;  %v6326_v7 = vld [vmem:[#allocation21 + $0x38] sm:$0xff]  }
0x1376   :  { %v6002_v33 = vpop.f32.mrf.mxu1 }
0x1378   :  { %v4164_v34 = vpop.f32.mrf.mxu1 }
0x137a   :  { %v6003_v35 = vpop.f32.mrf.mxu1 }
0x137b   :  { %v4180_v36 = vpack.c.bf16 %v6003_v35, %v6002_v33 }
0x137c   :  { %v4167_v37 = vpop.f32.mrf.mxu1 }
0x137d   :  { %v4179_v38 = vpack.c.bf16 %v4167_v37, %v4164_v34  ;;  %6004 = vmatprep.subr.bf16.mxu0 %v4180_v36  ;;  %v6331_v37 = vld [vmem:[#allocation21 + $0x10] sm:$0xff]  }
0x137e   :  { %6005 = vmatpush3.bf16.msra.mxu0 %v4180_v36  ;;  %v6330_v36 = vld [vmem:[#allocation21 + $0x18] sm:$0xff]  }
0x137f   :  { %6006 = vmatprep.subr.bf16.mxu0 %v4179_v38 }
0x1382   :  { %6007 = vmatpush3.bf16.msra.mxu0 %v4179_v38  ;;  %v6332_v38 = vld [vmem:[#allocation21 + $0x8] sm:$0xff]  }
0x1383   :  { %6012 = vmatprep.subr.bf16.mxu0 %v6308_v39 }
0x1385   :  { %6009 = vmatmul.mubr.msk.bf16.vlgmr.msra.gmra.mxu0 %vm630_vm2, %v6307_v40 }
0x1386   :  { %6013 = vmatpush3.bf16.msra.mxu0 %v6308_v39  ;;  %6028 = vmatprep.mubr.bf16.mxu0 %v7132_v54  ;;  %v6316_v54 = vld [vmem:[%s7235_s5 + $0x70] sm:$0xff]   ;;  %v6333_v39 = vld [vmem:[#allocation21] sm:$0xff]  }
0x1387   :  { %6014 = vmatprep.subr.bf16.mxu0 %v6309_v41  ;;  %6036 = vmatprep.mubr.msk.bf16.mxu1 %vm630_vm2, %v6316_v54 }
0x138a   :  { %6015 = vmatpush3.bf16.msra.mxu0 %v6309_v41  ;;  %v5123_v41 = vld [vmem:[#allocation7 + $0xe] ss:$0 sm:$0xff] }
0x138b   :  { %6016 = vmatprep.subr.bf16.mxu0 %v6310_v42 }
0x138e   :  { %6017 = vmatpush3.bf16.msra.mxu0 %v6310_v42 }
0x138f   :  { %6018 = vmatprep.subr.bf16.mxu0 %v6311_v43 }
0x1392   :  { %6019 = vmatpush3.bf16.msra.mxu0 %v6311_v43 }
0x1393   :  { %6020 = vmatprep.subr.bf16.mxu0 %v6312_v44 }
0x1396   :  { %6021 = vmatpush3.bf16.msra.mxu0 %v6312_v44 }
0x1397   :  { %6022 = vmatprep.subr.bf16.mxu0 %v6313_v45 }
0x139a   :  { %6023 = vmatpush3.bf16.msra.mxu0 %v6313_v45 }
0x139b   :  { %6024 = vmatprep.subr.bf16.mxu0 %v6314_v46 }
0x139e   :  { %6025 = vmatpush3.bf16.msra.mxu0 %v6314_v46  ;;  %v5124_v46 = vld [vmem:[#allocation7 + $0xf] ss:$0 sm:$0xff] }
0x139f   :  { %6026 = vmatprep.subr.bf16.mxu0 %v6315_v47 }
0x13a2   :  { %6027 = vmatpush3.bf16.msra.mxu0 %v6315_v47 }
0x13a3   :  { %6060 = vmatprep.subr.bf16.mxu0 %v6326_v7 }
0x13a5   :  { %6029 = vmatmul.mubr.bf16.vlgmr.msra.gmra.mxu0 %v7135_v62 }
0x13a6   :  { %6061 = vmatpush3.bf16.msra.mxu0 %v6326_v7 }
0x13a7   :  { %6062 = vmatprep.subr.bf16.mxu0 %v6327_v8 }
0x13aa   :  { %6063 = vmatpush3.bf16.msra.mxu0 %v6327_v8 }
0x13ab   :  { %6064 = vmatprep.subr.bf16.mxu0 %v6328_v9 }
0x13ae   :  { %6065 = vmatpush3.bf16.msra.mxu0 %v6328_v9 }
0x13af   :  { %6066 = vmatprep.subr.bf16.mxu0 %v6329_v10 }
0x13b2   :  { %6067 = vmatpush3.bf16.msra.mxu0 %v6329_v10 }
0x13b3   :  { %6068 = vmatprep.subr.bf16.mxu0 %v6330_v36 }
0x13b6   :  { %6069 = vmatpush3.bf16.msra.mxu0 %v6330_v36 }
0x13b7   :  { %6070 = vmatprep.subr.bf16.mxu0 %v6331_v37 }
0x13ba   :  { %6071 = vmatpush3.bf16.msra.mxu0 %v6331_v37 }
0x13bb   :  { %6072 = vmatprep.subr.bf16.mxu0 %v6332_v38 }
0x13be   :  { %6073 = vmatpush3.bf16.msra.mxu0 %v6332_v38 }
0x13bf   :  { %6074 = vmatprep.subr.bf16.mxu0 %v6333_v39 }
0x13c2   :  { %6075 = vmatpush3.bf16.msra.mxu0 %v6333_v39 }
0x1445   :  { %v6010_v48 = vpop.f32.mrf.mxu0 }
0x1446   :  { %v4248_v49 = vadd.f32 %v6010_v48, %v4059_v25 }
0x1447   :  { %v4231_v50 = vpop.f32.mrf.mxu0 }
0x1448   :  { %v4246_v51 = vadd.f32 %v4231_v50, %v4057_v27 }
0x1449   :  { %v6011_v52 = vpop.f32.mrf.mxu0 }
0x144a   :  { %v4249_v53 = vadd.f32 %v6011_v52, %v4060_v32 }
0x144b   :  { %v4234_v1 = vpop.f32.mrf.mxu0 }
0x144c   :  { %v4247_v55 = vadd.f32 %v4234_v1, %v4058_v31 }
0x1465   :  { %v6030_v56 = vpop.f32.mrf.mxu0 }
0x1467   :  { %v4353_v57 = vpop.f32.mrf.mxu0 }
0x1469   :  { %v6031_v29 = vpop.f32.mrf.mxu0 }
0x146a   :  { %v4369_v58 = vpack.c.bf16 %v6031_v29, %v6030_v56 }
0x146b   :  { %v4356_v59 = vpop.f32.mrf.mxu0 }
0x146c   :  { %v4368_v62 = vpack.c.bf16 %v4356_v59, %v4353_v57  ;;  %6032 = vmatprep.subr.bf16.mxu1 %v4369_v58 }
0x146d   :  { %6033 = vmatpush3.bf16.msra.mxu1 %v4369_v58  ;;  %v5125_v58 = vld [vmem:[#allocation7 + $0x10] ss:$0 sm:$0xff] }
0x146e   :  { %6034 = vmatprep.subr.bf16.mxu1 %v4368_v62 }
0x1471   :  { %6035 = vmatpush3.bf16.msra.mxu1 %v4368_v62 }
0x1472   :  { %6040 = vmatprep.subr.bf16.mxu1 %v6318_v60 }
0x1474   :  { %6037 = vmatmul.mubr.msk.bf16.vlgmr.msra.gmra.mxu1 %vm630_vm2, %v6317_v61 }
0x1475   :  { %6041 = vmatpush3.bf16.msra.mxu1 %v6318_v60 }
0x1476   :  { %6042 = vmatprep.subr.bf16.mxu1 %v6319_v63 }
0x1479   :  { %6043 = vmatpush3.bf16.msra.mxu1 %v6319_v63 }
0x147a   :  { %6044 = vmatprep.subr.bf16.mxu1 %v6320_v0 }
0x147d   :  { %6045 = vmatpush3.bf16.msra.mxu1 %v6320_v0 }
0x147e   :  { %6046 = vmatprep.subr.bf16.mxu1 %v6321_v2 }
0x1481   :  { %6047 = vmatpush3.bf16.msra.mxu1 %v6321_v2 }
0x1482   :  { %6048 = vmatprep.subr.bf16.mxu1 %v6322_v3 }
0x1485   :  { %6049 = vmatpush3.bf16.msra.mxu1 %v6322_v3 }
0x1486   :  { %6050 = vmatprep.subr.bf16.mxu1 %v6323_v4 }
0x1489   :  { %6051 = vmatpush3.bf16.msra.mxu1 %v6323_v4 }
0x148a   :  { %6052 = vmatprep.subr.bf16.mxu1 %v6324_v5 }
0x148d   :  { %6053 = vmatpush3.bf16.msra.mxu1 %v6324_v5 }
0x148e   :  { %6054 = vmatprep.subr.bf16.mxu1 %v6325_v6 }
0x1491   :  { %6055 = vmatpush3.bf16.msra.mxu1 %v6325_v6 }
0x1534   :  { %v6038_v12 = vpop.f32.mrf.mxu1 }
0x1535   :  { %v4437_v13 = vadd.f32 %v6038_v12, %v4248_v49 }
0x1536   :  { %v4420_v14 = vpop.f32.mrf.mxu1 }
0x1537   :  { %v4445_v21 = vmul.f32 %v5113_v11, %v4437_v13  ;;  %v4435_v15 = vadd.f32 %v4420_v14, %v4246_v51 }
0x1538   :  { %v6039_v17 = vpop.f32.mrf.mxu1 }
0x1539   :  { %v4443_v18 = vmul.f32 %v5113_v11, %v4435_v15  ;;  %v4438_v19 = vadd.f32 %v6039_v17, %v4249_v53  ;;  %v4453_v22 = vadd.f32 %v5114_v16, %v4445_v21 }
0x153a   :  { %v4423_v20 = vpop.f32.mrf.mxu1 }
0x153b   :  { %v4446_v23 = vmul.f32 %v5113_v11, %v4438_v19  ;;  %v4436_v24 = vadd.f32 %v4423_v20, %v4247_v55  ;;  %v4451_v25 = vadd.f32 %v5114_v16, %v4443_v18  ;;  %v4457_v28 = vmax.f32 %v4453_v22, 0.0 }
0x153d   :  { %v4454_v26 = vadd.f32 %v5114_v16, %v4446_v23  ;;  %v4444_v27 = vmul.f32 %v5113_v11, %v4436_v24  ;;  %v4455_v31 = vmax.f32 %v4451_v25, 0.0 }
0x153f   :  { %v4458_v32 = vmax.f32 %v4454_v26, 0.0  ;;  %v4452_v30 = vadd.f32 %v5114_v16, %v4444_v27 }
0x1541   :  { %v4476_v33 = vpack.c.bf16 %v4458_v32, %v4457_v28  ;;  %v4456_v34 = vmax.f32 %v4452_v30, 0.0 }
0x1543   :  { %v4475_v35 = vpack.c.bf16 %v4456_v34, %v4455_v31 }
0x1545   :  { %6056 = vmatprep.mubr.bf16.mxu1 %v4475_v35 }
0x1546   :  { %6057 = vmatmul.mubr.bf16.vlgmr.msra.gmra.mxu1 %v4476_v33 }
0x1606   :  { %v6058_v40 = vpop.f32.mrf.mxu1 }
0x1607   :  { %v4581_v44 = vmul.f32 %v6058_v40, %v5123_v41 }
0x1608   :  { %v4559_v42 = vpop.f32.mrf.mxu1 }
0x1609   :  { %v4579_v43 = vmul.f32 %v5123_v41, %v4559_v42  ;;  %v4590_v51 = vadd.f32 %v5124_v46, %v4581_v44 }
0x160a   :  { %v6059_v45 = vpop.f32.mrf.mxu1 }
0x160b   :  { %v4582_v47 = vmul.f32 %v6059_v45, %v5123_v41  ;;  %v4588_v48 = vadd.f32 %v5124_v46, %v4579_v43  ;;  %v4594_v56 = vmax.f32 %v4590_v51, 0.0 }
0x160c   :  { %v4562_v54 = vpop.f32.mrf.mxu1 }
0x160d   :  { %v4591_v49 = vadd.f32 %v5124_v46, %v4582_v47  ;;  %v4580_v50 = vmul.f32 %v5123_v41, %v4562_v54  ;;  %v4592_v1 = vmax.f32 %v4588_v48, 0.0 }
0x160f   :  { %v4589_v52 = vadd.f32 %v5124_v46, %v4580_v50  ;;  %v4595_v53 = vmax.f32 %v4591_v49, 0.0 }
0x1611   :  { %v4593_v55 = vmax.f32 %v4589_v52, 0.0  ;;  %v4613_v29 = vpack.c.bf16 %v4595_v53, %v4594_v56 }
0x1613   :  { %v4612_v57 = vpack.c.bf16 %v4593_v55, %v4592_v1 }
0x1615   :  { %6076 = vmatprep.mubr.bf16.mxu0 %v4612_v57 }
0x1616   :  { %6077 = vmatmul.mubr.bf16.vlgmr.msra.gmra.mxu0 %v4613_v29 }
0x16d6   :  { %v6078_v59 = vpop.f32.mrf.mxu0 }
0x16d7   :  { %v4710_v62 = vadd.f32 %v6078_v59, %v5125_v58 }
0x16d8   :  { %v4701_v60 = vpop.f32.mrf.mxu0 }
0x16d9   :  { %v4702_v61 = vadd.f32 %v5125_v58, %v4701_v60  ;;  %4720 = vmax.xlane.f32.xlu1 %v4710_v62 }
0x16da   :  { %v6079_v63 = vpop.f32.mrf.mxu0 }
0x16db   :  { %v4713_v0 = vadd.f32 %v6079_v63, %v5125_v58  ;;  %4716 = vmax.xlane.f32.xlu0 %v4702_v61 }
0x16dc   :  { %v4704_v2 = vpop.f32.mrf.mxu0 }
0x16dd   :  { %v4705_v3 = vadd.f32 %v5125_v58, %v4704_v2  ;;  %4722 = vmax.xlane.f32.xlu1 %v4713_v0 }
0x16df   :  { %4718 = vmax.xlane.f32.xlu0 %v4705_v3 }
0x1762   :  { %v4721_v4 = vpop.xlane.xlu1 %4720 }
0x1763   :  { %v4726_v5 = vsub.f32 %v4710_v62, %v4721_v4 }
0x1764   :  { %v4717_v6 = vpop.xlane.xlu0 %4716 }
0x1765   :  { %v4724_v7 = vsub.f32 %v4702_v61, %v4717_v6  ;;  %v4732_v10 = vmul.f32 1.442695, %v4726_v5 }
0x1766   :  { %v4723_v8 = vpop.xlane.xlu1 %4722 }
0x1767   :  { %v4728_v9 = vmul.f32 1.442695, %v4724_v7  ;;  %v4727_v12 = vsub.f32 %v4713_v0, %v4723_v8 }
0x1768   :  { %v4719_v11 = vpop.xlane.xlu0 %4718 }
0x1769   :  { %6334 = vpow2.f32 %v4728_v9  ;;  %v4725_v13 = vsub.f32 %v4705_v3, %v4719_v11  ;;  %v4734_v21 = vmul.f32 1.442695, %v4727_v12 }
0x176a   :  { %6336 = vpow2.f32 %v4732_v10 }
0x176b   :  { %v4730_v14 = vmul.f32 1.442695, %v4725_v13 }
0x176d   :  { %6338 = vpow2.f32 %v4730_v14 }
0x176e   :  { %6340 = vpow2.f32 %v4734_v21 }
0x1776   :  { %v6335_v15 = vpop.eup %6334 }
0x1777   :  { %4736 = vadd.xlane.f32.xlu0 %v6335_v15  ;;  %v6337_v16 = vpop.eup %6336 }
0x177a   :  { %v6339_v17 = vpop.eup %6338 }
0x177b   :  { %4740 = vadd.xlane.f32.xlu0 %v6337_v16  ;;  %4738 = vadd.xlane.f32.xlu1 %v6339_v17  ;;  %v6341_v18 = vpop.eup %6340 }
0x177f   :  { %4742 = vadd.xlane.f32.xlu1 %v6341_v18 }
0x1800   :  { %v4737_v19 = vpop.xlane.xlu0 %4736 }
0x1801   :  { %6342 = vlog2.f32 %v4737_v19 }
0x1804   :  { %v4739_v20 = vpop.xlane.xlu1 %4738  ;;  %v4741_v22 = vpop.xlane.xlu0 %4740 }
0x1805   :  { %6344 = vlog2.f32 %v4739_v20 }
0x1806   :  { %6346 = vlog2.f32 %v4741_v22 }
0x1808   :  { %v4743_v23 = vpop.xlane.xlu1 %4742 }
0x1809   :  { %6348 = vlog2.f32 %v4743_v23 }
0x180e   :  { %v6343_v24 = vpop.eup %6342 }
0x180f   :  { %v4745_v25 = vmul.f32 0.6931472, %v6343_v24 }
0x1811   :  { %v4752_v26 = vsub.f32 %v4724_v7, %v4745_v25 }
0x1812   :  { %v6345_v27 = vpop.eup %6344 }
0x1813   :  { %v6347_v28 = vpop.eup %6346  ;;  %4756 = vst [vmem:[%s7248_s18] sm:$0xff] %v4752_v26  ;;  %v4747_v32 = vmul.f32 0.6931472, %v6345_v27 }
0x1814   :  { %v4749_v30 = vmul.f32 0.6931472, %v6347_v28 }
0x1815   :  { %v4753_v31 = vsub.f32 %v4725_v13, %v4747_v32 }
0x1816   :  { %v6349_v33 = vpop.eup %6348  ;;  %v4754_v34 = vsub.f32 %v4726_v5, %v4749_v30 }
0x1817   :  { %4757 = vst [vmem:[%s7248_s18 + $0x8] sm:$0xff] %v4753_v31  ;;  %v4751_v35 = vmul.f32 0.6931472, %v6349_v33 }
0x1818   :  { %4758 = vst [vmem:[%s7248_s18 + $0x10] sm:$0xff] %v4754_v34 }
0x1819   :  { %v4755_v36 = vsub.f32 %v4727_v12, %v4751_v35 }
0x181b   :  { %4759 = vst [vmem:[%s7248_s18 + $0x18] sm:$0xff] %v4755_v36 }
0x181c   :  { %4768 = vsyncpa [#allocation6], 1 }
0x181d   :  { %4769 = vsyncpa [#allocation8], 1 }
0x181e   :  { %4770 = vsyncpa [#allocation11], 1 }
0x181f   :  { %4771 = vsyncpa [#allocation14], 1 }
0x1820   :  { %4772 = vsyncpa [#allocation17], 1 }
0x1821   :  { %4773 = vsyncpa [#allocation20], 1 }
0x1822   :  { %4774 = vsyncmov [#allocation4] }
0x1825   :  { %s4775_s17 = vpop.sfrf %4774 }
0x1826   :  { %p5134_p4 = scmp.ne.s32.totalorder %s4775_s17, 0 }
0x1828   :  { %4779 = shalt.err (%p5134_p4)  }
0x1829   :  { %4781 = vsyncmov [#allocation4 + $0x1] }
0x182c   :  { %s4782_s27 = vpop.sfrf %4781 }
0x182d   :  { %p5135_p5 = scmp.ne.s32.totalorder %s4782_s27, 0 }
0x182f   :  { %4786 = shalt.err (%p5135_p5)  }

</bundles_post_ra>
